<compile_context>
chip_gen: v7x
topology: tpu7x:2x2x1
jax: 0.10.0
libtpu: 0.0.40
codegen_flags: <defaults>
</compile_context>

<pallas_src>
import functools

import numpy as np
import jax
import jax.numpy as jnp
from jax import lax
from jax.experimental import pallas as pl
from jax.experimental.pallas import tpu as pltpu

INPUT_DIM = 10            # torch: input_dim = 10
HIDDEN = 32               # torch: hidden_dim1 = 32
MLP_DIMS = [2 * HIDDEN, 512, 256, 2]
BN_EPS = 1e-5


def _vmem():
    return pl.BlockSpec(memory_space=pltpu.MemorySpace.VMEM)


# --------------------------------------------------------------------------
# Fully fused forward kernel
# --------------------------------------------------------------------------
def fused_tccnn_kernel(x_ref, xrev_ref, gamma_ref, beta_ref,
                       wx1a_ref, wx1b_ref, bx1_ref, wh1_ref,
                       wx2a_ref, wx2b_ref, bx2_ref, wh2_ref,
                       w1_ref, b1_ref, w2_ref, b2_ref, w3_ref, b3_ref,
                       o_ref,
                       gx1_ref, gx2_ref, s1_ref, s1r_ref,
                       *, b_real, unroll):
    T, B, D = x_ref.shape
    H = wh1_ref.shape[0] // 2          # 32
    G = wh1_ref.shape[1]               # 8H = 256 (both directions, gate-interleaved)

    # ---- BatchNorm1d stats (training-mode batch stats, matching the PyTorch
    # reference, which normalizes the zero-padded (B, 10, T) tensor).  Padded
    # batch rows are zero, so full-array sums divided by the real element count
    # give exact mean / E[x^2] without an unaligned sub-batch slice. ----
    x = x_ref[...]                                          # (T, B, D)
    xf = x.reshape(T * B, D)
    n = jnp.float32(T * b_real)
    mean = jnp.sum(xf, axis=0, keepdims=True) / n           # (1, D)
    ex2 = jnp.sum(xf * xf, axis=0, keepdims=True) / n       # (1, D)
    var = jnp.maximum(ex2 - mean * mean, 0.0)
    scale = gamma_ref[...] * lax.rsqrt(var + BN_EPS)        # (1, D)
    shift = beta_ref[...] - mean * scale                    # (1, D)

    # ---- fold BN into the layer-1 projection: xn @ W == x @ (diag(scale) @ W)
    # plus a bias term shift @ W.  diag(scale) is built with a (D, D) iota mask
    # so no lane->sublane transpose of the tiny scale vector is needed. ----
    rr = lax.broadcasted_iota(jnp.int32, (D, D), 0)
    cc = lax.broadcasted_iota(jnp.int32, (D, D), 1)
    dscale = jnp.where(rr == cc, jnp.broadcast_to(scale, (D, D)), 0.0)
    w1a = jnp.dot(dscale, wx1a_ref[...], preferred_element_type=jnp.float32)
    w1b = jnp.dot(dscale, wx1b_ref[...], preferred_element_type=jnp.float32)
    eff_b1 = bx1_ref[...] + jnp.dot(shift, wx1a_ref[...] + wx1b_ref[...],
                                    preferred_element_type=jnp.float32)

    # ---- layer-1 gate preactivations, hoisted out of the recurrence and
    # already direction-combined in processing order:
    #   gx1[t] = [fwd gates of time t | bwd gates of time T-1-t]
    # (wx1a is zero in bwd gate columns, wx1b zero in fwd gate columns). ----
    xrevf = xrev_ref[...].reshape(T * B, D)
    gx1_ref[...] = (jnp.dot(xf, w1a, preferred_element_type=jnp.float32)
                    + jnp.dot(xrevf, w1b, preferred_element_type=jnp.float32)
                    + eff_b1).reshape(T, B, G)

    wh1 = wh1_ref[...]                                      # (2H, 8H), block-diag per dir
    wh2 = wh2_ref[...]

    def cell(gates, c):
        # gate layout: [i_f i_b | f_f f_b | g_f g_b | o_f o_b]; state = [fwd | bwd]
        i = jax.nn.sigmoid(gates[:, 0:2 * H])
        f = jax.nn.sigmoid(gates[:, 2 * H:4 * H])
        g = jnp.tanh(gates[:, 4 * H:6 * H])
        o = jax.nn.sigmoid(gates[:, 6 * H:8 * H])
        c = f * c + i * g
        h = o * jnp.tanh(c)
        return h, c

    zero_state = jnp.zeros((B, 2 * H), jnp.float32)

    # ---- layer 1: fused forward+backward recurrence.  One gate-slice load,
    # one recurrent matmul, one 64-lane store per serial step. ----
    def step1(t, carry):
        h, c = carry
        gates = gx1_ref[pl.ds(t, 1), :, :][0] + jnp.dot(
            h, wh1, preferred_element_type=jnp.float32)
        h, c = cell(gates, c)
        s1_ref[pl.ds(t, 1), :, :] = h[None, :, :]
        return h, c

    lax.fori_loop(0, T, step1, (zero_state, zero_state), unroll=unroll)

    # ---- time-reverse the layer-1 hidden sequence once, off the critical
    # path (iterations are independent, so this pipelines freely). ----
    def rev_step(t, _):
        s1r_ref[pl.ds(T - 1 - t, 1), :, :] = s1_ref[pl.ds(t, 1), :, :]
        return 0

    lax.fori_loop(0, T, rev_step, 0, unroll=unroll)

    # ---- layer-2 gate preactivations, hoisted + direction-combined.
    #   s1[t]  = [h1_fwd(t)     | h1_bwd(T-1-t)]
    #   s1r[t] = [h1_fwd(T-1-t) | h1_bwd(t)    ]
    # wx2a keeps "same-direction" (input-row, gate-col) entries, wx2b the
    # complement, so gx2[t] = [fwd gates of time t | bwd gates of time T-1-t].
    gx2_ref[...] = (jnp.dot(s1_ref[...].reshape(T * B, 2 * H), wx2a_ref[...],
                            preferred_element_type=jnp.float32)
                    + jnp.dot(s1r_ref[...].reshape(T * B, 2 * H), wx2b_ref[...],
                              preferred_element_type=jnp.float32)
                    + bx2_ref[...]).reshape(T, B, G)

    # ---- layer 2: fused recurrence + running max over time (layer-2 output
    # sequence never materialized). ----
    def step2(t, carry):
        h, c, mx = carry
        gates = gx2_ref[pl.ds(t, 1), :, :][0] + jnp.dot(
            h, wh2, preferred_element_type=jnp.float32)
        h, c = cell(gates, c)
        return h, c, jnp.maximum(mx, h)

    neg_inf = jnp.full((B, 2 * H), -jnp.inf, jnp.float32)
    _, _, pooled = lax.fori_loop(0, T, step2, (zero_state, zero_state, neg_inf),
                                 unroll=unroll)

    # ---- MLP head [64, 512, 256, 2] with ReLU, then log_softmax ----
    h1 = jnp.maximum(jnp.dot(pooled, w1_ref[...],
                             preferred_element_type=jnp.float32) + b1_ref[...], 0.0)
    h2 = jnp.maximum(jnp.dot(h1, w2_ref[...],
                             preferred_element_type=jnp.float32) + b2_ref[...], 0.0)
    logits = jnp.dot(h2, w3_ref[...],
                     preferred_element_type=jnp.float32) + b3_ref[...]
    m = jnp.max(logits, axis=-1, keepdims=True)
    s = logits - m
    lse = jnp.log(jnp.sum(jnp.exp(s), axis=-1, keepdims=True))
    o_ref[...] = s - lse


# --------------------------------------------------------------------------
# get_input: group rows of voc_attr by batch id, pad, produce TIME-MAJOR
# (T, B_pad, D) with B padded to a multiple of 8 (sublane-friendly).
# --------------------------------------------------------------------------
def get_input(voc, batch):
    voc = np.asarray(voc, np.float32)
    batch = np.asarray(batch)
    start = [0]
    for i in range(1, len(batch)):
        if batch[i] != batch[i - 1]:
            start.append(i)
    segs = [voc[start[i]:start[i + 1]] for i in range(len(start) - 1)]
    segs.append(voc[start[-1]:])
    b_real = len(segs)
    max_len = max(s.shape[0] for s in segs)
    feature_dim = segs[0].shape[1]
    # TODO(synk): batching more graphs per call (B toward 128/256) would fill
    #             far more MXU rows in the (B,64)@(64,256) recurrent matmul.
    b_pad = max(8, ((b_real + 7) // 8) * 8)
    padded = np.zeros((max_len, b_pad, feature_dim), np.float32)
    for i, s in enumerate(segs):
        padded[:s.shape[0], i, :] = s
    return jnp.asarray(padded), b_real


# --------------------------------------------------------------------------
# Weight packing: PyTorch (4H, Din) per-direction weights -> gate-interleaved
# [i_f i_b | f_f f_b | g_f g_b | o_f o_b] combined matrices.
# --------------------------------------------------------------------------
def _combine_bidir(dir_f, dir_b, H):
    wih_f, whh_f, bih_f, bhh_f = dir_f
    wih_b, whh_b, bih_b, bhh_b = dir_b
    zeros_h = jnp.zeros((H, H), jnp.float32)
    wx_blocks, wh_blocks, b_blocks = [], [], []
    for k in range(4):                       # torch gate order: i, f, g, o
        sl = slice(k * H, (k + 1) * H)
        wx_blocks += [wih_f[sl].T, wih_b[sl].T]
        wh_blocks += [jnp.concatenate([whh_f[sl].T, zeros_h], axis=0),
                      jnp.concatenate([zeros_h, whh_b[sl].T], axis=0)]
        b_blocks += [(bih_f + bhh_f)[sl], (bih_b + bhh_b)[sl]]
    wx = jnp.concatenate(wx_blocks, axis=1)  # (Din, 8H)
    wh = jnp.concatenate(wh_blocks, axis=1)  # (2H, 8H)  block-diag per direction
    b = jnp.concatenate(b_blocks)[None, :]   # (1, 8H)
    return wx, b, wh


# --------------------------------------------------------------------------
# Parameter init (deterministic, synthetic, PyTorch-style shapes then packed)
# --------------------------------------------------------------------------
def init_params(key):
    def u(k, shape, bound):
        return jax.random.uniform(k, shape, jnp.float32, -bound, bound)

    params = {}
    params["bn_gamma"] = jnp.ones((1, INPUT_DIM), jnp.float32)
    params["bn_beta"] = jnp.zeros((1, INPUT_DIM), jnp.float32)

    bound = 1.0 / np.sqrt(HIDDEN)
    lstm = []
    for din in (INPUT_DIM, 2 * HIDDEN):                  # layer 0, layer 1 input dims
        dirs = []
        for _ in range(2):                               # forward, reverse
            key, k1, k2, k3, k4 = jax.random.split(key, 5)
            wih = u(k1, (4 * HIDDEN, din), bound)
            whh = u(k2, (4 * HIDDEN, HIDDEN), bound)
            bih = u(k3, (4 * HIDDEN,), bound)
            bhh = u(k4, (4 * HIDDEN,), bound)
            dirs.append((wih, whh, bih, bhh))
        lstm.append(_combine_bidir(dirs[0], dirs[1], HIDDEN))
    params["lstm"] = lstm

    mlp = []
    for din, dout in zip(MLP_DIMS[:-1], MLP_DIMS[1:]):
        key, kw, kb = jax.random.split(key, 3)
        bnd = 1.0 / np.sqrt(din)
        mlp.append((u(kw, (din, dout), bnd), u(kb, (1, dout), bnd)))
    params["mlp"] = mlp
    return params


# --------------------------------------------------------------------------
# Full forward (matches TCCNN.forward) — one fused pallas_call
# --------------------------------------------------------------------------
def tccnn_forward(voc_attr, batch, params):
    x, b_real = get_input(voc_attr, batch)                # (T, B_pad, 10) time-major
    x_rev = jnp.flip(x, axis=0)                           # time-reversed copy (XLA side)
    T, b_pad, D = x.shape
    H = HIDDEN
    G = 8 * H
    (wx1, bx1, wh1), (wx2, bx2, wh2) = params["lstm"]
    (w1, b1), (w2, b2), (w3, b3) = params["mlp"]

    # Direction-masked projection weights.  Gate columns are interleaved
    # [i_f i_b | f_f f_b | g_f g_b | o_f o_b]: fwd gate columns have
    # (col % 2H) < H.  Layer-2 input rows 0:H come from h1_fwd, H:2H from h1_bwd.
    fwd_col = jnp.asarray((np.arange(G) % (2 * H)) < H)   # (G,)
    wx1a = jnp.where(fwd_col[None, :], wx1, 0.0)          # layer-1, fwd gate cols only
    wx1b = jnp.where(fwd_col[None, :], 0.0, wx1)          # layer-1, bwd gate cols only
    row_fwd = jnp.asarray(np.arange(2 * H) < H)           # (2H,)
    same_dir = row_fwd[:, None] == fwd_col[None, :]
    wx2a = jnp.where(same_dir, wx2, 0.0)                  # same-direction entries
    wx2b = jnp.where(same_dir, 0.0, wx2)                  # cross-direction entries

    args = (x, x_rev, params["bn_gamma"], params["bn_beta"],
            wx1a, wx1b, bx1, wh1, wx2a, wx2b, bx2, wh2,
            w1, b1, w2, b2, w3, b3)

    unroll = int(max(1, min(8, T)))                       # bounded unroll (not full)

    flops = (2 * 2 * T * b_pad * D * G                    # layer-1 projection (2 masked mms)
             + 2 * 2 * T * b_pad * 2 * H * G              # layer-2 projection (2 masked mms)
             + 2 * 2 * T * b_pad * 2 * H * G              # recurrent matmuls, 2 layers
             + 2 * b_pad * (2 * H * 512 + 512 * 256 + 256 * 2))
    transcendentals = 2 * T * b_pad * 10 * H
    scratch_bytes = 4 * (2 * T * b_pad * G + 2 * T * b_pad * 2 * H)
    io_bytes = 4 * (sum(int(np.prod(a.shape)) for a in args) + b_pad * 2)
    vmem_limit = int(min(100 * 1024 * 1024,
                         max(32 * 1024 * 1024,
                             2 * (scratch_bytes + io_bytes) + (1 << 20))))

    out = pl.pallas_call(
        functools.partial(fused_tccnn_kernel, b_real=b_real, unroll=unroll),
        out_shape=jax.ShapeDtypeStruct((b_pad, 2), jnp.float32),
        in_specs=[_vmem()] * len(args),
        out_specs=_vmem(),
        scratch_shapes=[
            pltpu.VMEM((T, b_pad, G), jnp.float32),       # layer-1 combined input gates
            pltpu.VMEM((T, b_pad, G), jnp.float32),       # layer-2 combined input gates
            pltpu.VMEM((T, b_pad, 2 * H), jnp.float32),   # layer-1 hidden, processing order
            pltpu.VMEM((T, b_pad, 2 * H), jnp.float32),   # layer-1 hidden, time-reversed
        ],
        compiler_params=pltpu.CompilerParams(vmem_limit_bytes=vmem_limit),
        cost_estimate=pl.CostEstimate(flops=int(flops),
                                      transcendentals=int(transcendentals),
                                      bytes_accessed=int(io_bytes)),
    )(*args)
    return out[:b_real]                                   # (B, 2) log-probabilities


if __name__ == "__main__":
    key = jax.random.PRNGKey(0)
    k_data, k_params = jax.random.split(key)

    # synthetic point-cloud-style input: 20 rows of 10 features, 3 graphs
    batch_vec = np.array([0] * 7 + [1] * 5 + [2] * 8, dtype=np.int32)
    voc_attr = jax.random.normal(k_data, (batch_vec.shape[0], INPUT_DIM), jnp.float32)

    params = init_params(k_params)
    out = tccnn_forward(voc_attr, batch_vec, params)
    out = jax.block_until_ready(out)

    assert out.shape == (3, 2)
    assert bool(jnp.all(jnp.isfinite(out)))
    print("KERNEL_OK")
</pallas_src>

<mosaic_0001>
module attributes {stable_mosaic.version = 11 : i64} {
  func.func @fused_tccnn_kernel(%arg0: memref<8x8x10xf32, #tpu.memory_space<vmem>>, %arg1: memref<8x8x10xf32, #tpu.memory_space<vmem>>, %arg2: memref<1x10xf32, #tpu.memory_space<vmem>>, %arg3: memref<1x10xf32, #tpu.memory_space<vmem>>, %arg4: memref<10x256xf32, #tpu.memory_space<vmem>>, %arg5: memref<10x256xf32, #tpu.memory_space<vmem>>, %arg6: memref<1x256xf32, #tpu.memory_space<vmem>>, %arg7: memref<64x256xf32, #tpu.memory_space<vmem>>, %arg8: memref<64x256xf32, #tpu.memory_space<vmem>>, %arg9: memref<64x256xf32, #tpu.memory_space<vmem>>, %arg10: memref<1x256xf32, #tpu.memory_space<vmem>>, %arg11: memref<64x256xf32, #tpu.memory_space<vmem>>, %arg12: memref<64x512xf32, #tpu.memory_space<vmem>>, %arg13: memref<1x512xf32, #tpu.memory_space<vmem>>, %arg14: memref<512x256xf32, #tpu.memory_space<vmem>>, %arg15: memref<1x256xf32, #tpu.memory_space<vmem>>, %arg16: memref<256x2xf32, #tpu.memory_space<vmem>>, %arg17: memref<1x2xf32, #tpu.memory_space<vmem>>, %arg18: memref<8x2xf32, #tpu.memory_space<vmem>>, %arg19: memref<8x8x256xf32, #tpu.memory_space<vmem>>, %arg20: memref<8x8x256xf32, #tpu.memory_space<vmem>>, %arg21: memref<8x8x64xf32, #tpu.memory_space<vmem>>, %arg22: memref<8x8x64xf32, #tpu.memory_space<vmem>>) attributes {dimension_semantics = [], scalar_prefetch = 0 : i64, scratch_operands = 4 : i64, tpu.core_type = #tpu.core_type<tc>} {
    %c0 = arith.constant 0 : index
    %c0_0 = arith.constant 0 : index
    %c0_1 = arith.constant 0 : index
    %0 = vector.load %arg0[%c0, %c0_0, %c0_1] : memref<8x8x10xf32, #tpu.memory_space<vmem>>, vector<8x8x10xf32>
    %1 = vector.shape_cast %0 : vector<8x8x10xf32> to vector<64x10xf32>
    %cst = arith.constant dense<0.000000e+00> : vector<10xf32>
    %2 = vector.multi_reduction <add>, %1, %cst [0] : vector<64x10xf32> to vector<10xf32>
    %3 = vector.shape_cast %2 : vector<10xf32> to vector<1x10xf32>
    %cst_2 = arith.constant 2.400000e+01 : f32
    %4 = vector.broadcast %cst_2 : f32 to vector<1x10xf32>
    %5 = arith.divf %3, %4 : vector<1x10xf32>
    %6 = arith.mulf %1, %1 : vector<64x10xf32>
    %cst_3 = arith.constant dense<0.000000e+00> : vector<10xf32>
    %7 = vector.multi_reduction <add>, %6, %cst_3 [0] : vector<64x10xf32> to vector<10xf32>
    %8 = vector.shape_cast %7 : vector<10xf32> to vector<1x10xf32>
    %cst_4 = arith.constant 2.400000e+01 : f32
    %9 = vector.broadcast %cst_4 : f32 to vector<1x10xf32>
    %10 = arith.divf %8, %9 : vector<1x10xf32>
    %11 = arith.mulf %5, %5 : vector<1x10xf32>
    %12 = arith.subf %10, %11 : vector<1x10xf32>
    %cst_5 = arith.constant 0.000000e+00 : f32
    %13 = vector.broadcast %cst_5 : f32 to vector<1x10xf32>
    %14 = arith.maximumf %12, %13 : vector<1x10xf32>
    %c0_6 = arith.constant 0 : index
    %c0_7 = arith.constant 0 : index
    %15 = vector.load %arg2[%c0_6, %c0_7] : memref<1x10xf32, #tpu.memory_space<vmem>>, vector<1x10xf32>
    %cst_8 = arith.constant 9.99999974E-6 : f32
    %16 = vector.broadcast %cst_8 : f32 to vector<1x10xf32>
    %17 = arith.addf %14, %16 : vector<1x10xf32>
    %18 = math.rsqrt %17 : vector<1x10xf32>
    %19 = arith.mulf %15, %18 : vector<1x10xf32>
    %c0_9 = arith.constant 0 : index
    %c0_10 = arith.constant 0 : index
    %20 = vector.load %arg3[%c0_9, %c0_10] : memref<1x10xf32, #tpu.memory_space<vmem>>, vector<1x10xf32>
    %21 = arith.mulf %5, %19 : vector<1x10xf32>
    %22 = arith.subf %20, %21 : vector<1x10xf32>
    %23 = tpu.iota {dimensions = array<i32: 0>} : vector<10x10xi32>
    %24 = tpu.iota {dimensions = array<i32: 1>} : vector<10x10xi32>
    %25 = arith.cmpi eq, %23, %24 : vector<10x10xi32>
    %26 = vector.shape_cast %19 : vector<1x10xf32> to vector<1x10xf32>
    %27 = vector.broadcast %26 : vector<1x10xf32> to vector<10x10xf32>
    %cst_11 = arith.constant 0.000000e+00 : f32
    %28 = vector.broadcast %cst_11 : f32 to vector<10x10xf32>
    %29 = arith.select %25, %27, %28 : vector<10x10xi1>, vector<10x10xf32>
    %c0_12 = arith.constant 0 : index
    %c0_13 = arith.constant 0 : index
    %30 = vector.load %arg4[%c0_12, %c0_13] : memref<10x256xf32, #tpu.memory_space<vmem>>, vector<10x256xf32>
    %cst_14 = arith.constant dense<0.000000e+00> : vector<10x256xf32>
    %31 = tpu.matmul %29, %30, %cst_14 {dimension_numbers = #tpu.dot_dimension_numbers<[1], [0], [0], [1], [0, 0, 1, 1], [], []>} : vector<10x10xf32>, vector<10x256xf32>, vector<10x256xf32> -> vector<10x256xf32>
    %c0_15 = arith.constant 0 : index
    %c0_16 = arith.constant 0 : index
    %32 = vector.load %arg5[%c0_15, %c0_16] : memref<10x256xf32, #tpu.memory_space<vmem>>, vector<10x256xf32>
    %cst_17 = arith.constant dense<0.000000e+00> : vector<10x256xf32>
    %33 = tpu.matmul %29, %32, %cst_17 {dimension_numbers = #tpu.dot_dimension_numbers<[1], [0], [0], [1], [0, 0, 1, 1], [], []>} : vector<10x10xf32>, vector<10x256xf32>, vector<10x256xf32> -> vector<10x256xf32>
    %c0_18 = arith.constant 0 : index
    %c0_19 = arith.constant 0 : index
    %34 = vector.load %arg6[%c0_18, %c0_19] : memref<1x256xf32, #tpu.memory_space<vmem>>, vector<1x256xf32>
    %c0_20 = arith.constant 0 : index
    %c0_21 = arith.constant 0 : index
    %35 = vector.load %arg4[%c0_20, %c0_21] : memref<10x256xf32, #tpu.memory_space<vmem>>, vector<10x256xf32>
    %c0_22 = arith.constant 0 : index
    %c0_23 = arith.constant 0 : index
    %36 = vector.load %arg5[%c0_22, %c0_23] : memref<10x256xf32, #tpu.memory_space<vmem>>, vector<10x256xf32>
    %37 = arith.addf %35, %36 : vector<10x256xf32>
    %cst_24 = arith.constant dense<0.000000e+00> : vector<1x256xf32>
    %38 = tpu.matmul %22, %37, %cst_24 {dimension_numbers = #tpu.dot_dimension_numbers<[1], [0], [0], [1], [0, 0, 1, 1], [], []>} : vector<1x10xf32>, vector<10x256xf32>, vector<1x256xf32> -> vector<1x256xf32>
    %39 = arith.addf %34, %38 : vector<1x256xf32>
    %c0_25 = arith.constant 0 : index
    %c0_26 = arith.constant 0 : index
    %c0_27 = arith.constant 0 : index
    %40 = vector.load %arg1[%c0_25, %c0_26, %c0_27] : memref<8x8x10xf32, #tpu.memory_space<vmem>>, vector<8x8x10xf32>
    %41 = vector.shape_cast %40 : vector<8x8x10xf32> to vector<64x10xf32>
    %cst_28 = arith.constant dense<0.000000e+00> : vector<64x256xf32>
    %42 = tpu.matmul %1, %31, %cst_28 {dimension_numbers = #tpu.dot_dimension_numbers<[1], [0], [0], [1], [0, 0, 1, 1], [], []>} : vector<64x10xf32>, vector<10x256xf32>, vector<64x256xf32> -> vector<64x256xf32>
    %cst_29 = arith.constant dense<0.000000e+00> : vector<64x256xf32>
    %43 = tpu.matmul %41, %33, %cst_29 {dimension_numbers = #tpu.dot_dimension_numbers<[1], [0], [0], [1], [0, 0, 1, 1], [], []>} : vector<64x10xf32>, vector<10x256xf32>, vector<64x256xf32> -> vector<64x256xf32>
    %44 = arith.addf %42, %43 : vector<64x256xf32>
    %45 = vector.broadcast %39 : vector<1x256xf32> to vector<64x256xf32>
    %46 = arith.addf %44, %45 : vector<64x256xf32>
    %47 = vector.shape_cast %46 : vector<64x256xf32> to vector<8x8x256xf32>
    %c0_30 = arith.constant 0 : index
    %c0_31 = arith.constant 0 : index
    %c0_32 = arith.constant 0 : index
    %48 = vector.load %arg19[%c0_30, %c0_31, %c0_32] : memref<8x8x256xf32, #tpu.memory_space<vmem>>, vector<8x8x256xf32>
    tpu.vector_store %arg19[%c0_30, %c0_31, %c0_32], %47 {strides = array<i32>} : memref<8x8x256xf32, #tpu.memory_space<vmem>>, vector<8x8x256xf32>,
    %c0_33 = arith.constant 0 : index
    %c0_34 = arith.constant 0 : index
    %49 = vector.load %arg7[%c0_33, %c0_34] : memref<64x256xf32, #tpu.memory_space<vmem>>, vector<64x256xf32>
    %c0_35 = arith.constant 0 : index
    %c0_36 = arith.constant 0 : index
    %50 = vector.load %arg11[%c0_35, %c0_36] : memref<64x256xf32, #tpu.memory_space<vmem>>, vector<64x256xf32>
    %cst_37 = arith.constant 0.000000e+00 : f32
    %51 = vector.broadcast %cst_37 : f32 to vector<8x64xf32>
    %c0_i32 = arith.constant 0 : i32
    %52 = arith.index_cast %c0_i32 : i32 to index
    %c0_38 = arith.constant 0 : index
    %c0_39 = arith.constant 0 : index
    %53 = vector.load %arg19[%52, %c0_38, %c0_39] : memref<8x8x256xf32, #tpu.memory_space<vmem>>, vector<1x8x256xf32>
    %54 = vector.shape_cast %53 : vector<1x8x256xf32> to vector<8x256xf32>
    %cst_40 = arith.constant dense<0.000000e+00> : vector<8x256xf32>
    %55 = tpu.matmul %51, %49, %cst_40 {dimension_numbers = #tpu.dot_dimension_numbers<[1], [0], [0], [1], [0, 0, 1, 1], [], []>} : vector<8x64xf32>, vector<64x256xf32>, vector<8x256xf32> -> vector<8x256xf32>
    %56 = arith.addf %54, %55 : vector<8x256xf32>
    %57 = vector.extract_strided_slice %56 {offsets = [0, 0], sizes = [8, 64], strides = [1, 1]} : vector<8x256xf32> to vector<8x64xf32>
    %58 = arith.negf %57 : vector<8x64xf32>
    %59 = math.exp %58 : vector<8x64xf32>
    %cst_41 = arith.constant 1.000000e+00 : f32
    %60 = vector.broadcast %cst_41 : f32 to vector<8x64xf32>
    %61 = arith.addf %60, %59 : vector<8x64xf32>
    %62 = arith.divf %60, %61 : vector<8x64xf32>
    %63 = vector.extract_strided_slice %56 {offsets = [0, 64], sizes = [8, 64], strides = [1, 1]} : vector<8x256xf32> to vector<8x64xf32>
    %64 = arith.negf %63 : vector<8x64xf32>
    %65 = math.exp %64 : vector<8x64xf32>
    %cst_42 = arith.constant 1.000000e+00 : f32
    %66 = vector.broadcast %cst_42 : f32 to vector<8x64xf32>
    %67 = arith.addf %66, %65 : vector<8x64xf32>
    %68 = arith.divf %66, %67 : vector<8x64xf32>
    %69 = vector.extract_strided_slice %56 {offsets = [0, 128], sizes = [8, 64], strides = [1, 1]} : vector<8x256xf32> to vector<8x64xf32>
    %70 = math.tanh %69 : vector<8x64xf32>
    %71 = vector.extract_strided_slice %56 {offsets = [0, 192], sizes = [8, 64], strides = [1, 1]} : vector<8x256xf32> to vector<8x64xf32>
    %72 = arith.negf %71 : vector<8x64xf32>
    %73 = math.exp %72 : vector<8x64xf32>
    %cst_43 = arith.constant 1.000000e+00 : f32
    %74 = vector.broadcast %cst_43 : f32 to vector<8x64xf32>
    %75 = arith.addf %74, %73 : vector<8x64xf32>
    %76 = arith.divf %74, %75 : vector<8x64xf32>
    %77 = arith.mulf %68, %51 : vector<8x64xf32>
    %78 = arith.mulf %62, %70 : vector<8x64xf32>
    %79 = arith.addf %77, %78 : vector<8x64xf32>
    %80 = math.tanh %79 : vector<8x64xf32>
    %81 = arith.mulf %76, %80 : vector<8x64xf32>
    %82 = vector.shape_cast %81 : vector<8x64xf32> to vector<1x8x64xf32>
    %83 = arith.index_cast %c0_i32 : i32 to index
    %c0_44 = arith.constant 0 : index
    %c0_45 = arith.constant 0 : index
    %84 = vector.load %arg21[%83, %c0_44, %c0_45] : memref<8x8x64xf32, #tpu.memory_space<vmem>>, vector<1x8x64xf32>
    tpu.vector_store %arg21[%83, %c0_44, %c0_45], %82 {strides = array<i32>} : memref<8x8x64xf32, #tpu.memory_space<vmem>>, vector<1x8x64xf32>,
    %c1_i32 = arith.constant 1 : i32
    %85 = arith.index_cast %c1_i32 : i32 to index
    %c0_46 = arith.constant 0 : index
    %c0_47 = arith.constant 0 : index
    %86 = vector.load %arg19[%85, %c0_46, %c0_47] : memref<8x8x256xf32, #tpu.memory_space<vmem>>, vector<1x8x256xf32>
    %87 = vector.shape_cast %86 : vector<1x8x256xf32> to vector<8x256xf32>
    %cst_48 = arith.constant dense<0.000000e+00> : vector<8x256xf32>
    %88 = tpu.matmul %81, %49, %cst_48 {dimension_numbers = #tpu.dot_dimension_numbers<[1], [0], [0], [1], [0, 0, 1, 1], [], []>} : vector<8x64xf32>, vector<64x256xf32>, vector<8x256xf32> -> vector<8x256xf32>
    %89 = arith.addf %87, %88 : vector<8x256xf32>
    %90 = vector.extract_strided_slice %89 {offsets = [0, 0], sizes = [8, 64], strides = [1, 1]} : vector<8x256xf32> to vector<8x64xf32>
    %91 = arith.negf %90 : vector<8x64xf32>
    %92 = math.exp %91 : vector<8x64xf32>
    %cst_49 = arith.constant 1.000000e+00 : f32
    %93 = vector.broadcast %cst_49 : f32 to vector<8x64xf32>
    %94 = arith.addf %93, %92 : vector<8x64xf32>
    %95 = arith.divf %93, %94 : vector<8x64xf32>
    %96 = vector.extract_strided_slice %89 {offsets = [0, 64], sizes = [8, 64], strides = [1, 1]} : vector<8x256xf32> to vector<8x64xf32>
    %97 = arith.negf %96 : vector<8x64xf32>
    %98 = math.exp %97 : vector<8x64xf32>
    %cst_50 = arith.constant 1.000000e+00 : f32
    %99 = vector.broadcast %cst_50 : f32 to vector<8x64xf32>
    %100 = arith.addf %99, %98 : vector<8x64xf32>
    %101 = arith.divf %99, %100 : vector<8x64xf32>
    %102 = vector.extract_strided_slice %89 {offsets = [0, 128], sizes = [8, 64], strides = [1, 1]} : vector<8x256xf32> to vector<8x64xf32>
    %103 = math.tanh %102 : vector<8x64xf32>
    %104 = vector.extract_strided_slice %89 {offsets = [0, 192], sizes = [8, 64], strides = [1, 1]} : vector<8x256xf32> to vector<8x64xf32>
    %105 = arith.negf %104 : vector<8x64xf32>
    %106 = math.exp %105 : vector<8x64xf32>
    %cst_51 = arith.constant 1.000000e+00 : f32
    %107 = vector.broadcast %cst_51 : f32 to vector<8x64xf32>
    %108 = arith.addf %107, %106 : vector<8x64xf32>
    %109 = arith.divf %107, %108 : vector<8x64xf32>
    %110 = arith.mulf %101, %79 : vector<8x64xf32>
    %111 = arith.mulf %95, %103 : vector<8x64xf32>
    %112 = arith.addf %110, %111 : vector<8x64xf32>
    %113 = math.tanh %112 : vector<8x64xf32>
    %114 = arith.mulf %109, %113 : vector<8x64xf32>
    %115 = vector.shape_cast %114 : vector<8x64xf32> to vector<1x8x64xf32>
    %116 = arith.index_cast %c1_i32 : i32 to index
    %c0_52 = arith.constant 0 : index
    %c0_53 = arith.constant 0 : index
    %117 = vector.load %arg21[%116, %c0_52, %c0_53] : memref<8x8x64xf32, #tpu.memory_space<vmem>>, vector<1x8x64xf32>
    tpu.vector_store %arg21[%116, %c0_52, %c0_53], %115 {strides = array<i32>} : memref<8x8x64xf32, #tpu.memory_space<vmem>>, vector<1x8x64xf32>,
    %c2_i32 = arith.constant 2 : i32
    %118 = arith.index_cast %c2_i32 : i32 to index
    %c0_54 = arith.constant 0 : index
    %c0_55 = arith.constant 0 : index
    %119 = vector.load %arg19[%118, %c0_54, %c0_55] : memref<8x8x256xf32, #tpu.memory_space<vmem>>, vector<1x8x256xf32>
    %120 = vector.shape_cast %119 : vector<1x8x256xf32> to vector<8x256xf32>
    %cst_56 = arith.constant dense<0.000000e+00> : vector<8x256xf32>
    %121 = tpu.matmul %114, %49, %cst_56 {dimension_numbers = #tpu.dot_dimension_numbers<[1], [0], [0], [1], [0, 0, 1, 1], [], []>} : vector<8x64xf32>, vector<64x256xf32>, vector<8x256xf32> -> vector<8x256xf32>
    %122 = arith.addf %120, %121 : vector<8x256xf32>
    %123 = vector.extract_strided_slice %122 {offsets = [0, 0], sizes = [8, 64], strides = [1, 1]} : vector<8x256xf32> to vector<8x64xf32>
    %124 = arith.negf %123 : vector<8x64xf32>
    %125 = math.exp %124 : vector<8x64xf32>
    %cst_57 = arith.constant 1.000000e+00 : f32
    %126 = vector.broadcast %cst_57 : f32 to vector<8x64xf32>
    %127 = arith.addf %126, %125 : vector<8x64xf32>
    %128 = arith.divf %126, %127 : vector<8x64xf32>
    %129 = vector.extract_strided_slice %122 {offsets = [0, 64], sizes = [8, 64], strides = [1, 1]} : vector<8x256xf32> to vector<8x64xf32>
    %130 = arith.negf %129 : vector<8x64xf32>
    %131 = math.exp %130 : vector<8x64xf32>
    %cst_58 = arith.constant 1.000000e+00 : f32
    %132 = vector.broadcast %cst_58 : f32 to vector<8x64xf32>
    %133 = arith.addf %132, %131 : vector<8x64xf32>
    %134 = arith.divf %132, %133 : vector<8x64xf32>
    %135 = vector.extract_strided_slice %122 {offsets = [0, 128], sizes = [8, 64], strides = [1, 1]} : vector<8x256xf32> to vector<8x64xf32>
    %136 = math.tanh %135 : vector<8x64xf32>
    %137 = vector.extract_strided_slice %122 {offsets = [0, 192], sizes = [8, 64], strides = [1, 1]} : vector<8x256xf32> to vector<8x64xf32>
    %138 = arith.negf %137 : vector<8x64xf32>
    %139 = math.exp %138 : vector<8x64xf32>
    %cst_59 = arith.constant 1.000000e+00 : f32
    %140 = vector.broadcast %cst_59 : f32 to vector<8x64xf32>
    %141 = arith.addf %140, %139 : vector<8x64xf32>
    %142 = arith.divf %140, %141 : vector<8x64xf32>
    %143 = arith.mulf %134, %112 : vector<8x64xf32>
    %144 = arith.mulf %128, %136 : vector<8x64xf32>
    %145 = arith.addf %143, %144 : vector<8x64xf32>
    %146 = math.tanh %145 : vector<8x64xf32>
    %147 = arith.mulf %142, %146 : vector<8x64xf32>
    %148 = vector.shape_cast %147 : vector<8x64xf32> to vector<1x8x64xf32>
    %149 = arith.index_cast %c2_i32 : i32 to index
    %c0_60 = arith.constant 0 : index
    %c0_61 = arith.constant 0 : index
    %150 = vector.load %arg21[%149, %c0_60, %c0_61] : memref<8x8x64xf32, #tpu.memory_space<vmem>>, vector<1x8x64xf32>
    tpu.vector_store %arg21[%149, %c0_60, %c0_61], %148 {strides = array<i32>} : memref<8x8x64xf32, #tpu.memory_space<vmem>>, vector<1x8x64xf32>,
    %c3_i32 = arith.constant 3 : i32
    %151 = arith.index_cast %c3_i32 : i32 to index
    %c0_62 = arith.constant 0 : index
    %c0_63 = arith.constant 0 : index
    %152 = vector.load %arg19[%151, %c0_62, %c0_63] : memref<8x8x256xf32, #tpu.memory_space<vmem>>, vector<1x8x256xf32>
    %153 = vector.shape_cast %152 : vector<1x8x256xf32> to vector<8x256xf32>
    %cst_64 = arith.constant dense<0.000000e+00> : vector<8x256xf32>
    %154 = tpu.matmul %147, %49, %cst_64 {dimension_numbers = #tpu.dot_dimension_numbers<[1], [0], [0], [1], [0, 0, 1, 1], [], []>} : vector<8x64xf32>, vector<64x256xf32>, vector<8x256xf32> -> vector<8x256xf32>
    %155 = arith.addf %153, %154 : vector<8x256xf32>
    %156 = vector.extract_strided_slice %155 {offsets = [0, 0], sizes = [8, 64], strides = [1, 1]} : vector<8x256xf32> to vector<8x64xf32>
    %157 = arith.negf %156 : vector<8x64xf32>
    %158 = math.exp %157 : vector<8x64xf32>
    %cst_65 = arith.constant 1.000000e+00 : f32
    %159 = vector.broadcast %cst_65 : f32 to vector<8x64xf32>
    %160 = arith.addf %159, %158 : vector<8x64xf32>
    %161 = arith.divf %159, %160 : vector<8x64xf32>
    %162 = vector.extract_strided_slice %155 {offsets = [0, 64], sizes = [8, 64], strides = [1, 1]} : vector<8x256xf32> to vector<8x64xf32>
    %163 = arith.negf %162 : vector<8x64xf32>
    %164 = math.exp %163 : vector<8x64xf32>
    %cst_66 = arith.constant 1.000000e+00 : f32
    %165 = vector.broadcast %cst_66 : f32 to vector<8x64xf32>
    %166 = arith.addf %165, %164 : vector<8x64xf32>
    %167 = arith.divf %165, %166 : vector<8x64xf32>
    %168 = vector.extract_strided_slice %155 {offsets = [0, 128], sizes = [8, 64], strides = [1, 1]} : vector<8x256xf32> to vector<8x64xf32>
    %169 = math.tanh %168 : vector<8x64xf32>
    %170 = vector.extract_strided_slice %155 {offsets = [0, 192], sizes = [8, 64], strides = [1, 1]} : vector<8x256xf32> to vector<8x64xf32>
    %171 = arith.negf %170 : vector<8x64xf32>
    %172 = math.exp %171 : vector<8x64xf32>
    %cst_67 = arith.constant 1.000000e+00 : f32
    %173 = vector.broadcast %cst_67 : f32 to vector<8x64xf32>
    %174 = arith.addf %173, %172 : vector<8x64xf32>
    %175 = arith.divf %173, %174 : vector<8x64xf32>
    %176 = arith.mulf %167, %145 : vector<8x64xf32>
    %177 = arith.mulf %161, %169 : vector<8x64xf32>
    %178 = arith.addf %176, %177 : vector<8x64xf32>
    %179 = math.tanh %178 : vector<8x64xf32>
    %180 = arith.mulf %175, %179 : vector<8x64xf32>
    %181 = vector.shape_cast %180 : vector<8x64xf32> to vector<1x8x64xf32>
    %182 = arith.index_cast %c3_i32 : i32 to index
    %c0_68 = arith.constant 0 : index
    %c0_69 = arith.constant 0 : index
    %183 = vector.load %arg21[%182, %c0_68, %c0_69] : memref<8x8x64xf32, #tpu.memory_space<vmem>>, vector<1x8x64xf32>
    tpu.vector_store %arg21[%182, %c0_68, %c0_69], %181 {strides = array<i32>} : memref<8x8x64xf32, #tpu.memory_space<vmem>>, vector<1x8x64xf32>,
    %c4_i32 = arith.constant 4 : i32
    %184 = arith.index_cast %c4_i32 : i32 to index
    %c0_70 = arith.constant 0 : index
    %c0_71 = arith.constant 0 : index
    %185 = vector.load %arg19[%184, %c0_70, %c0_71] : memref<8x8x256xf32, #tpu.memory_space<vmem>>, vector<1x8x256xf32>
    %186 = vector.shape_cast %185 : vector<1x8x256xf32> to vector<8x256xf32>
    %cst_72 = arith.constant dense<0.000000e+00> : vector<8x256xf32>
    %187 = tpu.matmul %180, %49, %cst_72 {dimension_numbers = #tpu.dot_dimension_numbers<[1], [0], [0], [1], [0, 0, 1, 1], [], []>} : vector<8x64xf32>, vector<64x256xf32>, vector<8x256xf32> -> vector<8x256xf32>
    %188 = arith.addf %186, %187 : vector<8x256xf32>
    %189 = vector.extract_strided_slice %188 {offsets = [0, 0], sizes = [8, 64], strides = [1, 1]} : vector<8x256xf32> to vector<8x64xf32>
    %190 = arith.negf %189 : vector<8x64xf32>
    %191 = math.exp %190 : vector<8x64xf32>
    %cst_73 = arith.constant 1.000000e+00 : f32
    %192 = vector.broadcast %cst_73 : f32 to vector<8x64xf32>
    %193 = arith.addf %192, %191 : vector<8x64xf32>
    %194 = arith.divf %192, %193 : vector<8x64xf32>
    %195 = vector.extract_strided_slice %188 {offsets = [0, 64], sizes = [8, 64], strides = [1, 1]} : vector<8x256xf32> to vector<8x64xf32>
    %196 = arith.negf %195 : vector<8x64xf32>
    %197 = math.exp %196 : vector<8x64xf32>
    %cst_74 = arith.constant 1.000000e+00 : f32
    %198 = vector.broadcast %cst_74 : f32 to vector<8x64xf32>
    %199 = arith.addf %198, %197 : vector<8x64xf32>
    %200 = arith.divf %198, %199 : vector<8x64xf32>
    %201 = vector.extract_strided_slice %188 {offsets = [0, 128], sizes = [8, 64], strides = [1, 1]} : vector<8x256xf32> to vector<8x64xf32>
    %202 = math.tanh %201 : vector<8x64xf32>
    %203 = vector.extract_strided_slice %188 {offsets = [0, 192], sizes = [8, 64], strides = [1, 1]} : vector<8x256xf32> to vector<8x64xf32>
    %204 = arith.negf %203 : vector<8x64xf32>
    %205 = math.exp %204 : vector<8x64xf32>
    %cst_75 = arith.constant 1.000000e+00 : f32
    %206 = vector.broadcast %cst_75 : f32 to vector<8x64xf32>
    %207 = arith.addf %206, %205 : vector<8x64xf32>
    %208 = arith.divf %206, %207 : vector<8x64xf32>
    %209 = arith.mulf %200, %178 : vector<8x64xf32>
    %210 = arith.mulf %194, %202 : vector<8x64xf32>
    %211 = arith.addf %209, %210 : vector<8x64xf32>
    %212 = math.tanh %211 : vector<8x64xf32>
    %213 = arith.mulf %208, %212 : vector<8x64xf32>
    %214 = vector.shape_cast %213 : vector<8x64xf32> to vector<1x8x64xf32>
    %215 = arith.index_cast %c4_i32 : i32 to index
    %c0_76 = arith.constant 0 : index
    %c0_77 = arith.constant 0 : index
    %216 = vector.load %arg21[%215, %c0_76, %c0_77] : memref<8x8x64xf32, #tpu.memory_space<vmem>>, vector<1x8x64xf32>
    tpu.vector_store %arg21[%215, %c0_76, %c0_77], %214 {strides = array<i32>} : memref<8x8x64xf32, #tpu.memory_space<vmem>>, vector<1x8x64xf32>,
    %c5_i32 = arith.constant 5 : i32
    %217 = arith.index_cast %c5_i32 : i32 to index
    %c0_78 = arith.constant 0 : index
    %c0_79 = arith.constant 0 : index
    %218 = vector.load %arg19[%217, %c0_78, %c0_79] : memref<8x8x256xf32, #tpu.memory_space<vmem>>, vector<1x8x256xf32>
    %219 = vector.shape_cast %218 : vector<1x8x256xf32> to vector<8x256xf32>
    %cst_80 = arith.constant dense<0.000000e+00> : vector<8x256xf32>
    %220 = tpu.matmul %213, %49, %cst_80 {dimension_numbers = #tpu.dot_dimension_numbers<[1], [0], [0], [1], [0, 0, 1, 1], [], []>} : vector<8x64xf32>, vector<64x256xf32>, vector<8x256xf32> -> vector<8x256xf32>
    %221 = arith.addf %219, %220 : vector<8x256xf32>
    %222 = vector.extract_strided_slice %221 {offsets = [0, 0], sizes = [8, 64], strides = [1, 1]} : vector<8x256xf32> to vector<8x64xf32>
    %223 = arith.negf %222 : vector<8x64xf32>
    %224 = math.exp %223 : vector<8x64xf32>
    %cst_81 = arith.constant 1.000000e+00 : f32
    %225 = vector.broadcast %cst_81 : f32 to vector<8x64xf32>
    %226 = arith.addf %225, %224 : vector<8x64xf32>
    %227 = arith.divf %225, %226 : vector<8x64xf32>
    %228 = vector.extract_strided_slice %221 {offsets = [0, 64], sizes = [8, 64], strides = [1, 1]} : vector<8x256xf32> to vector<8x64xf32>
    %229 = arith.negf %228 : vector<8x64xf32>
    %230 = math.exp %229 : vector<8x64xf32>
    %cst_82 = arith.constant 1.000000e+00 : f32
    %231 = vector.broadcast %cst_82 : f32 to vector<8x64xf32>
    %232 = arith.addf %231, %230 : vector<8x64xf32>
    %233 = arith.divf %231, %232 : vector<8x64xf32>
    %234 = vector.extract_strided_slice %221 {offsets = [0, 128], sizes = [8, 64], strides = [1, 1]} : vector<8x256xf32> to vector<8x64xf32>
    %235 = math.tanh %234 : vector<8x64xf32>
    %236 = vector.extract_strided_slice %221 {offsets = [0, 192], sizes = [8, 64], strides = [1, 1]} : vector<8x256xf32> to vector<8x64xf32>
    %237 = arith.negf %236 : vector<8x64xf32>
    %238 = math.exp %237 : vector<8x64xf32>
    %cst_83 = arith.constant 1.000000e+00 : f32
    %239 = vector.broadcast %cst_83 : f32 to vector<8x64xf32>
    %240 = arith.addf %239, %238 : vector<8x64xf32>
    %241 = arith.divf %239, %240 : vector<8x64xf32>
    %242 = arith.mulf %233, %211 : vector<8x64xf32>
    %243 = arith.mulf %227, %235 : vector<8x64xf32>
    %244 = arith.addf %242, %243 : vector<8x64xf32>
    %245 = math.tanh %244 : vector<8x64xf32>
    %246 = arith.mulf %241, %245 : vector<8x64xf32>
    %247 = vector.shape_cast %246 : vector<8x64xf32> to vector<1x8x64xf32>
    %248 = arith.index_cast %c5_i32 : i32 to index
    %c0_84 = arith.constant 0 : index
    %c0_85 = arith.constant 0 : index
    %249 = vector.load %arg21[%248, %c0_84, %c0_85] : memref<8x8x64xf32, #tpu.memory_space<vmem>>, vector<1x8x64xf32>
    tpu.vector_store %arg21[%248, %c0_84, %c0_85], %247 {strides = array<i32>} : memref<8x8x64xf32, #tpu.memory_space<vmem>>, vector<1x8x64xf32>,
    %c6_i32 = arith.constant 6 : i32
    %250 = arith.index_cast %c6_i32 : i32 to index
    %c0_86 = arith.constant 0 : index
    %c0_87 = arith.constant 0 : index
    %251 = vector.load %arg19[%250, %c0_86, %c0_87] : memref<8x8x256xf32, #tpu.memory_space<vmem>>, vector<1x8x256xf32>
    %252 = vector.shape_cast %251 : vector<1x8x256xf32> to vector<8x256xf32>
    %cst_88 = arith.constant dense<0.000000e+00> : vector<8x256xf32>
    %253 = tpu.matmul %246, %49, %cst_88 {dimension_numbers = #tpu.dot_dimension_numbers<[1], [0], [0], [1], [0, 0, 1, 1], [], []>} : vector<8x64xf32>, vector<64x256xf32>, vector<8x256xf32> -> vector<8x256xf32>
    %254 = arith.addf %252, %253 : vector<8x256xf32>
    %255 = vector.extract_strided_slice %254 {offsets = [0, 0], sizes = [8, 64], strides = [1, 1]} : vector<8x256xf32> to vector<8x64xf32>
    %256 = arith.negf %255 : vector<8x64xf32>
    %257 = math.exp %256 : vector<8x64xf32>
    %cst_89 = arith.constant 1.000000e+00 : f32
    %258 = vector.broadcast %cst_89 : f32 to vector<8x64xf32>
    %259 = arith.addf %258, %257 : vector<8x64xf32>
    %260 = arith.divf %258, %259 : vector<8x64xf32>
    %261 = vector.extract_strided_slice %254 {offsets = [0, 64], sizes = [8, 64], strides = [1, 1]} : vector<8x256xf32> to vector<8x64xf32>
    %262 = arith.negf %261 : vector<8x64xf32>
    %263 = math.exp %262 : vector<8x64xf32>
    %cst_90 = arith.constant 1.000000e+00 : f32
    %264 = vector.broadcast %cst_90 : f32 to vector<8x64xf32>
    %265 = arith.addf %264, %263 : vector<8x64xf32>
    %266 = arith.divf %264, %265 : vector<8x64xf32>
    %267 = vector.extract_strided_slice %254 {offsets = [0, 128], sizes = [8, 64], strides = [1, 1]} : vector<8x256xf32> to vector<8x64xf32>
    %268 = math.tanh %267 : vector<8x64xf32>
    %269 = vector.extract_strided_slice %254 {offsets = [0, 192], sizes = [8, 64], strides = [1, 1]} : vector<8x256xf32> to vector<8x64xf32>
    %270 = arith.negf %269 : vector<8x64xf32>
    %271 = math.exp %270 : vector<8x64xf32>
    %cst_91 = arith.constant 1.000000e+00 : f32
    %272 = vector.broadcast %cst_91 : f32 to vector<8x64xf32>
    %273 = arith.addf %272, %271 : vector<8x64xf32>
    %274 = arith.divf %272, %273 : vector<8x64xf32>
    %275 = arith.mulf %266, %244 : vector<8x64xf32>
    %276 = arith.mulf %260, %268 : vector<8x64xf32>
    %277 = arith.addf %275, %276 : vector<8x64xf32>
    %278 = math.tanh %277 : vector<8x64xf32>
    %279 = arith.mulf %274, %278 : vector<8x64xf32>
    %280 = vector.shape_cast %279 : vector<8x64xf32> to vector<1x8x64xf32>
    %281 = arith.index_cast %c6_i32 : i32 to index
    %c0_92 = arith.constant 0 : index
    %c0_93 = arith.constant 0 : index
    %282 = vector.load %arg21[%281, %c0_92, %c0_93] : memref<8x8x64xf32, #tpu.memory_space<vmem>>, vector<1x8x64xf32>
    tpu.vector_store %arg21[%281, %c0_92, %c0_93], %280 {strides = array<i32>} : memref<8x8x64xf32, #tpu.memory_space<vmem>>, vector<1x8x64xf32>,
    %c7_i32 = arith.constant 7 : i32
    %283 = arith.index_cast %c7_i32 : i32 to index
    %c0_94 = arith.constant 0 : index
    %c0_95 = arith.constant 0 : index
    %284 = vector.load %arg19[%283, %c0_94, %c0_95] : memref<8x8x256xf32, #tpu.memory_space<vmem>>, vector<1x8x256xf32>
    %285 = vector.shape_cast %284 : vector<1x8x256xf32> to vector<8x256xf32>
    %cst_96 = arith.constant dense<0.000000e+00> : vector<8x256xf32>
    %286 = tpu.matmul %279, %49, %cst_96 {dimension_numbers = #tpu.dot_dimension_numbers<[1], [0], [0], [1], [0, 0, 1, 1], [], []>} : vector<8x64xf32>, vector<64x256xf32>, vector<8x256xf32> -> vector<8x256xf32>
    %287 = arith.addf %285, %286 : vector<8x256xf32>
    %288 = vector.extract_strided_slice %287 {offsets = [0, 0], sizes = [8, 64], strides = [1, 1]} : vector<8x256xf32> to vector<8x64xf32>
    %289 = arith.negf %288 : vector<8x64xf32>
    %290 = math.exp %289 : vector<8x64xf32>
    %cst_97 = arith.constant 1.000000e+00 : f32
    %291 = vector.broadcast %cst_97 : f32 to vector<8x64xf32>
    %292 = arith.addf %291, %290 : vector<8x64xf32>
    %293 = arith.divf %291, %292 : vector<8x64xf32>
    %294 = vector.extract_strided_slice %287 {offsets = [0, 64], sizes = [8, 64], strides = [1, 1]} : vector<8x256xf32> to vector<8x64xf32>
    %295 = arith.negf %294 : vector<8x64xf32>
    %296 = math.exp %295 : vector<8x64xf32>
    %cst_98 = arith.constant 1.000000e+00 : f32
    %297 = vector.broadcast %cst_98 : f32 to vector<8x64xf32>
    %298 = arith.addf %297, %296 : vector<8x64xf32>
    %299 = arith.divf %297, %298 : vector<8x64xf32>
    %300 = vector.extract_strided_slice %287 {offsets = [0, 128], sizes = [8, 64], strides = [1, 1]} : vector<8x256xf32> to vector<8x64xf32>
    %301 = math.tanh %300 : vector<8x64xf32>
    %302 = vector.extract_strided_slice %287 {offsets = [0, 192], sizes = [8, 64], strides = [1, 1]} : vector<8x256xf32> to vector<8x64xf32>
    %303 = arith.negf %302 : vector<8x64xf32>
    %304 = math.exp %303 : vector<8x64xf32>
    %cst_99 = arith.constant 1.000000e+00 : f32
    %305 = vector.broadcast %cst_99 : f32 to vector<8x64xf32>
    %306 = arith.addf %305, %304 : vector<8x64xf32>
    %307 = arith.divf %305, %306 : vector<8x64xf32>
    %308 = arith.mulf %299, %277 : vector<8x64xf32>
    %309 = arith.mulf %293, %301 : vector<8x64xf32>
    %310 = arith.addf %308, %309 : vector<8x64xf32>
    %311 = math.tanh %310 : vector<8x64xf32>
    %312 = arith.mulf %307, %311 : vector<8x64xf32>
    %313 = vector.shape_cast %312 : vector<8x64xf32> to vector<1x8x64xf32>
    %314 = arith.index_cast %c7_i32 : i32 to index
    %c0_100 = arith.constant 0 : index
    %c0_101 = arith.constant 0 : index
    %315 = vector.load %arg21[%314, %c0_100, %c0_101] : memref<8x8x64xf32, #tpu.memory_space<vmem>>, vector<1x8x64xf32>
    tpu.vector_store %arg21[%314, %c0_100, %c0_101], %313 {strides = array<i32>} : memref<8x8x64xf32, #tpu.memory_space<vmem>>, vector<1x8x64xf32>,
    %c8_i32 = arith.constant 8 : i32
    %c0_i32_102 = arith.constant 0 : i32
    %316 = arith.index_cast %c0_i32_102 : i32 to index
    %c0_103 = arith.constant 0 : index
    %c0_104 = arith.constant 0 : index
    %317 = vector.load %arg21[%316, %c0_103, %c0_104] : memref<8x8x64xf32, #tpu.memory_space<vmem>>, vector<1x8x64xf32>
    %c7_i32_105 = arith.constant 7 : i32
    %318 = arith.subi %c7_i32_105, %c0_i32_102 : i32
    %319 = arith.index_cast %318 : i32 to index
    %c0_106 = arith.constant 0 : index
    %c0_107 = arith.constant 0 : index
    %320 = vector.load %arg22[%319, %c0_106, %c0_107] : memref<8x8x64xf32, #tpu.memory_space<vmem>>, vector<1x8x64xf32>
    tpu.vector_store %arg22[%319, %c0_106, %c0_107], %317 {strides = array<i32>} : memref<8x8x64xf32, #tpu.memory_space<vmem>>, vector<1x8x64xf32>,
    %c1_i32_108 = arith.constant 1 : i32
    %321 = arith.index_cast %c1_i32_108 : i32 to index
    %c0_109 = arith.constant 0 : index
    %c0_110 = arith.constant 0 : index
    %322 = vector.load %arg21[%321, %c0_109, %c0_110] : memref<8x8x64xf32, #tpu.memory_space<vmem>>, vector<1x8x64xf32>
    %c7_i32_111 = arith.constant 7 : i32
    %323 = arith.subi %c7_i32_111, %c1_i32_108 : i32
    %324 = arith.index_cast %323 : i32 to index
    %c0_112 = arith.constant 0 : index
    %c0_113 = arith.constant 0 : index
    %325 = vector.load %arg22[%324, %c0_112, %c0_113] : memref<8x8x64xf32, #tpu.memory_space<vmem>>, vector<1x8x64xf32>
    tpu.vector_store %arg22[%324, %c0_112, %c0_113], %322 {strides = array<i32>} : memref<8x8x64xf32, #tpu.memory_space<vmem>>, vector<1x8x64xf32>,
    %c2_i32_114 = arith.constant 2 : i32
    %326 = arith.index_cast %c2_i32_114 : i32 to index
    %c0_115 = arith.constant 0 : index
    %c0_116 = arith.constant 0 : index
    %327 = vector.load %arg21[%326, %c0_115, %c0_116] : memref<8x8x64xf32, #tpu.memory_space<vmem>>, vector<1x8x64xf32>
    %c7_i32_117 = arith.constant 7 : i32
    %328 = arith.subi %c7_i32_117, %c2_i32_114 : i32
    %329 = arith.index_cast %328 : i32 to index
    %c0_118 = arith.constant 0 : index
    %c0_119 = arith.constant 0 : index
    %330 = vector.load %arg22[%329, %c0_118, %c0_119] : memref<8x8x64xf32, #tpu.memory_space<vmem>>, vector<1x8x64xf32>
    tpu.vector_store %arg22[%329, %c0_118, %c0_119], %327 {strides = array<i32>} : memref<8x8x64xf32, #tpu.memory_space<vmem>>, vector<1x8x64xf32>,
    %c3_i32_120 = arith.constant 3 : i32
    %331 = arith.index_cast %c3_i32_120 : i32 to index
    %c0_121 = arith.constant 0 : index
    %c0_122 = arith.constant 0 : index
    %332 = vector.load %arg21[%331, %c0_121, %c0_122] : memref<8x8x64xf32, #tpu.memory_space<vmem>>, vector<1x8x64xf32>
    %c7_i32_123 = arith.constant 7 : i32
    %333 = arith.subi %c7_i32_123, %c3_i32_120 : i32
    %334 = arith.index_cast %333 : i32 to index
    %c0_124 = arith.constant 0 : index
    %c0_125 = arith.constant 0 : index
    %335 = vector.load %arg22[%334, %c0_124, %c0_125] : memref<8x8x64xf32, #tpu.memory_space<vmem>>, vector<1x8x64xf32>
    tpu.vector_store %arg22[%334, %c0_124, %c0_125], %332 {strides = array<i32>} : memref<8x8x64xf32, #tpu.memory_space<vmem>>, vector<1x8x64xf32>,
    %c4_i32_126 = arith.constant 4 : i32
    %336 = arith.index_cast %c4_i32_126 : i32 to index
    %c0_127 = arith.constant 0 : index
    %c0_128 = arith.constant 0 : index
    %337 = vector.load %arg21[%336, %c0_127, %c0_128] : memref<8x8x64xf32, #tpu.memory_space<vmem>>, vector<1x8x64xf32>
    %c7_i32_129 = arith.constant 7 : i32
    %338 = arith.subi %c7_i32_129, %c4_i32_126 : i32
    %339 = arith.index_cast %338 : i32 to index
    %c0_130 = arith.constant 0 : index
    %c0_131 = arith.constant 0 : index
    %340 = vector.load %arg22[%339, %c0_130, %c0_131] : memref<8x8x64xf32, #tpu.memory_space<vmem>>, vector<1x8x64xf32>
    tpu.vector_store %arg22[%339, %c0_130, %c0_131], %337 {strides = array<i32>} : memref<8x8x64xf32, #tpu.memory_space<vmem>>, vector<1x8x64xf32>,
    %c5_i32_132 = arith.constant 5 : i32
    %341 = arith.index_cast %c5_i32_132 : i32 to index
    %c0_133 = arith.constant 0 : index
    %c0_134 = arith.constant 0 : index
    %342 = vector.load %arg21[%341, %c0_133, %c0_134] : memref<8x8x64xf32, #tpu.memory_space<vmem>>, vector<1x8x64xf32>
    %c7_i32_135 = arith.constant 7 : i32
    %343 = arith.subi %c7_i32_135, %c5_i32_132 : i32
    %344 = arith.index_cast %343 : i32 to index
    %c0_136 = arith.constant 0 : index
    %c0_137 = arith.constant 0 : index
    %345 = vector.load %arg22[%344, %c0_136, %c0_137] : memref<8x8x64xf32, #tpu.memory_space<vmem>>, vector<1x8x64xf32>
    tpu.vector_store %arg22[%344, %c0_136, %c0_137], %342 {strides = array<i32>} : memref<8x8x64xf32, #tpu.memory_space<vmem>>, vector<1x8x64xf32>,
    %c6_i32_138 = arith.constant 6 : i32
    %346 = arith.index_cast %c6_i32_138 : i32 to index
    %c0_139 = arith.constant 0 : index
    %c0_140 = arith.constant 0 : index
    %347 = vector.load %arg21[%346, %c0_139, %c0_140] : memref<8x8x64xf32, #tpu.memory_space<vmem>>, vector<1x8x64xf32>
    %c7_i32_141 = arith.constant 7 : i32
    %348 = arith.subi %c7_i32_141, %c6_i32_138 : i32
    %349 = arith.index_cast %348 : i32 to index
    %c0_142 = arith.constant 0 : index
    %c0_143 = arith.constant 0 : index
    %350 = vector.load %arg22[%349, %c0_142, %c0_143] : memref<8x8x64xf32, #tpu.memory_space<vmem>>, vector<1x8x64xf32>
    tpu.vector_store %arg22[%349, %c0_142, %c0_143], %347 {strides = array<i32>} : memref<8x8x64xf32, #tpu.memory_space<vmem>>, vector<1x8x64xf32>,
    %c7_i32_144 = arith.constant 7 : i32
    %351 = arith.index_cast %c7_i32_144 : i32 to index
    %c0_145 = arith.constant 0 : index
    %c0_146 = arith.constant 0 : index
    %352 = vector.load %arg21[%351, %c0_145, %c0_146] : memref<8x8x64xf32, #tpu.memory_space<vmem>>, vector<1x8x64xf32>
    %c7_i32_147 = arith.constant 7 : i32
    %353 = arith.subi %c7_i32_147, %c7_i32_144 : i32
    %354 = arith.index_cast %353 : i32 to index
    %c0_148 = arith.constant 0 : index
    %c0_149 = arith.constant 0 : index
    %355 = vector.load %arg22[%354, %c0_148, %c0_149] : memref<8x8x64xf32, #tpu.memory_space<vmem>>, vector<1x8x64xf32>
    tpu.vector_store %arg22[%354, %c0_148, %c0_149], %352 {strides = array<i32>} : memref<8x8x64xf32, #tpu.memory_space<vmem>>, vector<1x8x64xf32>,
    %c8_i32_150 = arith.constant 8 : i32
    %c0_151 = arith.constant 0 : index
    %c0_152 = arith.constant 0 : index
    %c0_153 = arith.constant 0 : index
    %356 = vector.load %arg21[%c0_151, %c0_152, %c0_153] : memref<8x8x64xf32, #tpu.memory_space<vmem>>, vector<8x8x64xf32>
    %357 = vector.shape_cast %356 : vector<8x8x64xf32> to vector<64x64xf32>
    %c0_154 = arith.constant 0 : index
    %c0_155 = arith.constant 0 : index
    %358 = vector.load %arg8[%c0_154, %c0_155] : memref<64x256xf32, #tpu.memory_space<vmem>>, vector<64x256xf32>
    %cst_156 = arith.constant dense<0.000000e+00> : vector<64x256xf32>
    %359 = tpu.matmul %357, %358, %cst_156 {dimension_numbers = #tpu.dot_dimension_numbers<[1], [0], [0], [1], [0, 0, 1, 1], [], []>} : vector<64x64xf32>, vector<64x256xf32>, vector<64x256xf32> -> vector<64x256xf32>
    %c0_157 = arith.constant 0 : index
    %c0_158 = arith.constant 0 : index
    %c0_159 = arith.constant 0 : index
    %360 = vector.load %arg22[%c0_157, %c0_158, %c0_159] : memref<8x8x64xf32, #tpu.memory_space<vmem>>, vector<8x8x64xf32>
    %361 = vector.shape_cast %360 : vector<8x8x64xf32> to vector<64x64xf32>
    %c0_160 = arith.constant 0 : index
    %c0_161 = arith.constant 0 : index
    %362 = vector.load %arg9[%c0_160, %c0_161] : memref<64x256xf32, #tpu.memory_space<vmem>>, vector<64x256xf32>
    %cst_162 = arith.constant dense<0.000000e+00> : vector<64x256xf32>
    %363 = tpu.matmul %361, %362, %cst_162 {dimension_numbers = #tpu.dot_dimension_numbers<[1], [0], [0], [1], [0, 0, 1, 1], [], []>} : vector<64x64xf32>, vector<64x256xf32>, vector<64x256xf32> -> vector<64x256xf32>
    %364 = arith.addf %359, %363 : vector<64x256xf32>
    %c0_163 = arith.constant 0 : index
    %c0_164 = arith.constant 0 : index
    %365 = vector.load %arg10[%c0_163, %c0_164] : memref<1x256xf32, #tpu.memory_space<vmem>>, vector<1x256xf32>
    %366 = vector.broadcast %365 : vector<1x256xf32> to vector<64x256xf32>
    %367 = arith.addf %364, %366 : vector<64x256xf32>
    %368 = vector.shape_cast %367 : vector<64x256xf32> to vector<8x8x256xf32>
    %c0_165 = arith.constant 0 : index
    %c0_166 = arith.constant 0 : index
    %c0_167 = arith.constant 0 : index
    %369 = vector.load %arg20[%c0_165, %c0_166, %c0_167] : memref<8x8x256xf32, #tpu.memory_space<vmem>>, vector<8x8x256xf32>
    tpu.vector_store %arg20[%c0_165, %c0_166, %c0_167], %368 {strides = array<i32>} : memref<8x8x256xf32, #tpu.memory_space<vmem>>, vector<8x8x256xf32>,
    %cst_168 = arith.constant 0xFF800000 : f32
    %370 = vector.broadcast %cst_168 : f32 to vector<8x64xf32>
    %c0_i32_169 = arith.constant 0 : i32
    %371 = arith.index_cast %c0_i32_169 : i32 to index
    %c0_170 = arith.constant 0 : index
    %c0_171 = arith.constant 0 : index
    %372 = vector.load %arg20[%371, %c0_170, %c0_171] : memref<8x8x256xf32, #tpu.memory_space<vmem>>, vector<1x8x256xf32>
    %373 = vector.shape_cast %372 : vector<1x8x256xf32> to vector<8x256xf32>
    %cst_172 = arith.constant dense<0.000000e+00> : vector<8x256xf32>
    %374 = tpu.matmul %51, %50, %cst_172 {dimension_numbers = #tpu.dot_dimension_numbers<[1], [0], [0], [1], [0, 0, 1, 1], [], []>} : vector<8x64xf32>, vector<64x256xf32>, vector<8x256xf32> -> vector<8x256xf32>
    %375 = arith.addf %373, %374 : vector<8x256xf32>
    %376 = vector.extract_strided_slice %375 {offsets = [0, 0], sizes = [8, 64], strides = [1, 1]} : vector<8x256xf32> to vector<8x64xf32>
    %377 = arith.negf %376 : vector<8x64xf32>
    %378 = math.exp %377 : vector<8x64xf32>
    %cst_173 = arith.constant 1.000000e+00 : f32
    %379 = vector.broadcast %cst_173 : f32 to vector<8x64xf32>
    %380 = arith.addf %379, %378 : vector<8x64xf32>
    %381 = arith.divf %379, %380 : vector<8x64xf32>
    %382 = vector.extract_strided_slice %375 {offsets = [0, 64], sizes = [8, 64], strides = [1, 1]} : vector<8x256xf32> to vector<8x64xf32>
    %383 = arith.negf %382 : vector<8x64xf32>
    %384 = math.exp %383 : vector<8x64xf32>
    %cst_174 = arith.constant 1.000000e+00 : f32
    %385 = vector.broadcast %cst_174 : f32 to vector<8x64xf32>
    %386 = arith.addf %385, %384 : vector<8x64xf32>
    %387 = arith.divf %385, %386 : vector<8x64xf32>
    %388 = vector.extract_strided_slice %375 {offsets = [0, 128], sizes = [8, 64], strides = [1, 1]} : vector<8x256xf32> to vector<8x64xf32>
    %389 = math.tanh %388 : vector<8x64xf32>
    %390 = vector.extract_strided_slice %375 {offsets = [0, 192], sizes = [8, 64], strides = [1, 1]} : vector<8x256xf32> to vector<8x64xf32>
    %391 = arith.negf %390 : vector<8x64xf32>
    %392 = math.exp %391 : vector<8x64xf32>
    %cst_175 = arith.constant 1.000000e+00 : f32
    %393 = vector.broadcast %cst_175 : f32 to vector<8x64xf32>
    %394 = arith.addf %393, %392 : vector<8x64xf32>
    %395 = arith.divf %393, %394 : vector<8x64xf32>
    %396 = arith.mulf %387, %51 : vector<8x64xf32>
    %397 = arith.mulf %381, %389 : vector<8x64xf32>
    %398 = arith.addf %396, %397 : vector<8x64xf32>
    %399 = math.tanh %398 : vector<8x64xf32>
    %400 = arith.mulf %395, %399 : vector<8x64xf32>
    %401 = arith.maximumf %370, %400 : vector<8x64xf32>
    %c1_i32_176 = arith.constant 1 : i32
    %402 = arith.index_cast %c1_i32_176 : i32 to index
    %c0_177 = arith.constant 0 : index
    %c0_178 = arith.constant 0 : index
    %403 = vector.load %arg20[%402, %c0_177, %c0_178] : memref<8x8x256xf32, #tpu.memory_space<vmem>>, vector<1x8x256xf32>
    %404 = vector.shape_cast %403 : vector<1x8x256xf32> to vector<8x256xf32>
    %cst_179 = arith.constant dense<0.000000e+00> : vector<8x256xf32>
    %405 = tpu.matmul %400, %50, %cst_179 {dimension_numbers = #tpu.dot_dimension_numbers<[1], [0], [0], [1], [0, 0, 1, 1], [], []>} : vector<8x64xf32>, vector<64x256xf32>, vector<8x256xf32> -> vector<8x256xf32>
    %406 = arith.addf %404, %405 : vector<8x256xf32>
    %407 = vector.extract_strided_slice %406 {offsets = [0, 0], sizes = [8, 64], strides = [1, 1]} : vector<8x256xf32> to vector<8x64xf32>
    %408 = arith.negf %407 : vector<8x64xf32>
    %409 = math.exp %408 : vector<8x64xf32>
    %cst_180 = arith.constant 1.000000e+00 : f32
    %410 = vector.broadcast %cst_180 : f32 to vector<8x64xf32>
    %411 = arith.addf %410, %409 : vector<8x64xf32>
    %412 = arith.divf %410, %411 : vector<8x64xf32>
    %413 = vector.extract_strided_slice %406 {offsets = [0, 64], sizes = [8, 64], strides = [1, 1]} : vector<8x256xf32> to vector<8x64xf32>
    %414 = arith.negf %413 : vector<8x64xf32>
    %415 = math.exp %414 : vector<8x64xf32>
    %cst_181 = arith.constant 1.000000e+00 : f32
    %416 = vector.broadcast %cst_181 : f32 to vector<8x64xf32>
    %417 = arith.addf %416, %415 : vector<8x64xf32>
    %418 = arith.divf %416, %417 : vector<8x64xf32>
    %419 = vector.extract_strided_slice %406 {offsets = [0, 128], sizes = [8, 64], strides = [1, 1]} : vector<8x256xf32> to vector<8x64xf32>
    %420 = math.tanh %419 : vector<8x64xf32>
    %421 = vector.extract_strided_slice %406 {offsets = [0, 192], sizes = [8, 64], strides = [1, 1]} : vector<8x256xf32> to vector<8x64xf32>
    %422 = arith.negf %421 : vector<8x64xf32>
    %423 = math.exp %422 : vector<8x64xf32>
    %cst_182 = arith.constant 1.000000e+00 : f32
    %424 = vector.broadcast %cst_182 : f32 to vector<8x64xf32>
    %425 = arith.addf %424, %423 : vector<8x64xf32>
    %426 = arith.divf %424, %425 : vector<8x64xf32>
    %427 = arith.mulf %418, %398 : vector<8x64xf32>
    %428 = arith.mulf %412, %420 : vector<8x64xf32>
    %429 = arith.addf %427, %428 : vector<8x64xf32>
    %430 = math.tanh %429 : vector<8x64xf32>
    %431 = arith.mulf %426, %430 : vector<8x64xf32>
    %432 = arith.maximumf %401, %431 : vector<8x64xf32>
    %c2_i32_183 = arith.constant 2 : i32
    %433 = arith.index_cast %c2_i32_183 : i32 to index
    %c0_184 = arith.constant 0 : index
    %c0_185 = arith.constant 0 : index
    %434 = vector.load %arg20[%433, %c0_184, %c0_185] : memref<8x8x256xf32, #tpu.memory_space<vmem>>, vector<1x8x256xf32>
    %435 = vector.shape_cast %434 : vector<1x8x256xf32> to vector<8x256xf32>
    %cst_186 = arith.constant dense<0.000000e+00> : vector<8x256xf32>
    %436 = tpu.matmul %431, %50, %cst_186 {dimension_numbers = #tpu.dot_dimension_numbers<[1], [0], [0], [1], [0, 0, 1, 1], [], []>} : vector<8x64xf32>, vector<64x256xf32>, vector<8x256xf32> -> vector<8x256xf32>
    %437 = arith.addf %435, %436 : vector<8x256xf32>
    %438 = vector.extract_strided_slice %437 {offsets = [0, 0], sizes = [8, 64], strides = [1, 1]} : vector<8x256xf32> to vector<8x64xf32>
    %439 = arith.negf %438 : vector<8x64xf32>
    %440 = math.exp %439 : vector<8x64xf32>
    %cst_187 = arith.constant 1.000000e+00 : f32
    %441 = vector.broadcast %cst_187 : f32 to vector<8x64xf32>
    %442 = arith.addf %441, %440 : vector<8x64xf32>
    %443 = arith.divf %441, %442 : vector<8x64xf32>
    %444 = vector.extract_strided_slice %437 {offsets = [0, 64], sizes = [8, 64], strides = [1, 1]} : vector<8x256xf32> to vector<8x64xf32>
    %445 = arith.negf %444 : vector<8x64xf32>
    %446 = math.exp %445 : vector<8x64xf32>
    %cst_188 = arith.constant 1.000000e+00 : f32
    %447 = vector.broadcast %cst_188 : f32 to vector<8x64xf32>
    %448 = arith.addf %447, %446 : vector<8x64xf32>
    %449 = arith.divf %447, %448 : vector<8x64xf32>
    %450 = vector.extract_strided_slice %437 {offsets = [0, 128], sizes = [8, 64], strides = [1, 1]} : vector<8x256xf32> to vector<8x64xf32>
    %451 = math.tanh %450 : vector<8x64xf32>
    %452 = vector.extract_strided_slice %437 {offsets = [0, 192], sizes = [8, 64], strides = [1, 1]} : vector<8x256xf32> to vector<8x64xf32>
    %453 = arith.negf %452 : vector<8x64xf32>
    %454 = math.exp %453 : vector<8x64xf32>
    %cst_189 = arith.constant 1.000000e+00 : f32
    %455 = vector.broadcast %cst_189 : f32 to vector<8x64xf32>
    %456 = arith.addf %455, %454 : vector<8x64xf32>
    %457 = arith.divf %455, %456 : vector<8x64xf32>
    %458 = arith.mulf %449, %429 : vector<8x64xf32>
    %459 = arith.mulf %443, %451 : vector<8x64xf32>
    %460 = arith.addf %458, %459 : vector<8x64xf32>
    %461 = math.tanh %460 : vector<8x64xf32>
    %462 = arith.mulf %457, %461 : vector<8x64xf32>
    %463 = arith.maximumf %432, %462 : vector<8x64xf32>
    %c3_i32_190 = arith.constant 3 : i32
    %464 = arith.index_cast %c3_i32_190 : i32 to index
    %c0_191 = arith.constant 0 : index
    %c0_192 = arith.constant 0 : index
    %465 = vector.load %arg20[%464, %c0_191, %c0_192] : memref<8x8x256xf32, #tpu.memory_space<vmem>>, vector<1x8x256xf32>
    %466 = vector.shape_cast %465 : vector<1x8x256xf32> to vector<8x256xf32>
    %cst_193 = arith.constant dense<0.000000e+00> : vector<8x256xf32>
    %467 = tpu.matmul %462, %50, %cst_193 {dimension_numbers = #tpu.dot_dimension_numbers<[1], [0], [0], [1], [0, 0, 1, 1], [], []>} : vector<8x64xf32>, vector<64x256xf32>, vector<8x256xf32> -> vector<8x256xf32>
    %468 = arith.addf %466, %467 : vector<8x256xf32>
    %469 = vector.extract_strided_slice %468 {offsets = [0, 0], sizes = [8, 64], strides = [1, 1]} : vector<8x256xf32> to vector<8x64xf32>
    %470 = arith.negf %469 : vector<8x64xf32>
    %471 = math.exp %470 : vector<8x64xf32>
    %cst_194 = arith.constant 1.000000e+00 : f32
    %472 = vector.broadcast %cst_194 : f32 to vector<8x64xf32>
    %473 = arith.addf %472, %471 : vector<8x64xf32>
    %474 = arith.divf %472, %473 : vector<8x64xf32>
    %475 = vector.extract_strided_slice %468 {offsets = [0, 64], sizes = [8, 64], strides = [1, 1]} : vector<8x256xf32> to vector<8x64xf32>
    %476 = arith.negf %475 : vector<8x64xf32>
    %477 = math.exp %476 : vector<8x64xf32>
    %cst_195 = arith.constant 1.000000e+00 : f32
    %478 = vector.broadcast %cst_195 : f32 to vector<8x64xf32>
    %479 = arith.addf %478, %477 : vector<8x64xf32>
    %480 = arith.divf %478, %479 : vector<8x64xf32>
    %481 = vector.extract_strided_slice %468 {offsets = [0, 128], sizes = [8, 64], strides = [1, 1]} : vector<8x256xf32> to vector<8x64xf32>
    %482 = math.tanh %481 : vector<8x64xf32>
    %483 = vector.extract_strided_slice %468 {offsets = [0, 192], sizes = [8, 64], strides = [1, 1]} : vector<8x256xf32> to vector<8x64xf32>
    %484 = arith.negf %483 : vector<8x64xf32>
    %485 = math.exp %484 : vector<8x64xf32>
    %cst_196 = arith.constant 1.000000e+00 : f32
    %486 = vector.broadcast %cst_196 : f32 to vector<8x64xf32>
    %487 = arith.addf %486, %485 : vector<8x64xf32>
    %488 = arith.divf %486, %487 : vector<8x64xf32>
    %489 = arith.mulf %480, %460 : vector<8x64xf32>
    %490 = arith.mulf %474, %482 : vector<8x64xf32>
    %491 = arith.addf %489, %490 : vector<8x64xf32>
    %492 = math.tanh %491 : vector<8x64xf32>
    %493 = arith.mulf %488, %492 : vector<8x64xf32>
    %494 = arith.maximumf %463, %493 : vector<8x64xf32>
    %c4_i32_197 = arith.constant 4 : i32
    %495 = arith.index_cast %c4_i32_197 : i32 to index
    %c0_198 = arith.constant 0 : index
    %c0_199 = arith.constant 0 : index
    %496 = vector.load %arg20[%495, %c0_198, %c0_199] : memref<8x8x256xf32, #tpu.memory_space<vmem>>, vector<1x8x256xf32>
    %497 = vector.shape_cast %496 : vector<1x8x256xf32> to vector<8x256xf32>
    %cst_200 = arith.constant dense<0.000000e+00> : vector<8x256xf32>
    %498 = tpu.matmul %493, %50, %cst_200 {dimension_numbers = #tpu.dot_dimension_numbers<[1], [0], [0], [1], [0, 0, 1, 1], [], []>} : vector<8x64xf32>, vector<64x256xf32>, vector<8x256xf32> -> vector<8x256xf32>
    %499 = arith.addf %497, %498 : vector<8x256xf32>
    %500 = vector.extract_strided_slice %499 {offsets = [0, 0], sizes = [8, 64], strides = [1, 1]} : vector<8x256xf32> to vector<8x64xf32>
    %501 = arith.negf %500 : vector<8x64xf32>
    %502 = math.exp %501 : vector<8x64xf32>
    %cst_201 = arith.constant 1.000000e+00 : f32
    %503 = vector.broadcast %cst_201 : f32 to vector<8x64xf32>
    %504 = arith.addf %503, %502 : vector<8x64xf32>
    %505 = arith.divf %503, %504 : vector<8x64xf32>
    %506 = vector.extract_strided_slice %499 {offsets = [0, 64], sizes = [8, 64], strides = [1, 1]} : vector<8x256xf32> to vector<8x64xf32>
    %507 = arith.negf %506 : vector<8x64xf32>
    %508 = math.exp %507 : vector<8x64xf32>
    %cst_202 = arith.constant 1.000000e+00 : f32
    %509 = vector.broadcast %cst_202 : f32 to vector<8x64xf32>
    %510 = arith.addf %509, %508 : vector<8x64xf32>
    %511 = arith.divf %509, %510 : vector<8x64xf32>
    %512 = vector.extract_strided_slice %499 {offsets = [0, 128], sizes = [8, 64], strides = [1, 1]} : vector<8x256xf32> to vector<8x64xf32>
    %513 = math.tanh %512 : vector<8x64xf32>
    %514 = vector.extract_strided_slice %499 {offsets = [0, 192], sizes = [8, 64], strides = [1, 1]} : vector<8x256xf32> to vector<8x64xf32>
    %515 = arith.negf %514 : vector<8x64xf32>
    %516 = math.exp %515 : vector<8x64xf32>
    %cst_203 = arith.constant 1.000000e+00 : f32
    %517 = vector.broadcast %cst_203 : f32 to vector<8x64xf32>
    %518 = arith.addf %517, %516 : vector<8x64xf32>
    %519 = arith.divf %517, %518 : vector<8x64xf32>
    %520 = arith.mulf %511, %491 : vector<8x64xf32>
    %521 = arith.mulf %505, %513 : vector<8x64xf32>
    %522 = arith.addf %520, %521 : vector<8x64xf32>
    %523 = math.tanh %522 : vector<8x64xf32>
    %524 = arith.mulf %519, %523 : vector<8x64xf32>
    %525 = arith.maximumf %494, %524 : vector<8x64xf32>
    %c5_i32_204 = arith.constant 5 : i32
    %526 = arith.index_cast %c5_i32_204 : i32 to index
    %c0_205 = arith.constant 0 : index
    %c0_206 = arith.constant 0 : index
    %527 = vector.load %arg20[%526, %c0_205, %c0_206] : memref<8x8x256xf32, #tpu.memory_space<vmem>>, vector<1x8x256xf32>
    %528 = vector.shape_cast %527 : vector<1x8x256xf32> to vector<8x256xf32>
    %cst_207 = arith.constant dense<0.000000e+00> : vector<8x256xf32>
    %529 = tpu.matmul %524, %50, %cst_207 {dimension_numbers = #tpu.dot_dimension_numbers<[1], [0], [0], [1], [0, 0, 1, 1], [], []>} : vector<8x64xf32>, vector<64x256xf32>, vector<8x256xf32> -> vector<8x256xf32>
    %530 = arith.addf %528, %529 : vector<8x256xf32>
    %531 = vector.extract_strided_slice %530 {offsets = [0, 0], sizes = [8, 64], strides = [1, 1]} : vector<8x256xf32> to vector<8x64xf32>
    %532 = arith.negf %531 : vector<8x64xf32>
    %533 = math.exp %532 : vector<8x64xf32>
    %cst_208 = arith.constant 1.000000e+00 : f32
    %534 = vector.broadcast %cst_208 : f32 to vector<8x64xf32>
    %535 = arith.addf %534, %533 : vector<8x64xf32>
    %536 = arith.divf %534, %535 : vector<8x64xf32>
    %537 = vector.extract_strided_slice %530 {offsets = [0, 64], sizes = [8, 64], strides = [1, 1]} : vector<8x256xf32> to vector<8x64xf32>
    %538 = arith.negf %537 : vector<8x64xf32>
    %539 = math.exp %538 : vector<8x64xf32>
    %cst_209 = arith.constant 1.000000e+00 : f32
    %540 = vector.broadcast %cst_209 : f32 to vector<8x64xf32>
    %541 = arith.addf %540, %539 : vector<8x64xf32>
    %542 = arith.divf %540, %541 : vector<8x64xf32>
    %543 = vector.extract_strided_slice %530 {offsets = [0, 128], sizes = [8, 64], strides = [1, 1]} : vector<8x256xf32> to vector<8x64xf32>
    %544 = math.tanh %543 : vector<8x64xf32>
    %545 = vector.extract_strided_slice %530 {offsets = [0, 192], sizes = [8, 64], strides = [1, 1]} : vector<8x256xf32> to vector<8x64xf32>
    %546 = arith.negf %545 : vector<8x64xf32>
    %547 = math.exp %546 : vector<8x64xf32>
    %cst_210 = arith.constant 1.000000e+00 : f32
    %548 = vector.broadcast %cst_210 : f32 to vector<8x64xf32>
    %549 = arith.addf %548, %547 : vector<8x64xf32>
    %550 = arith.divf %548, %549 : vector<8x64xf32>
    %551 = arith.mulf %542, %522 : vector<8x64xf32>
    %552 = arith.mulf %536, %544 : vector<8x64xf32>
    %553 = arith.addf %551, %552 : vector<8x64xf32>
    %554 = math.tanh %553 : vector<8x64xf32>
    %555 = arith.mulf %550, %554 : vector<8x64xf32>
    %556 = arith.maximumf %525, %555 : vector<8x64xf32>
    %c6_i32_211 = arith.constant 6 : i32
    %557 = arith.index_cast %c6_i32_211 : i32 to index
    %c0_212 = arith.constant 0 : index
    %c0_213 = arith.constant 0 : index
    %558 = vector.load %arg20[%557, %c0_212, %c0_213] : memref<8x8x256xf32, #tpu.memory_space<vmem>>, vector<1x8x256xf32>
    %559 = vector.shape_cast %558 : vector<1x8x256xf32> to vector<8x256xf32>
    %cst_214 = arith.constant dense<0.000000e+00> : vector<8x256xf32>
    %560 = tpu.matmul %555, %50, %cst_214 {dimension_numbers = #tpu.dot_dimension_numbers<[1], [0], [0], [1], [0, 0, 1, 1], [], []>} : vector<8x64xf32>, vector<64x256xf32>, vector<8x256xf32> -> vector<8x256xf32>
    %561 = arith.addf %559, %560 : vector<8x256xf32>
    %562 = vector.extract_strided_slice %561 {offsets = [0, 0], sizes = [8, 64], strides = [1, 1]} : vector<8x256xf32> to vector<8x64xf32>
    %563 = arith.negf %562 : vector<8x64xf32>
    %564 = math.exp %563 : vector<8x64xf32>
    %cst_215 = arith.constant 1.000000e+00 : f32
    %565 = vector.broadcast %cst_215 : f32 to vector<8x64xf32>
    %566 = arith.addf %565, %564 : vector<8x64xf32>
    %567 = arith.divf %565, %566 : vector<8x64xf32>
    %568 = vector.extract_strided_slice %561 {offsets = [0, 64], sizes = [8, 64], strides = [1, 1]} : vector<8x256xf32> to vector<8x64xf32>
    %569 = arith.negf %568 : vector<8x64xf32>
    %570 = math.exp %569 : vector<8x64xf32>
    %cst_216 = arith.constant 1.000000e+00 : f32
    %571 = vector.broadcast %cst_216 : f32 to vector<8x64xf32>
    %572 = arith.addf %571, %570 : vector<8x64xf32>
    %573 = arith.divf %571, %572 : vector<8x64xf32>
    %574 = vector.extract_strided_slice %561 {offsets = [0, 128], sizes = [8, 64], strides = [1, 1]} : vector<8x256xf32> to vector<8x64xf32>
    %575 = math.tanh %574 : vector<8x64xf32>
    %576 = vector.extract_strided_slice %561 {offsets = [0, 192], sizes = [8, 64], strides = [1, 1]} : vector<8x256xf32> to vector<8x64xf32>
    %577 = arith.negf %576 : vector<8x64xf32>
    %578 = math.exp %577 : vector<8x64xf32>
    %cst_217 = arith.constant 1.000000e+00 : f32
    %579 = vector.broadcast %cst_217 : f32 to vector<8x64xf32>
    %580 = arith.addf %579, %578 : vector<8x64xf32>
    %581 = arith.divf %579, %580 : vector<8x64xf32>
    %582 = arith.mulf %573, %553 : vector<8x64xf32>
    %583 = arith.mulf %567, %575 : vector<8x64xf32>
    %584 = arith.addf %582, %583 : vector<8x64xf32>
    %585 = math.tanh %584 : vector<8x64xf32>
    %586 = arith.mulf %581, %585 : vector<8x64xf32>
    %587 = arith.maximumf %556, %586 : vector<8x64xf32>
    %c7_i32_218 = arith.constant 7 : i32
    %588 = arith.index_cast %c7_i32_218 : i32 to index
    %c0_219 = arith.constant 0 : index
    %c0_220 = arith.constant 0 : index
    %589 = vector.load %arg20[%588, %c0_219, %c0_220] : memref<8x8x256xf32, #tpu.memory_space<vmem>>, vector<1x8x256xf32>
    %590 = vector.shape_cast %589 : vector<1x8x256xf32> to vector<8x256xf32>
    %cst_221 = arith.constant dense<0.000000e+00> : vector<8x256xf32>
    %591 = tpu.matmul %586, %50, %cst_221 {dimension_numbers = #tpu.dot_dimension_numbers<[1], [0], [0], [1], [0, 0, 1, 1], [], []>} : vector<8x64xf32>, vector<64x256xf32>, vector<8x256xf32> -> vector<8x256xf32>
    %592 = arith.addf %590, %591 : vector<8x256xf32>
    %593 = vector.extract_strided_slice %592 {offsets = [0, 0], sizes = [8, 64], strides = [1, 1]} : vector<8x256xf32> to vector<8x64xf32>
    %594 = arith.negf %593 : vector<8x64xf32>
    %595 = math.exp %594 : vector<8x64xf32>
    %cst_222 = arith.constant 1.000000e+00 : f32
    %596 = vector.broadcast %cst_222 : f32 to vector<8x64xf32>
    %597 = arith.addf %596, %595 : vector<8x64xf32>
    %598 = arith.divf %596, %597 : vector<8x64xf32>
    %599 = vector.extract_strided_slice %592 {offsets = [0, 64], sizes = [8, 64], strides = [1, 1]} : vector<8x256xf32> to vector<8x64xf32>
    %600 = arith.negf %599 : vector<8x64xf32>
    %601 = math.exp %600 : vector<8x64xf32>
    %cst_223 = arith.constant 1.000000e+00 : f32
    %602 = vector.broadcast %cst_223 : f32 to vector<8x64xf32>
    %603 = arith.addf %602, %601 : vector<8x64xf32>
    %604 = arith.divf %602, %603 : vector<8x64xf32>
    %605 = vector.extract_strided_slice %592 {offsets = [0, 128], sizes = [8, 64], strides = [1, 1]} : vector<8x256xf32> to vector<8x64xf32>
    %606 = math.tanh %605 : vector<8x64xf32>
    %607 = vector.extract_strided_slice %592 {offsets = [0, 192], sizes = [8, 64], strides = [1, 1]} : vector<8x256xf32> to vector<8x64xf32>
    %608 = arith.negf %607 : vector<8x64xf32>
    %609 = math.exp %608 : vector<8x64xf32>
    %cst_224 = arith.constant 1.000000e+00 : f32
    %610 = vector.broadcast %cst_224 : f32 to vector<8x64xf32>
    %611 = arith.addf %610, %609 : vector<8x64xf32>
    %612 = arith.divf %610, %611 : vector<8x64xf32>
    %613 = arith.mulf %604, %584 : vector<8x64xf32>
    %614 = arith.mulf %598, %606 : vector<8x64xf32>
    %615 = arith.addf %613, %614 : vector<8x64xf32>
    %616 = math.tanh %615 : vector<8x64xf32>
    %617 = arith.mulf %612, %616 : vector<8x64xf32>
    %618 = arith.maximumf %587, %617 : vector<8x64xf32>
    %c8_i32_225 = arith.constant 8 : i32
    %c0_226 = arith.constant 0 : index
    %c0_227 = arith.constant 0 : index
    %619 = vector.load %arg12[%c0_226, %c0_227] : memref<64x512xf32, #tpu.memory_space<vmem>>, vector<64x512xf32>
    %cst_228 = arith.constant dense<0.000000e+00> : vector<8x512xf32>
    %620 = tpu.matmul %618, %619, %cst_228 {dimension_numbers = #tpu.dot_dimension_numbers<[1], [0], [0], [1], [0, 0, 1, 1], [], []>} : vector<8x64xf32>, vector<64x512xf32>, vector<8x512xf32> -> vector<8x512xf32>
    %c0_229 = arith.constant 0 : index
    %c0_230 = arith.constant 0 : index
    %621 = vector.load %arg13[%c0_229, %c0_230] : memref<1x512xf32, #tpu.memory_space<vmem>>, vector<1x512xf32>
    %622 = vector.broadcast %621 : vector<1x512xf32> to vector<8x512xf32>
    %623 = arith.addf %620, %622 : vector<8x512xf32>
    %cst_231 = arith.constant 0.000000e+00 : f32
    %624 = vector.broadcast %cst_231 : f32 to vector<8x512xf32>
    %625 = arith.maximumf %623, %624 : vector<8x512xf32>
    %c0_232 = arith.constant 0 : index
    %c0_233 = arith.constant 0 : index
    %626 = vector.load %arg14[%c0_232, %c0_233] : memref<512x256xf32, #tpu.memory_space<vmem>>, vector<512x256xf32>
    %cst_234 = arith.constant dense<0.000000e+00> : vector<8x256xf32>
    %627 = tpu.matmul %625, %626, %cst_234 {dimension_numbers = #tpu.dot_dimension_numbers<[1], [0], [0], [1], [0, 0, 1, 1], [], []>} : vector<8x512xf32>, vector<512x256xf32>, vector<8x256xf32> -> vector<8x256xf32>
    %c0_235 = arith.constant 0 : index
    %c0_236 = arith.constant 0 : index
    %628 = vector.load %arg15[%c0_235, %c0_236] : memref<1x256xf32, #tpu.memory_space<vmem>>, vector<1x256xf32>
    %629 = vector.broadcast %628 : vector<1x256xf32> to vector<8x256xf32>
    %630 = arith.addf %627, %629 : vector<8x256xf32>
    %cst_237 = arith.constant 0.000000e+00 : f32
    %631 = vector.broadcast %cst_237 : f32 to vector<8x256xf32>
    %632 = arith.maximumf %630, %631 : vector<8x256xf32>
    %c0_238 = arith.constant 0 : index
    %c0_239 = arith.constant 0 : index
    %633 = vector.load %arg16[%c0_238, %c0_239] : memref<256x2xf32, #tpu.memory_space<vmem>>, vector<256x2xf32>
    %cst_240 = arith.constant dense<0.000000e+00> : vector<8x2xf32>
    %634 = tpu.matmul %632, %633, %cst_240 {dimension_numbers = #tpu.dot_dimension_numbers<[1], [0], [0], [1], [0, 0, 1, 1], [], []>} : vector<8x256xf32>, vector<256x2xf32>, vector<8x2xf32> -> vector<8x2xf32>
    %c0_241 = arith.constant 0 : index
    %c0_242 = arith.constant 0 : index
    %635 = vector.load %arg17[%c0_241, %c0_242] : memref<1x2xf32, #tpu.memory_space<vmem>>, vector<1x2xf32>
    %636 = vector.broadcast %635 : vector<1x2xf32> to vector<8x2xf32>
    %637 = arith.addf %634, %636 : vector<8x2xf32>
    %cst_243 = arith.constant dense<0xFF800000> : vector<8xf32>
    %638 = vector.multi_reduction <maximumf>, %637, %cst_243 [1] : vector<8x2xf32> to vector<8xf32>
    %639 = vector.shape_cast %638 : vector<8xf32> to vector<8x1xf32>
    %640 = vector.broadcast %639 : vector<8x1xf32> to vector<8x2xf32>
    %641 = arith.subf %637, %640 : vector<8x2xf32>
    %642 = math.exp %641 : vector<8x2xf32>
    %cst_244 = arith.constant dense<0.000000e+00> : vector<8xf32>
    %643 = vector.multi_reduction <add>, %642, %cst_244 [1] : vector<8x2xf32> to vector<8xf32>
    %644 = vector.shape_cast %643 : vector<8xf32> to vector<8x1xf32>
    %645 = math.log %644 : vector<8x1xf32>
    %646 = vector.broadcast %645 : vector<8x1xf32> to vector<8x2xf32>
    %647 = arith.subf %641, %646 : vector<8x2xf32>
    %c0_245 = arith.constant 0 : index
    %c0_246 = arith.constant 0 : index
    %648 = vector.load %arg18[%c0_245, %c0_246] : memref<8x2xf32, #tpu.memory_space<vmem>>, vector<8x2xf32>
    tpu.vector_store %arg18[%c0_245, %c0_246], %647 {strides = array<i32>} : memref<8x2xf32, #tpu.memory_space<vmem>>, vector<8x2xf32>,
    return
  }
}

</mosaic_0001>

<bundles_post_ra>
// kernel: tpu_custom_call.1
= control target key start
LH: loop header
LB: loop body
LE: loop exit
PB: predicated region body
PF: predicated region fallthrough
CT: control target
= control target key end

     0   :  { %s5776_s0 = inlined_call_operand.hbm [shape: f32[8,8,10], index: 0, kind: input, shape index: {}]   ;;  %s5777_s1 = inlined_call_operand.hbm [shape: f32[8,8,10], index: 1, kind: input, shape index: {}]   ;;  %s5778_s2 = inlined_call_operand.vmem [shape: f32[1,10], index: 2, kind: input, shape index: {}]   ;;  %s5779_s3 = inlined_call_operand.vmem [shape: f32[1,10], index: 3, kind: input, shape index: {}]   ;;  %s5780_s4 = inlined_call_operand.vmem [shape: f32[10,256], index: 4, kind: input, shape index: {}]   ;;  %s5781_s5 = inlined_call_operand.hbm [shape: f32[10,256], index: 5, kind: input, shape index: {}]   ;;  %s5782_s6 = inlined_call_operand.vmem [shape: f32[1,256], index: 6, kind: input, shape index: {}]   ;;  %s5783_s7 = inlined_call_operand.hbm [shape: f32[64,256], index: 7, kind: input, shape index: {}]   ;;  %s5784_s8 = inlined_call_operand.hbm [shape: f32[64,256], index: 8, kind: input, shape index: {}]   ;;  %s5785_s9 = inlined_call_operand.hbm [shape: f32[64,256], index: 9, kind: input, shape index: {}]   ;;  %s5786_s10 = inlined_call_operand.vmem [shape: f32[1,256], index: 10, kind: input, shape index: {}]   ;;  %s5787_s11 = inlined_call_operand.hbm [shape: f32[64,256], index: 11, kind: input, shape index: {}]   ;;  %s5788_s12 = inlined_call_operand.vmem [shape: f32[64,512], index: 12, kind: input, shape index: {}]   ;;  %s5789_s13 = inlined_call_operand.vmem [shape: f32[1,512], index: 13, kind: input, shape index: {}]   ;;  %s5790_s14 = inlined_call_operand.hbm [shape: f32[512,256], index: 14, kind: input, shape index: {}]   ;;  %s5791_s15 = inlined_call_operand.vmem [shape: f32[1,256], index: 15, kind: input, shape index: {}]   ;;  %s5792_s16 = inlined_call_operand.vmem [shape: f32[256,2], index: 16, kind: input, shape index: {}]   ;;  %s5793_s17 = inlined_call_operand.vmem [shape: f32[1,2], index: 17, kind: input, shape index: {}]   ;;  %s5794_s18 = inlined_call_operand.vmem [shape: f32[8,2], index: 18, kind: output, shape index: {}]  }
   0x1   :  { %5798 = sst [smem:[#allocation24_spill]] %s5776_s0 }
   0x2   :  { %5799 = sst [smem:[#allocation25_spill]] %s5777_s1 }
   0x3   :  { %5800 = sst [smem:[#allocation26_spill]] %s5778_s2 }
   0x4   :  { %5801 = sst [smem:[#allocation27_spill]] %s5793_s17 }
   0x5   :  { %5802 = sst [smem:[#allocation28_spill]] %s5794_s18 }
   0x6   :  { %23 = vsyncpa [#allocation7], 0 }
   0x7   :  { %24 = vsyncpa [#allocation9], 0 }
   0x8   :  { %25 = vsyncpa [#allocation12], 0 }
   0x9   :  { %26 = vsyncpa [#allocation15], 0 }
   0xa   :  { %27 = vsyncpa [#allocation18], 0  ;;  %s4735_s27 = smov [#allocation8]   ;;  %s5803_s0 = sld [smem:[#allocation25_spill]] }
   0xb   :  { %s45_s28 = sshll.u32 %s4735_s27, 4  ;;  %s46_s28 = int_to_ptr.vmem [resolvable:$true] %s45_s28 }
  0x10   :  { %s4549_s19 = scalar_lea.hbm %s5803_s0, 1024 }
  0x11   :  { %p4550_p0 = scmp.ne.s32.totalorder %s5803_s0, %s4549_s19  ;;  %p4553_p1 = scmp.lt.u32.totalorder %s4549_s19, %s5803_s0 }
  0x13   :  { %p4555_p2 = pnand %p4553_p1, %p4550_p0 }
  0x15   :  { %4558 = shalt.err (!%p4555_p2)
}
  0x16   :  { %s4559_s2 = scalar_lea.vmem %s46_s28, 1024  ;;  %p4564_p4 = scmp.lt.s32.totalorder %s46_s28, %s46_s28 }
  0x17   :  { %p4560_p3 = scmp.ne.s32.totalorder %s46_s28, %s4559_s2  ;;  %p4565_p5 = scmp.lt.s32.totalorder %s4559_s2, %s4559_s2 }
  0x19   :  { %p4566_p6 = por %p4565_p5, %p4564_p4 }
  0x1b   :  { %p4567_p7 = pnand %p4566_p6, %p4560_p3 }
  0x1d   :  { %4570 = shalt.err (!%p4567_p7)
}
  0x1e   :  { %s5797_s23 = smov 128   ;;  %s4737_s24 = smov 8  }
  0x1f   :  { %51 = dma.hbm_to_vmem [thread:$0]  %s5803_s0, 1024, %s46_s28, [#allocation9], %s5797_s23, %s5797_s23, %s4737_s24  }
  0x20   :  { %s4738_s27 = smov [#allocation11]   ;;  %s4739_s30 = smov [#allocation14]  }
  0x21   :  { %s77_s29 = sshll.u32 %s4738_s27, 4  ;;  %s101_s19 = sshll.u32 %s4739_s30, 4  ;;  %s78_s29 = int_to_ptr.vmem [resolvable:$true] %s77_s29  ;;  %s102_s19 = int_to_ptr.vmem [resolvable:$true] %s101_s19 }
  0x22   :  { %s4571_s21 = scalar_lea.hbm %s5783_s7, 2048 }
  0x23   :  { %p4572_p8 = scmp.ne.s32.totalorder %s5783_s7, %s4571_s21  ;;  %p4575_p9 = scmp.lt.u32.totalorder %s4571_s21, %s5783_s7 }
  0x25   :  { %p4577_p10 = pnand %p4575_p9, %p4572_p8 }
  0x27   :  { %4580 = shalt.err (!%p4577_p10)
}
  0x28   :  { %s4581_s28 = scalar_lea.vmem %s78_s29, 2048  ;;  %p4586_p12 = scmp.lt.s32.totalorder %s78_s29, %s78_s29 }
  0x29   :  { %p4582_p11 = scmp.ne.s32.totalorder %s78_s29, %s4581_s28  ;;  %p4587_p13 = scmp.lt.s32.totalorder %s4581_s28, %s4581_s28 }
  0x2b   :  { %p4588_p0 = por %p4587_p13, %p4586_p12 }
  0x2d   :  { %p4589_p1 = pnand %p4588_p0, %p4582_p11 }
  0x2f   :  { %4592 = shalt.err (!%p4589_p1)
}
  0x30   :  { %s4740_s0 = smov 256   ;;  %s4741_s25 = smov 16  }
  0x31   :  { %83 = dma.hbm_to_vmem [thread:$0]  %s5783_s7, 2048, %s78_s29, [#allocation12], %s4740_s0, %s4740_s0, %s4741_s25  }
  0x32   :  { %s4593_s30 = scalar_lea.hbm %s5785_s9, 2048 }
  0x33   :  { %p4594_p2 = scmp.ne.s32.totalorder %s5785_s9, %s4593_s30  ;;  %p4597_p3 = scmp.lt.u32.totalorder %s4593_s30, %s5785_s9 }
  0x35   :  { %p4599_p4 = pnand %p4597_p3, %p4594_p2 }
  0x37   :  { %4602 = shalt.err (!%p4599_p4)
}
  0x38   :  { %s4603_s2 = scalar_lea.vmem %s102_s19, 2048  ;;  %p4608_p6 = scmp.lt.s32.totalorder %s102_s19, %s102_s19 }
  0x39   :  { %p4604_p5 = scmp.ne.s32.totalorder %s102_s19, %s4603_s2  ;;  %p4609_p7 = scmp.lt.s32.totalorder %s4603_s2, %s4603_s2 }
  0x3b   :  { %p4610_p8 = por %p4609_p7, %p4608_p6 }
  0x3d   :  { %p4611_p9 = pnand %p4610_p8, %p4604_p5 }
  0x3f   :  { %4614 = shalt.err (!%p4611_p9)
}
  0x40   :  { %107 = dma.hbm_to_vmem [thread:$0]  %s5785_s9, 2048, %s102_s19, [#allocation15], %s4740_s0, %s4740_s0, %s4741_s25  }
  0x41   :  { %s4742_s28 = smov [#allocation6]   ;;  %s4743_s27 = smov [#allocation10]  }
  0x42   :  { %s33_s26 = sshll.u32 %s4742_s28, 4  ;;  %s63_s17 = sshll.u32 %s4743_s27, 4  ;;  %s34_s26 = int_to_ptr.vmem [resolvable:$true] %s33_s26  ;;  %s64_s17 = int_to_ptr.vmem [resolvable:$true] %s63_s17 }
  0x43   :  { %s5804_s1 = sld [smem:[#allocation24_spill]] }
  0x49   :  { %s4615_s20 = scalar_lea.hbm %s5804_s1, 1024 }
  0x4a   :  { %p4616_p10 = scmp.ne.s32.totalorder %s5804_s1, %s4615_s20  ;;  %p4619_p11 = scmp.lt.u32.totalorder %s4615_s20, %s5804_s1 }
  0x4c   :  { %p4621_p12 = pnand %p4619_p11, %p4616_p10 }
  0x4e   :  { %4624 = shalt.err (!%p4621_p12)
}
  0x4f   :  { %s4625_s9 = scalar_lea.vmem %s34_s26, 1024  ;;  %p4630_p0 = scmp.lt.s32.totalorder %s34_s26, %s34_s26 }
  0x50   :  { %p4626_p13 = scmp.ne.s32.totalorder %s34_s26, %s4625_s9  ;;  %p4631_p1 = scmp.lt.s32.totalorder %s4625_s9, %s4625_s9 }
  0x52   :  { %p4632_p2 = por %p4631_p1, %p4630_p0 }
  0x54   :  { %p4633_p3 = pnand %p4632_p2, %p4626_p13 }
  0x56   :  { %4636 = shalt.err (!%p4633_p3)
}
  0x57   :  { %s5805_s19 = smov 128   ;;  %s4637_s27 = scalar_lea.hbm %s5781_s5, 512 }
  0x58   :  { %39 = dma.hbm_to_vmem [thread:$0]  %s5804_s1, 1024, %s34_s26, [#allocation7], %s5805_s19, %s5805_s19, %s4737_s24  }
  0x59   :  { %p4638_p4 = scmp.ne.s32.totalorder %s5781_s5, %s4637_s27  ;;  %p4641_p5 = scmp.lt.u32.totalorder %s4637_s27, %s5781_s5 }
  0x5b   :  { %p4643_p6 = pnand %p4641_p5, %p4638_p4 }
  0x5d   :  { %4646 = shalt.err (!%p4643_p6)
}
  0x5e   :  { %s4647_s22 = scalar_lea.vmem %s64_s17, 512  ;;  %p4652_p8 = scmp.lt.s32.totalorder %s64_s17, %s64_s17 }
  0x5f   :  { %p4648_p7 = scmp.ne.s32.totalorder %s64_s17, %s4647_s22  ;;  %p4653_p9 = scmp.lt.s32.totalorder %s4647_s22, %s4647_s22 }
  0x61   :  { %p4654_p10 = por %p4653_p9, %p4652_p8 }
  0x63   :  { %p4655_p11 = pnand %p4654_p10, %p4648_p7 }
  0x65   :  { %4658 = shalt.err (!%p4655_p11)
}
  0x66   :  { %69 = dma.hbm_to_vmem [thread:$0]  %s5781_s5, 512, %s64_s17, [#allocation9], %s4740_s0, %s4740_s0, %s4741_s25  }
  0x67   :  { %s4744_s1 = smov [#allocation13]   ;;  %s4745_s9 = smov [#allocation16]  }
  0x68   :  { %s89_s2 = sshll.u32 %s4744_s1, 4  ;;  %s115_s19 = sshll.u32 %s4745_s9, 4  ;;  %s90_s2 = int_to_ptr.vmem [resolvable:$true] %s89_s2  ;;  %s116_s19 = int_to_ptr.vmem [resolvable:$true] %s115_s19 }
  0x69   :  { %s4659_s28 = scalar_lea.hbm %s5784_s8, 2048 }
  0x6a   :  { %p4660_p12 = scmp.ne.s32.totalorder %s5784_s8, %s4659_s28  ;;  %p4663_p13 = scmp.lt.u32.totalorder %s4659_s28, %s5784_s8 }
  0x6c   :  { %p4665_p0 = pnand %p4663_p13, %p4660_p12 }
  0x6e   :  { %4668 = shalt.err (!%p4665_p0)
}
  0x6f   :  { %s4669_s5 = scalar_lea.vmem %s90_s2, 2048  ;;  %p4674_p2 = scmp.lt.s32.totalorder %s90_s2, %s90_s2 }
  0x70   :  { %p4670_p1 = scmp.ne.s32.totalorder %s90_s2, %s4669_s5  ;;  %p4675_p3 = scmp.lt.s32.totalorder %s4669_s5, %s4669_s5 }
  0x72   :  { %p4676_p4 = por %p4675_p3, %p4674_p2 }
  0x74   :  { %p4677_p5 = pnand %p4676_p4, %p4670_p1 }
  0x76   :  { %4680 = shalt.err (!%p4677_p5)
}
  0x77   :  { %95 = dma.hbm_to_vmem [thread:$0]  %s5784_s8, 2048, %s90_s2, [#allocation12], %s4740_s0, %s4740_s0, %s4741_s25  }
  0x78   :  { %s4681_s24 = scalar_lea.hbm %s5787_s11, 2048 }
  0x79   :  { %p4682_p6 = scmp.ne.s32.totalorder %s5787_s11, %s4681_s24  ;;  %p4685_p7 = scmp.lt.u32.totalorder %s4681_s24, %s5787_s11 }
  0x7b   :  { %p4687_p8 = pnand %p4685_p7, %p4682_p6 }
  0x7d   :  { %4690 = shalt.err (!%p4687_p8)
}
  0x7e   :  { %s4691_s29 = scalar_lea.vmem %s116_s19, 2048  ;;  %p4696_p10 = scmp.lt.s32.totalorder %s116_s19, %s116_s19 }
  0x7f   :  { %p4692_p9 = scmp.ne.s32.totalorder %s116_s19, %s4691_s29  ;;  %p4697_p11 = scmp.lt.s32.totalorder %s4691_s29, %s4691_s29 }
  0x81   :  { %p4698_p12 = por %p4697_p11, %p4696_p10 }
  0x83   :  { %p4699_p13 = pnand %p4698_p12, %p4692_p9 }
  0x85   :  { %4702 = shalt.err (!%p4699_p13)
}
  0x86   :  { %121 = dma.hbm_to_vmem [thread:$0]  %s5787_s11, 2048, %s116_s19, [#allocation15], %s4740_s0, %s4740_s0, %s4741_s25  }
  0x87   :  { %s4746_s28 = smov [#allocation17]   ;;  %s4703_s30 = scalar_lea.hbm %s5790_s14, 16384 }
  0x88   :  { %s131_s23 = sshll.u32 %s4746_s28, 4  ;;  %p4704_p0 = scmp.ne.s32.totalorder %s5790_s14, %s4703_s30  ;;  %s132_s23 = int_to_ptr.vmem [resolvable:$true] %s131_s23 }
  0x89   :  { %p4707_p1 = scmp.lt.u32.totalorder %s4703_s30, %s5790_s14 }
  0x8b   :  { %p4709_p2 = pnand %p4707_p1, %p4704_p0 }
  0x8d   :  { %4712 = shalt.err (!%p4709_p2)
}
  0x8e   :  { %s4713_s22 = scalar_lea.vmem %s132_s23, 16384  ;;  %p4718_p4 = scmp.lt.s32.totalorder %s132_s23, %s132_s23 }
  0x8f   :  { %p4714_p3 = scmp.ne.s32.totalorder %s132_s23, %s4713_s22  ;;  %p4719_p5 = scmp.lt.s32.totalorder %s4713_s22, %s4713_s22 }
  0x91   :  { %p4720_p6 = por %p4719_p5, %p4718_p4 }
  0x93   :  { %p4721_p7 = pnand %p4720_p6, %p4714_p3 }
  0x95   :  { %4724 = shalt.err (!%p4721_p7)
}
  0x96   :  { %137 = dma.hbm_to_vmem [thread:$0]  %s5790_s14, 16384, %s132_s23, [#allocation18], %s4740_s0, %s4740_s0, %s4741_s25  }
  0x97   :  { %4725 = dma.done.wait [#allocation7], 1024  }
  0x98   :  { %4726 = vsyncadd [#allocation7], 4294966272 }
  0x99   :  { %4727 = dma.done.wait [#allocation9], 1536  }
  0x9a   :  { %4728 = vsyncadd [#allocation9], 4294965760 }
  0x9b   :  { %4729 = dma.done.wait [#allocation12], 4096  }
  0x9c   :  { %4730 = vsyncadd [#allocation12], 4294963200 }
  0x9d   :  { %4731 = dma.done.wait [#allocation15], 4096  }
  0x9e   :  { %4732 = vsyncadd [#allocation15], 4294963200 }
  0x9f   :  { %4733 = dma.done.wait [#allocation18], 16384  }
  0xa0   :  { %4734 = vsyncadd [#allocation18], 4294950912  ;;  %v4747_v0 = vmov 0.0   ;;  %vm265_vm0 = vcmask 1041408   ;;  %vm4748_vm1 = vmmov 1   ;;  %v256_v2 = vld [vmem:[%s5780_s4 + $0x8] sm:$0xff] }
  0xa1   :  { %336 = vmatprep.mubr.f32.mxu0 %v4747_v0  ;;  %423 = vmatprep.mubr.f32.mxu1 %v4747_v0  ;;  %vm4968_vm2 = vmpackc.low %vm265_vm0, %vm4748_vm1  ;;  %v258_v3 = vld [vmem:[%s5780_s4 + $0x18] sm:$0x3]  ;;  %v350_v4 = vld [vmem:[#allocation10 + $0x8] sm:$0xff]  ;;  %vm176_vm3 = vcmask 80896   ;;  %s5808_s8 = sld [smem:[#allocation26_spill]]  ;;  %vm911_vm6 = vcmask 523264  }
  0xa2   :  { %v3723_v5 = vpack.c.bf16 %v258_v3, %v256_v2  ;;  %v352_v6 = vld [vmem:[#allocation10 + $0x18] sm:$0x3]  ;;  %v438_v7 = vadd.f32 %v350_v4, %v256_v2  ;;  %v4981_v8 = vld [vmem:[%s5780_s4] sm:$0xff]  ;;  %v4986_v9 = vld [vmem:[%s5780_s4 + $0x10] sm:$0x3]  ;;  %vm3569_vm7 = vcmask 15360  }
  0xa3   :  { %v3729_v10 = vpack.c.bf16 %v352_v6, %v350_v4  ;;  %v440_v11 = vadd.f32 %v352_v6, %v258_v3  ;;  %v3726_v12 = vpack.c.bf16 %v4986_v9, %v4981_v8  ;;  %v4990_v13 = vld [vmem:[#allocation10] sm:$0xff]  ;;  %v4992_v14 = vld [vmem:[#allocation10 + $0x10] sm:$0x3]  ;;  %v5000_v17 = vld [vmem:[#allocation6 + $0x8] sm:$0xff]  ;;  %s5810_s27 = sld [smem:[#allocation28_spill]] }
  0xa4   :  { %v4994_v15 = vld [vmem:[#allocation6] sm:$0xff]  ;;  %3725 = vmatprep.subr.msk.bf16.mxu0 %vm4968_vm2, %v3723_v5  ;;  %v3732_v16 = vpack.c.bf16 %v4992_v14, %v4990_v13  ;;  %v5002_v18 = vld [vmem:[#allocation6 + $0x10] sm:$0xff]  ;;  %v5004_v19 = vld [vmem:[#allocation6 + $0x18] sm:$0xff]  ;;  %v178_v22 = vsel %vm176_vm3, %v5000_v17, 0.0  ;;  %v201_v28 = vmul.f32 %v5000_v17, %v5000_v17 }
  0xa5   :  { %v177_v20 = vsel %vm176_vm3, %v4994_v15, 0.0  ;;  %3731 = vmatprep.subr.msk.bf16.mxu1 %vm4968_vm2, %v3729_v10  ;;  %v3735_v21 = vpack.c.bf16 %v440_v11, %v438_v7  ;;  %3728 = vmatpush1.bf16.msk.msra.mxu0 %vm4968_vm2, %v3726_v12  ;;  %v180_v23 = vsel %vm176_vm3, %v5002_v18, 0.0  ;;  %v5018_v24 = vld [vmem:[#allocation6 + $0x20] sm:$0xff]  ;;  %v182_v26 = vsel %vm176_vm3, %v5004_v19, 0.0  ;;  %v5028_v29 = vld [vmem:[#allocation6 + $0x28] sm:$0xff]  ;;  %v5037_v35 = vld [vmem:[#allocation6 + $0x30] sm:$0xff] }
  0xa6   :  { %3734 = vmatpush1.bf16.msk.msra.mxu1 %vm4968_vm2, %v3732_v16  ;;  %v179_v25 = vadd.f32 %v178_v22, %v177_v20  ;;  %v200_v27 = vmul.f32 %v4994_v15, %v4994_v15  ;;  %v202_v31 = vmul.f32 %v5002_v18, %v5002_v18  ;;  %v203_v32 = vmul.f32 %v5004_v19, %v5004_v19  ;;  %v5045_v42 = vld [vmem:[#allocation6 + $0x38] sm:$0xff]  ;;  %v890_v1 = vld [vmem:[#allocation11 + $0x68] sm:$0xff] }
  0xa7   :  { %3737 = vmatprep.subr.msk.bf16.mxu0 %vm4968_vm2, %v3735_v21  ;;  %v184_v33 = vsel %vm176_vm3, %v5018_v24, 0.0  ;;  %v204_v37 = vmul.f32 %v5018_v24, %v5018_v24  ;;  %v209_v38 = vsel %vm176_vm3, %v201_v28, 0.0  ;;  %v186_v40 = vsel %vm176_vm3, %v5028_v29, 0.0 }
  0xa8   :  { %v181_v30 = vadd.f32 %v180_v23, %v179_v25  ;;  %v208_v34 = vsel %vm176_vm3, %v200_v27, 0.0  ;;  %v211_v39 = vsel %vm176_vm3, %v202_v31, 0.0  ;;  %v205_v44 = vmul.f32 %v5028_v29, %v5028_v29  ;;  %v233_v31 = vld [vmem:[%s5808_s8] sm:$0x1] }
  0xa9   :  { %v210_v41 = vadd.f32 %v209_v38, %v208_v34  ;;  %v213_v45 = vsel %vm176_vm3, %v203_v32, 0.0  ;;  %v188_v46 = vsel %vm176_vm3, %v5037_v35, 0.0  ;;  %v206_v49 = vmul.f32 %v5037_v35, %v5037_v35 }
  0xaa   :  { %v183_v36 = vadd.f32 %v182_v26, %v181_v30  ;;  %v215_v50 = vsel %vm176_vm3, %v204_v37, 0.0  ;;  %v190_v51 = vsel %vm176_vm3, %v5045_v42, 0.0  ;;  %v207_v54 = vmul.f32 %v5045_v42, %v5045_v42 }
  0xab   :  { %v212_v47 = vadd.f32 %v211_v39, %v210_v41  ;;  %v217_v55 = vsel %vm176_vm3, %v205_v44, 0.0  ;;  %v219_v58 = vsel %vm176_vm3, %v206_v49, 0.0  ;;  %v240_v28 = vlaneseq  ;;  %v880_v49 = vld [vmem:[#allocation11 + $0x18] sm:$0xff] }
  0xac   :  { %v185_v43 = vadd.f32 %v184_v33, %v183_v36  ;;  %v221_v61 = vsel %vm176_vm3, %v207_v54, 0.0  ;;  %v437_v36 = vadd.f32 %v4990_v13, %v4981_v8  ;;  %v439_v37 = vadd.f32 %v4992_v14, %v4986_v9  ;;  %v237_v8 = vld [vmem:[%s5779_s3] sm:$0x1]  ;;  %s5809_s3 = sld [smem:[#allocation27_spill]] }
  0xad   :  { %v214_v52 = vadd.f32 %v213_v45, %v212_v47  ;;  %v5062_v30 = vshrl.u32 %v240_v28, 7  ;;  %v244_v32 = vand.u32 127, %v240_v28  ;;  %v889_v28 = vld [vmem:[#allocation11 + $0x60] sm:$0xff] }
  0xae   :  { %v187_v48 = vadd.f32 %v186_v40, %v185_v43  ;;  %v3738_v41 = vpack.c.bf16 %v439_v37, %v437_v36  ;;  %v547_v36 = vld [vmem:[#allocation8 + $0x38] sm:$0xff]  ;;  %v4749_v37 = vmov 1966171168  }
  0xaf   :  { %v216_v56 = vadd.f32 %v215_v50, %v214_v52  ;;  %v5068_v33 = vsub.s32 0, %v5062_v30  ;;  %v242_v38 = vadd.s32 8, %v5062_v30  ;;  %vm245_vm4 = vcmp.eq.s32.totalorder %v5062_v30, %v244_v32 }
  0xb0   :  { %v189_v53 = vadd.f32 %v188_v46, %v187_v48  ;;  %v878_v48 = vld [vmem:[#allocation11 + $0x8] sm:$0xff] }
  0xb1   :  { %v218_v59 = vadd.f32 %v217_v55, %v216_v56  ;;  %vm246_vm5 = vcmp.eq.s32.totalorder %v242_v38, %v244_v32  ;;  %v525_v38 = vunpack.c.l.s4 %v4749_v37 }
  0xb2   :  { %v191_v57 = vadd.f32 %v190_v51, %v189_v53 }
  0xb3   :  { %v220_v62 = vadd.f32 %v219_v58, %v218_v59  ;;  %v5092_v58 = vpack.c.bf16 %v880_v49, %v878_v48  ;;  %v877_v59 = vld [vmem:[#allocation11] sm:$0xff] }
  0xb4   :  { %v192_v60 = vrot.slane %v191_v57, 4 }
  0xb5   :  { %v222_v2 = vadd.f32 %v221_v61, %v220_v62  ;;  %v882_v61 = vld [vmem:[#allocation11 + $0x28] sm:$0xff]  ;;  %v884_v62 = vld [vmem:[#allocation11 + $0x38] sm:$0xff] }
  0xb6   :  { %v193_v63 = vadd.f32 %v192_v60, %v191_v57  ;;  %v879_v60 = vld [vmem:[#allocation11 + $0x10] sm:$0xff] }
  0xb7   :  { %v223_v4 = vrot.slane %v222_v2, 4 }
  0xb8   :  { %v194_v3 = vrot.slane %v193_v63, 2 }
  0xb9   :  { %v224_v6 = vadd.f32 %v223_v4, %v222_v2  ;;  %v540_v2 = vld [vmem:[#allocation8] sm:$0xff]  ;;  %v5109_v4 = vpack.c.bf16 %v879_v60, %v877_v59 }
  0xba   :  { %v195_v5 = vadd.f32 %v194_v3, %v193_v63 }
  0xbb   :  { %v225_v10 = vrot.slane %v224_v6, 2 }
  0xbc   :  { %v196_v7 = vrot.slane %v195_v5, 1 }
  0xbd   :  { %v226_v12 = vadd.f32 %v225_v10, %v224_v6  ;;  %v5113_v6 = vpack.c.bf16 %v884_v62, %v882_v61  ;;  %v883_v10 = vld [vmem:[#allocation11 + $0x30] sm:$0xff] }
  0xbe   :  { %v197_v11 = vadd.f32 %v196_v7, %v195_v5  ;;  %v881_v7 = vld [vmem:[#allocation11 + $0x20] sm:$0xff] }
  0xbf   :  { %v227_v20 = vrot.slane %v226_v12, 1 }
  0xc0   :  { %v199_v16 = vmul.f32 0.041666668, %v197_v11  ;;  %v886_v11 = vld [vmem:[#allocation11 + $0x48] sm:$0xff] }
  0xc1   :  { %v228_v21 = vadd.f32 %v227_v20, %v226_v12  ;;  %v888_v12 = vld [vmem:[#allocation11 + $0x58] sm:$0xff]  ;;  %v5123_v20 = vpack.c.bf16 %v883_v10, %v881_v7 }
  0xc2   :  { %v230_v22 = vmul.f32 %v199_v16, %v199_v16 }
  0xc3   :  { %v229_v23 = vmul.f32 0.041666668, %v228_v21  ;;  %v5126_v21 = vpack.c.bf16 %v888_v12, %v886_v11 }
  0xc5   :  { %v231_v25 = vsub.f32 %v229_v23, %v230_v22  ;;  %v885_v22 = vld [vmem:[#allocation11 + $0x40] sm:$0xff]  ;;  %v892_v23 = vld [vmem:[#allocation11 + $0x78] sm:$0xff] }
  0xc7   :  { %v232_v26 = vmax.f32 %v231_v25, 0.0  ;;  %v542_v25 = vld [vmem:[#allocation8 + $0x10] sm:$0xff] }
  0xc9   :  { %v234_v27 = vadd.f32 1e-05, %v232_v26 }
  0xcb   :  { %4351 = vrsqrt.f32 %v234_v27  ;;  %v5137_v27 = vpack.c.bf16 %v892_v23, %v890_v1 }
  0xd5   :  { %v4352_v34 = vpop.eup %4351 }
  0xd6   :  { %v236_v39 = vmul.f32 %v4352_v34, %v233_v31  ;;  %v891_v31 = vld [vmem:[#allocation11 + $0x70] sm:$0xff]  ;;  %v544_v34 = vld [vmem:[#allocation8 + $0x20] sm:$0xff] }
  0xd7   :  { %v5145_v32 = vpack.c.bf16 %v891_v31, %v889_v28 }
  0xd8   :  { %v251_v40 = vrot.slane %v236_v39, %v5068_v33  ;;  %v238_v44 = vmul.f32 %v236_v39, %v199_v16  ;;  %v541_v16 = vld [vmem:[#allocation8 + $0x8] sm:$0xff] }
  0xda   :  { %v253_v43 = vsel %vm245_vm4, %v251_v40, 0.0  ;;  %v254_v9 = vsel %vm246_vm5, %v251_v40, 0.0  ;;  %v239_v13 = vsub.f32 %v237_v8, %v238_v44 }
  0xdb   :  { %3594 = vmatmul.mubr.msk.f32.vlgmr.msra.gmra.mrb[0].mxu0 %vm176_vm3, %v253_v43  ;;  %3598 = vmatmul.mubr.msk.f32.vlgmr.msra.gmra.mrb[0].mxu1 %vm176_vm3, %v253_v43  ;;  %v5193_v43 = vsub.s32 1, %v5062_v30 }
  0xdc   :  { %342 = vmatprep.mubr.f32.mxu0 %v4747_v0  ;;  %429 = vmatprep.mubr.f32.mxu1 %v4747_v0 }
  0xdd   :  { %3740 = vmatpush1.bf16.msk.msra.mxu0 %vm4968_vm2, %v3738_v41 }
  0xdf   :  { %3595 = vmatmul.mubr.msk.f32.gmra.mrb[2].mxu0 %vm176_vm3, %v254_v9  ;;  %3599 = vmatmul.mubr.msk.f32.gmra.mrb[2].mxu1 %vm176_vm3, %v254_v9 }
  0xe0   :  { %514 = vmatprep.mubr.f32.mxu0 %v4747_v0  ;;  %809 = vmatprep.mubr.f32.mxu1 %v4747_v0 }
  0xe3   :  { %3602 = vmatmul.mubr.msk.f32.vlgmr.msra.gmra.mrb[4].mxu0 %vm176_vm3, %v239_v13 }
  0xe4   :  { %642 = vmatprep.mubr.f32.mxu0 %v4747_v0 }
 0x1ae   :  { %v425_v14 = vpop.f32.mrb[0].mxu1  ;;  %v338_v45 = vpop.f32.mrb[0].mxu0 }
 0x1af   :  { %v427_v46 = vpop.f32.mrb[1].mxu1  ;;  %v340_v47 = vpop.f32.mrb[1].mxu0 }
 0x1b2   :  { %v344_v50 = vpop.f32.mrb[2].mxu0  ;;  %v431_v51 = vpop.f32.mrb[2].mxu1 }
 0x1b3   :  { %v3750_v52 = vpack.c.bf16 %v344_v50, %v338_v45  ;;  %v3744_v53 = vpack.c.bf16 %v431_v51, %v425_v14  ;;  %v346_v54 = vpop.f32.mrb[3].mxu0  ;;  %v433_v55 = vpop.f32.mrb[3].mxu1 }
 0x1b4   :  { %v3747_v56 = vpack.c.bf16 %v346_v54, %v340_v47  ;;  %v3741_v57 = vpack.c.bf16 %v433_v55, %v427_v46 }
 0x1b6   :  { %3743 = vmatprep.subr.msk.bf16.mxu0 %vm4968_vm2, %v3741_v57  ;;  %4233 = vmatprep.subr.msk.bf16.mxu1 %vm4968_vm2, %v3747_v56  ;;  %v5098_v63 = vpop.f32.mrb[4].mxu0 }
 0x1b7   :  { %3746 = vmatpush1.bf16.msk.msra.mxu0 %vm4968_vm2, %v3744_v53  ;;  %4234 = vmatpush1.bf16.msk.msra.mxu1 %vm4968_vm2, %v3750_v52  ;;  %v5104_v3 = vpop.f32.mrb[5].mxu0 }
 0x1b8   :  { %3749 = vmatprep.subr.msk.bf16.mxu0 %vm4968_vm2, %v3747_v56  ;;  %3754 = vmatprep.subr.bf16.mxu1 %v5092_v58  ;;  %v523_v5 = vcombine.low %v5098_v63, %v5104_v3 }
 0x1ba   :  { %3605 = vmatmul.mubr.msk.f32.vlgmr.msra.gmra.mrb[6].mxu0 %vm176_vm3, %v540_v2  ;;  %3619 = vmatmul.mubr.msk.f32.vlgmr.msra.gmra.mrb[4].mxu1 %vm176_vm3, %v5018_v24  ;;  %v887_v24 = vld [vmem:[#allocation11 + $0x50] sm:$0xff] }
 0x1bb   :  { %3752 = vmatpush1.bf16.msk.msra.mxu0 %vm4968_vm2, %v3750_v52  ;;  %648 = vmatprep.mubr.f32.mxu0 %v4747_v0  ;;  %v5134_v26 = vpack.c.bf16 %v887_v24, %v885_v22 }
 0x1bc   :  { %3756 = vmatpush1.bf16.msra.mxu1 %v5109_v4  ;;  %815 = vmatprep.mubr.f32.mxu1 %v4747_v0 }
 0x1bd   :  { %3758 = vmatprep.subr.bf16.mxu1 %v5113_v6 }
 0x1be   :  { %3606 = vmatmul.mubr.msk.f32.gmra.mrb[8].mxu0 %vm176_vm3, %v541_v16  ;;  %3620 = vmatmul.mubr.msk.f32.gmra.mrb[6].mxu1 %vm176_vm3, %v5028_v29  ;;  %v543_v29 = vld [vmem:[#allocation8 + $0x18] sm:$0xff] }
 0x1bf   :  { %654 = vmatprep.mubr.f32.mxu0 %v4747_v0  ;;  %821 = vmatprep.mubr.f32.mxu1 %v4747_v0 }
 0x1c0   :  { %3760 = vmatpush1.bf16.msra.mxu1 %v5123_v20 }
 0x1c1   :  { %3762 = vmatprep.subr.bf16.mxu1 %v5126_v21 }
 0x1c2   :  { %3607 = vmatmul.mubr.msk.f32.gmra.mrb[10].mxu0 %vm176_vm3, %v542_v25  ;;  %3621 = vmatmul.mubr.msk.f32.gmra.mrb[8].mxu1 %vm176_vm3, %v5037_v35  ;;  %v545_v35 = vld [vmem:[#allocation8 + $0x28] sm:$0xff] }
 0x1c3   :  { %660 = vmatprep.mubr.f32.mxu0 %v4747_v0  ;;  %827 = vmatprep.mubr.f32.mxu1 %v4747_v0 }
 0x1c4   :  { %3764 = vmatpush1.bf16.msra.mxu1 %v5134_v26 }
 0x1c5   :  { %3766 = vmatprep.subr.bf16.mxu1 %v5137_v27 }
 0x1c6   :  { %3608 = vmatmul.mubr.msk.f32.gmra.mrb[12].mxu0 %vm176_vm3, %v543_v29  ;;  %3622 = vmatmul.mubr.msk.f32.gmra.mrb[10].mxu1 %vm176_vm3, %v5045_v42  ;;  %v546_v42 = vld [vmem:[#allocation8 + $0x30] sm:$0xff] }
 0x1c7   :  { %666 = vmatprep.mubr.f32.mxu0 %v4747_v0  ;;  %979 = vmatprep.mubr.f32.mxu1 %v4747_v0 }
 0x1c8   :  { %3768 = vmatpush1.bf16.msra.mxu1 %v5145_v32 }
 0x1c9   :  { %3770 = vmatprep.subr.bf16.mxu1 %v5092_v58 }
 0x1ca   :  { %3609 = vmatmul.mubr.msk.f32.gmra.mrb[14].mxu0 %vm176_vm3, %v544_v34 }
 0x1cb   :  { %672 = vmatprep.mubr.f32.mxu0 %v4747_v0  ;;  %980 = vmatmul.mubr.f32.vlgmr.msra.gmra.mrb[12].mxu1 %v4747_v0 }
 0x1cc   :  { %3772 = vmatpush1.bf16.msra.mxu1 %v5109_v4  ;;  %1084 = vmatprep.mubr.f32.mxu1 %v4747_v0 }
 0x1cd   :  { %3774 = vmatprep.subr.bf16.mxu1 %v5113_v6 }
 0x1ce   :  { %3610 = vmatmul.mubr.msk.f32.gmra.mrb[16].mxu0 %vm176_vm3, %v545_v35 }
 0x1cf   :  { %678 = vmatprep.mubr.f32.mxu0 %v4747_v0 }
 0x1d0   :  { %3776 = vmatpush1.bf16.msra.mxu1 %v5123_v20 }
 0x1d1   :  { %3778 = vmatprep.subr.bf16.mxu1 %v5126_v21 }
 0x1d2   :  { %3611 = vmatmul.mubr.msk.f32.gmra.mrb[18].mxu0 %vm176_vm3, %v546_v42 }
 0x1d3   :  { %684 = vmatprep.mubr.f32.mxu0 %v4747_v0 }
 0x1d4   :  { %3780 = vmatpush1.bf16.msra.mxu1 %v5134_v26 }
 0x1d5   :  { %3782 = vmatprep.subr.bf16.mxu1 %v5137_v27 }
 0x1d6   :  { %3612 = vmatmul.mubr.msk.f32.gmra.mrb[20].mxu0 %vm176_vm3, %v547_v36 }
 0x1d7   :  { %785 = vmatprep.mubr.f32.mxu0 %v4747_v0 }
 0x1d8   :  { %3784 = vmatpush1.bf16.msra.mxu1 %v5145_v32 }
 0x1d9   :  { %3786 = vmatprep.subr.bf16.mxu1 %v5092_v58 }
 0x1da   :  { %3615 = vmatmul.mubr.msk.f32.vlgmr.msra.gmra.mrb[6].mxu0 %vm176_vm3, %v4994_v15  ;;  %v526_v15 = vunpack.c.0.s8 %v525_v38 }
 0x1db   :  { %791 = vmatprep.mubr.f32.mxu0 %v4747_v0 }
 0x1dc   :  { %v529_v39 = vsub.s32 %v526_v15, %v5062_v30 }
 0x1de   :  { %3616 = vmatmul.mubr.msk.f32.gmra.mrb[8].mxu0 %vm176_vm3, %v5000_v17  ;;  %v530_v17 = vrot.slane %v523_v5, %v529_v39 }
 0x1df   :  { %797 = vmatprep.mubr.f32.mxu0 %v4747_v0 }
 0x1e0   :  { %v537_v40 = vrot.slane %v530_v17, %v529_v39 }
 0x1e2   :  { %3617 = vmatmul.mubr.msk.f32.gmra.mrb[10].mxu0 %vm176_vm3, %v5002_v18  ;;  %v436_v18 = vld [vmem:[%s5782_s6] sm:$0x3]  ;;  %s4750_s6 = smov 64  }
 0x1e3   :  { %803 = vmatprep.mubr.f32.mxu0 %v4747_v0  ;;  %v539_v41 = vadd.f32 %v537_v40, %v436_v18 }
 0x1e5   :  { %v842_v44 = vrot.slane %v539_v41, %v5193_v43 }
 0x1e6   :  { %3618 = vmatmul.mubr.msk.f32.gmra.mrb[12].mxu0 %vm176_vm3, %v5004_v19  ;;  %v838_v19 = vrot.slane %v539_v41, %v5068_v33 }
 0x1e7   :  { %1916 = vmatprep.mubr.f32.mxu0 %v4747_v0 }
 0x29d   :  { %v668_v8 = vpop.f32.mrb[14].mxu0 }
 0x29e   :  { %v5197_v9 = vadd.f32 %v838_v19, %v668_v8  ;;  %v670_v13 = vpop.f32.mrb[15].mxu0  ;;  %v981_v14 = vpop.f32.mrb[12].mxu1 }
 0x29f   :  { %v5199_v45 = vadd.f32 %v842_v44, %v670_v13  ;;  %v983_v46 = vpop.f32.mrb[13].mxu1 }
 0x2a1   :  { %v674_v47 = vpop.f32.mrb[16].mxu0 }
 0x2a2   :  { %v5201_v48 = vadd.f32 %v838_v19, %v674_v47  ;;  %v676_v49 = vpop.f32.mrb[17].mxu0 }
 0x2a3   :  { %v5203_v50 = vadd.f32 %v842_v44, %v676_v49 }
 0x2a5   :  { %v680_v51 = vpop.f32.mrb[18].mxu0 }
 0x2a6   :  { %v5205_v52 = vadd.f32 %v838_v19, %v680_v51  ;;  %v682_v53 = vpop.f32.mrb[19].mxu0 }
 0x2a7   :  { %v5207_v54 = vadd.f32 %v842_v44, %v682_v53 }
 0x2a9   :  { %v686_v55 = vpop.f32.mrb[20].mxu0 }
 0x2aa   :  { %v5209_v56 = vadd.f32 %v838_v19, %v686_v55  ;;  %v688_v57 = vpop.f32.mrb[21].mxu0 }
 0x2ab   :  { %v5211_v59 = vadd.f32 %v842_v44, %v688_v57 }
 0x2ad   :  { %v787_v60 = vpop.f32.mrb[6].mxu0 }
 0x2ae   :  { %v4235_v61 = vadd.f32 %v838_v19, %v787_v60  ;;  %v789_v62 = vpop.f32.mrb[7].mxu0 }
 0x2af   :  { %v4237_v63 = vadd.f32 %v842_v44, %v789_v62 }
 0x2b0   :  { %v4236_v2 = vadd.f32 %v4235_v61, %v981_v14 }
 0x2b1   :  { %v4238_v3 = vadd.f32 %v4237_v63, %v983_v46  ;;  %v793_v5 = vpop.f32.mrb[8].mxu0 }
 0x2b2   :  { %v3623_v7 = vmul.f32 -1.442695, %v4236_v2  ;;  %v4239_v10 = vadd.f32 %v838_v19, %v793_v5  ;;  %v795_v11 = vpop.f32.mrb[9].mxu0 }
 0x2b3   :  { %v4241_v12 = vadd.f32 %v842_v44, %v795_v11  ;;  %v3624_v37 = vmul.f32 -1.442695, %v4238_v3 }
 0x2b4   :  { %4353 = vpow2.f32 %v3623_v7 }
 0x2b5   :  { %v799_v16 = vpop.f32.mrb[10].mxu0  ;;  %4355 = vtanh.f32 %v4238_v3 }
 0x2b6   :  { %v5213_v22 = vadd.f32 %v838_v19, %v799_v16  ;;  %v801_v24 = vpop.f32.mrb[11].mxu0 }
 0x2b7   :  { %v5215_v1 = vadd.f32 %v842_v44, %v801_v24 }
 0x2b9   :  { %v805_v23 = vpop.f32.mrb[12].mxu0 }
 0x2ba   :  { %v5217_v25 = vadd.f32 %v838_v19, %v805_v23  ;;  %v807_v28 = vpop.f32.mrb[13].mxu0 }
 0x2bb   :  { %v5219_v31 = vadd.f32 %v842_v44, %v807_v28 }
 0x2be   :  { %v4354_v29 = vpop.eup %4353 }
 0x2bf   :  { %v991_v34 = vadd.f32 1.0, %v4354_v29  ;;  %v4356_v35 = vpop.eup %4355 }
 0x2c1   :  { %4357 = vrcp.f32 %v991_v34 }
 0x2c2   :  { %4359 = vpow2.f32 %v3624_v37 }
 0x2cb   :  { %v4358_v42 = vpop.eup %4357 }
 0x2cc   :  { %v1002_v36 = vmul.f32 %v4358_v42, %v4356_v35  ;;  %v4360_v38 = vpop.eup %4359  ;;  %v1001_v39 = vmul.f32 0.0, %v4358_v42 }
 0x2cd   :  { %v998_v15 = vadd.f32 1.0, %v4360_v38 }
 0x2ce   :  { %1004 = vrot.lane.b32.xlu0 %v1002_v36, %s4750_s6 }
 0x2cf   :  { %4361 = vrcp.f32 %v998_v15 }
 0x2d9   :  { %v4362_v18 = vpop.eup %4361 }
 0x340   :  { %v1005_v17 = vpop.permute.xlu0 %1004 }
 0x341   :  { %v1007_v40 = vadd.f32 %v1005_v17, %v1001_v39 }
 0x343   :  { %4363 = vtanh.f32 %v1007_v40 }
 0x34d   :  { %v4364_v41 = vpop.eup %4363 }
 0x34e   :  { %v1009_v19 = vmul.f32 %v4364_v41, %v4362_v18 }
 0x350   :  { %1011 = vrot.lane.b32.xlu0 %v1009_v19, %s4750_s6 }
 0x3c2   :  { %v1012_v44 = vpop.permute.xlu0 %1011 }
 0x3c3   :  { %1014 = vst.msk [vmem:[#allocation4] sm:$0xff] %vm911_vm6, %v1012_v44  ;;  %3625 = vmatmul.mubr.msk.f32.vlgmr.msra.gmra.mrb[14].mxu1 %vm911_vm6, %v1012_v44 }
 0x3c4   :  { %3788 = vmatpush1.bf16.msra.mxu1 %v5109_v4  ;;  %1190 = vmatprep.mubr.f32.mxu1 %v4747_v0 }
 0x3c5   :  { %3790 = vmatprep.subr.bf16.mxu1 %v5113_v6 }
 0x3c8   :  { %3792 = vmatpush1.bf16.msra.mxu1 %v5123_v20 }
 0x3c9   :  { %3794 = vmatprep.subr.bf16.mxu1 %v5126_v21 }
 0x3ca   :  { %v5230_v8 = vld [vmem:[#allocation4] sm:$0xff] }
 0x3cb   :  { %1759 = vst.msk [vmem:[#allocation5 + $0x38] sm:$0xff] %vm911_vm6, %v5230_v8 }
 0x3cc   :  { %3796 = vmatpush1.bf16.msra.mxu1 %v5134_v26 }
 0x3cd   :  { %3798 = vmatprep.subr.bf16.mxu1 %v5137_v27 }
 0x3d0   :  { %3800 = vmatpush1.bf16.msra.mxu1 %v5145_v32 }
 0x3d1   :  { %3802 = vmatprep.subr.bf16.mxu1 %v5092_v58 }
 0x496   :  { %v1086_v13 = vpop.f32.mrb[14].mxu1 }
 0x497   :  { %v4240_v14 = vadd.f32 %v4239_v10, %v1086_v13  ;;  %v1088_v46 = vpop.f32.mrb[15].mxu1 }
 0x498   :  { %v4242_v47 = vadd.f32 %v4241_v12, %v1088_v46 }
 0x499   :  { %v3626_v49 = vmul.f32 -1.442695, %v4240_v14 }
 0x49a   :  { %v3627_v61 = vmul.f32 -1.442695, %v4242_v47 }
 0x49b   :  { %4365 = vpow2.f32 %v3626_v49 }
 0x49c   :  { %4367 = vtanh.f32 %v4242_v47 }
 0x4a5   :  { %v4366_v51 = vpop.eup %4365 }
 0x4a6   :  { %v1096_v53 = vadd.f32 1.0, %v4366_v51  ;;  %v4368_v55 = vpop.eup %4367 }
 0x4a8   :  { %4369 = vrcp.f32 %v1096_v53 }
 0x4a9   :  { %4371 = vpow2.f32 %v3627_v61 }
 0x4b2   :  { %v4370_v57 = vpop.eup %4369 }
 0x4b3   :  { %v1107_v60 = vmul.f32 %v4370_v57, %v4368_v55  ;;  %v4372_v62 = vpop.eup %4371  ;;  %v1106_v2 = vmul.f32 %v4370_v57, %v1007_v40 }
 0x4b4   :  { %v1103_v63 = vadd.f32 1.0, %v4372_v62 }
 0x4b5   :  { %1109 = vrot.lane.b32.xlu1 %v1107_v60, %s4750_s6 }
 0x4b6   :  { %4373 = vrcp.f32 %v1103_v63 }
 0x4c0   :  { %v4374_v7 = vpop.eup %4373 }
 0x527   :  { %v1110_v3 = vpop.permute.xlu1 %1109 }
 0x528   :  { %v1112_v5 = vadd.f32 %v1110_v3, %v1106_v2 }
 0x52a   :  { %4375 = vtanh.f32 %v1112_v5 }
 0x534   :  { %v4376_v10 = vpop.eup %4375 }
 0x535   :  { %v1114_v11 = vmul.f32 %v4376_v10, %v4374_v7 }
 0x537   :  { %1116 = vrot.lane.b32.xlu1 %v1114_v11, %s4750_s6 }
 0x5a9   :  { %v1117_v12 = vpop.permute.xlu1 %1116 }
 0x5aa   :  { %1120 = vst.msk [vmem:[#allocation4 + $0x8] sm:$0xff] %vm911_vm6, %v1117_v12  ;;  %3628 = vmatmul.mubr.msk.f32.vlgmr.msra.gmra.mrb[16].mxu1 %vm911_vm6, %v1117_v12 }
 0x5ab   :  { %3804 = vmatpush1.bf16.msra.mxu1 %v5109_v4  ;;  %1296 = vmatprep.mubr.f32.mxu1 %v4747_v0 }
 0x5ac   :  { %3806 = vmatprep.subr.bf16.mxu1 %v5113_v6 }
 0x5af   :  { %3808 = vmatpush1.bf16.msra.mxu1 %v5123_v20 }
 0x5b0   :  { %3810 = vmatprep.subr.bf16.mxu1 %v5126_v21 }
 0x5b1   :  { %v5247_v16 = vld [vmem:[#allocation4 + $0x8] sm:$0xff] }
 0x5b2   :  { %1762 = vst.msk [vmem:[#allocation5 + $0x30] sm:$0xff] %vm911_vm6, %v5247_v16 }
 0x5b3   :  { %3812 = vmatpush1.bf16.msra.mxu1 %v5134_v26 }
 0x5b4   :  { %3814 = vmatprep.subr.bf16.mxu1 %v5137_v27 }
 0x5b7   :  { %3816 = vmatpush1.bf16.msra.mxu1 %v5145_v32 }
 0x5b8   :  { %3818 = vmatprep.subr.bf16.mxu1 %v5092_v58 }
 0x67d   :  { %v1192_v24 = vpop.f32.mrb[16].mxu1 }
 0x67e   :  { %v4244_v23 = vadd.f32 %v5213_v22, %v1192_v24  ;;  %v1194_v28 = vpop.f32.mrb[17].mxu1 }
 0x67f   :  { %v4246_v29 = vadd.f32 %v5215_v1, %v1194_v28 }
 0x680   :  { %v3629_v34 = vmul.f32 -1.442695, %v4244_v23 }
 0x681   :  { %v3630_v15 = vmul.f32 -1.442695, %v4246_v29 }
 0x682   :  { %4377 = vpow2.f32 %v3629_v34 }
 0x683   :  { %4379 = vtanh.f32 %v4246_v29 }
 0x68c   :  { %v4378_v35 = vpop.eup %4377 }
 0x68d   :  { %v1202_v42 = vadd.f32 1.0, %v4378_v35  ;;  %v4380_v36 = vpop.eup %4379 }
 0x68f   :  { %4381 = vrcp.f32 %v1202_v42 }
 0x690   :  { %4383 = vpow2.f32 %v3630_v15 }
 0x699   :  { %v4382_v37 = vpop.eup %4381 }
 0x69a   :  { %v1213_v38 = vmul.f32 %v4382_v37, %v4380_v36  ;;  %v4384_v39 = vpop.eup %4383  ;;  %v1212_v40 = vmul.f32 %v4382_v37, %v1112_v5 }
 0x69b   :  { %v1209_v17 = vadd.f32 1.0, %v4384_v39 }
 0x69c   :  { %1215 = vrot.lane.b32.xlu0 %v1213_v38, %s4750_s6 }
 0x69d   :  { %4385 = vrcp.f32 %v1209_v17 }
 0x6a7   :  { %v4386_v1 = vpop.eup %4385 }
 0x70e   :  { %v1216_v22 = vpop.permute.xlu0 %1215 }
 0x70f   :  { %v1218_v18 = vadd.f32 %v1216_v22, %v1212_v40 }
 0x711   :  { %4387 = vtanh.f32 %v1218_v18 }
 0x71b   :  { %v4388_v41 = vpop.eup %4387 }
 0x71c   :  { %v1220_v19 = vmul.f32 %v4388_v41, %v4386_v1 }
 0x71e   :  { %1222 = vrot.lane.b32.xlu1 %v1220_v19, %s4750_s6 }
 0x790   :  { %v1223_v44 = vpop.permute.xlu1 %1222 }
 0x791   :  { %1226 = vst.msk [vmem:[#allocation4 + $0x10] sm:$0xff] %vm911_vm6, %v1223_v44  ;;  %3631 = vmatmul.mubr.msk.f32.vlgmr.msra.gmra.mrb[18].mxu1 %vm911_vm6, %v1223_v44 }
 0x792   :  { %3820 = vmatpush1.bf16.msra.mxu1 %v5109_v4  ;;  %1402 = vmatprep.mubr.f32.mxu1 %v4747_v0 }
 0x793   :  { %3822 = vmatprep.subr.bf16.mxu1 %v5113_v6 }
 0x796   :  { %3824 = vmatpush1.bf16.msra.mxu1 %v5123_v20 }
 0x797   :  { %3826 = vmatprep.subr.bf16.mxu1 %v5126_v21 }
 0x798   :  { %v5266_v13 = vld [vmem:[#allocation4 + $0x10] sm:$0xff] }
 0x799   :  { %1765 = vst.msk [vmem:[#allocation5 + $0x28] sm:$0xff] %vm911_vm6, %v5266_v13 }
 0x79a   :  { %3828 = vmatpush1.bf16.msra.mxu1 %v5134_v26 }
 0x79b   :  { %3830 = vmatprep.subr.bf16.mxu1 %v5137_v27 }
 0x79e   :  { %3832 = vmatpush1.bf16.msra.mxu1 %v5145_v32 }
 0x79f   :  { %3834 = vmatprep.subr.bf16.mxu1 %v5092_v58 }
 0x864   :  { %v1298_v14 = vpop.f32.mrb[18].mxu1 }
 0x865   :  { %v4248_v46 = vadd.f32 %v5217_v25, %v1298_v14  ;;  %v1300_v47 = vpop.f32.mrb[19].mxu1 }
 0x866   :  { %v4250_v49 = vadd.f32 %v5219_v31, %v1300_v47 }
 0x867   :  { %v3632_v51 = vmul.f32 -1.442695, %v4248_v46 }
 0x868   :  { %v3633_v62 = vmul.f32 -1.442695, %v4250_v49 }
 0x869   :  { %4389 = vpow2.f32 %v3632_v51 }
 0x86a   :  { %4391 = vtanh.f32 %v4250_v49 }
 0x873   :  { %v4390_v53 = vpop.eup %4389 }
 0x874   :  { %v1308_v55 = vadd.f32 1.0, %v4390_v53  ;;  %v4392_v57 = vpop.eup %4391 }
 0x876   :  { %4393 = vrcp.f32 %v1308_v55 }
 0x877   :  { %4395 = vpow2.f32 %v3633_v62 }
 0x880   :  { %v4394_v60 = vpop.eup %4393 }
 0x881   :  { %v1319_v61 = vmul.f32 %v4394_v60, %v4392_v57  ;;  %v4396_v63 = vpop.eup %4395  ;;  %v1318_v3 = vmul.f32 %v4394_v60, %v1218_v18 }
 0x882   :  { %v1315_v2 = vadd.f32 1.0, %v4396_v63 }
 0x883   :  { %1321 = vrot.lane.b32.xlu0 %v1319_v61, %s4750_s6 }
 0x884   :  { %4397 = vrcp.f32 %v1315_v2 }
 0x88e   :  { %v4398_v31 = vpop.eup %4397 }
 0x8f5   :  { %v1322_v25 = vpop.permute.xlu0 %1321 }
 0x8f6   :  { %v1324_v5 = vadd.f32 %v1322_v25, %v1318_v3 }
 0x8f8   :  { %4399 = vtanh.f32 %v1324_v5 }
 0x902   :  { %v4400_v7 = vpop.eup %4399 }
 0x903   :  { %v1326_v10 = vmul.f32 %v4400_v7, %v4398_v31 }
 0x905   :  { %1328 = vrot.lane.b32.xlu1 %v1326_v10, %s4750_s6 }
 0x977   :  { %v1329_v11 = vpop.permute.xlu1 %1328 }
 0x978   :  { %1332 = vst.msk [vmem:[#allocation4 + $0x18] sm:$0xff] %vm911_vm6, %v1329_v11  ;;  %3634 = vmatmul.mubr.msk.f32.vlgmr.msra.gmra.mrb[4].mxu1 %vm911_vm6, %v1329_v11 }
 0x979   :  { %3836 = vmatpush1.bf16.msra.mxu1 %v5109_v4  ;;  %1508 = vmatprep.mubr.f32.mxu1 %v4747_v0 }
 0x97a   :  { %3838 = vmatprep.subr.bf16.mxu1 %v5113_v6 }
 0x97d   :  { %3840 = vmatpush1.bf16.msra.mxu1 %v5123_v20 }
 0x97e   :  { %3842 = vmatprep.subr.bf16.mxu1 %v5126_v21 }
 0x97f   :  { %v5285_v12 = vld [vmem:[#allocation4 + $0x18] sm:$0xff] }
 0x980   :  { %1768 = vst.msk [vmem:[#allocation5 + $0x20] sm:$0xff] %vm911_vm6, %v5285_v12 }
 0x981   :  { %3844 = vmatpush1.bf16.msra.mxu1 %v5134_v26 }
 0x982   :  { %3846 = vmatprep.subr.bf16.mxu1 %v5137_v27 }
 0x985   :  { %3848 = vmatpush1.bf16.msra.mxu1 %v5145_v32 }
 0x986   :  { %3850 = vmatprep.subr.bf16.mxu1 %v5092_v58 }
 0xa4b   :  { %v1404_v24 = vpop.f32.mrb[4].mxu1 }
 0xa4c   :  { %v4252_v23 = vadd.f32 %v5197_v9, %v1404_v24  ;;  %v1406_v28 = vpop.f32.mrb[5].mxu1 }
 0xa4d   :  { %v4254_v29 = vadd.f32 %v5199_v45, %v1406_v28 }
 0xa4e   :  { %v3635_v34 = vmul.f32 -1.442695, %v4252_v23 }
 0xa4f   :  { %v3636_v15 = vmul.f32 -1.442695, %v4254_v29 }
 0xa50   :  { %4401 = vpow2.f32 %v3635_v34 }
 0xa51   :  { %4403 = vtanh.f32 %v4254_v29 }
 0xa5a   :  { %v4402_v35 = vpop.eup %4401 }
 0xa5b   :  { %v1414_v42 = vadd.f32 1.0, %v4402_v35  ;;  %v4404_v36 = vpop.eup %4403 }
 0xa5d   :  { %4405 = vrcp.f32 %v1414_v42 }
 0xa5e   :  { %4407 = vpow2.f32 %v3636_v15 }
 0xa67   :  { %v4406_v37 = vpop.eup %4405 }
 0xa68   :  { %v1425_v38 = vmul.f32 %v4406_v37, %v4404_v36  ;;  %v4408_v39 = vpop.eup %4407  ;;  %v1424_v40 = vmul.f32 %v4406_v37, %v1324_v5 }
 0xa69   :  { %v1421_v17 = vadd.f32 1.0, %v4408_v39 }
 0xa6a   :  { %1427 = vrot.lane.b32.xlu0 %v1425_v38, %s4750_s6 }
 0xa6b   :  { %4409 = vrcp.f32 %v1421_v17 }
 0xa75   :  { %v4410_v45 = vpop.eup %4409 }
 0xadc   :  { %v1428_v9 = vpop.permute.xlu0 %1427 }
 0xadd   :  { %v1430_v22 = vadd.f32 %v1428_v9, %v1424_v40 }
 0xadf   :  { %4411 = vtanh.f32 %v1430_v22 }
 0xae9   :  { %v4412_v18 = vpop.eup %4411 }
 0xaea   :  { %v1432_v1 = vmul.f32 %v4412_v18, %v4410_v45 }
 0xaec   :  { %1434 = vrot.lane.b32.xlu1 %v1432_v1, %s4750_s6 }
 0xb5e   :  { %v1435_v41 = vpop.permute.xlu1 %1434 }
 0xb5f   :  { %1438 = vst.msk [vmem:[#allocation4 + $0x20] sm:$0xff] %vm911_vm6, %v1435_v41  ;;  %3637 = vmatmul.mubr.msk.f32.vlgmr.msra.gmra.mrb[6].mxu1 %vm911_vm6, %v1435_v41 }
 0xb60   :  { %3852 = vmatpush1.bf16.msra.mxu1 %v5109_v4  ;;  %1614 = vmatprep.mubr.f32.mxu1 %v4747_v0 }
 0xb61   :  { %3854 = vmatprep.subr.bf16.mxu1 %v5113_v6 }
 0xb64   :  { %3856 = vmatpush1.bf16.msra.mxu1 %v5123_v20 }
 0xb65   :  { %3858 = vmatprep.subr.bf16.mxu1 %v5126_v21 }
 0xb66   :  { %v5304_v19 = vld [vmem:[#allocation4 + $0x20] sm:$0xff] }
 0xb67   :  { %1771 = vst.msk [vmem:[#allocation5 + $0x18] sm:$0xff] %vm911_vm6, %v5304_v19 }
 0xb68   :  { %3860 = vmatpush1.bf16.msra.mxu1 %v5134_v26 }
 0xb69   :  { %3862 = vmatprep.subr.bf16.mxu1 %v5137_v27 }
 0xb6c   :  { %3864 = vmatpush1.bf16.msra.mxu1 %v5145_v32 }
 0xb6d   :  { %3866 = vmatprep.subr.bf16.mxu1 %v5092_v58 }
 0xc32   :  { %v1510_v44 = vpop.f32.mrb[6].mxu1 }
 0xc33   :  { %v4256_v14 = vadd.f32 %v5201_v48, %v1510_v44  ;;  %v1512_v46 = vpop.f32.mrb[7].mxu1 }
 0xc34   :  { %v4258_v47 = vadd.f32 %v5203_v50, %v1512_v46 }
 0xc35   :  { %v3638_v49 = vmul.f32 -1.442695, %v4256_v14 }
 0xc36   :  { %v3639_v61 = vmul.f32 -1.442695, %v4258_v47 }
 0xc37   :  { %4413 = vpow2.f32 %v3638_v49  ;;  %v1815_v49 = vld [vmem:[#allocation14 + $0x18] sm:$0xff] }
 0xc38   :  { %4415 = vtanh.f32 %v4258_v47  ;;  %v1813_v47 = vld [vmem:[#allocation14 + $0x8] sm:$0xff] }
 0xc41   :  { %v4414_v51 = vpop.eup %4413 }
 0xc42   :  { %v1520_v53 = vadd.f32 1.0, %v4414_v51  ;;  %v4416_v55 = vpop.eup %4415  ;;  %v3881_v51 = vpack.c.bf16 %v1815_v49, %v1813_v47  ;;  %v1800_v47 = vld [vmem:[#allocation13 + $0x60] sm:$0xff]  ;;  %v1802_v49 = vld [vmem:[#allocation13 + $0x70] sm:$0xff] }
 0xc44   :  { %4417 = vrcp.f32 %v1520_v53  ;;  %v1812_v53 = vld [vmem:[#allocation14] sm:$0xff]  ;;  %3882 = vmatprep.subr.bf16.mxu0 %v3881_v51  ;;  %v894_v51 = vld [vmem:[#allocation16 + $0x8] sm:$0xff] }
 0xc45   :  { %4419 = vpow2.f32 %v3639_v61  ;;  %v1819_v61 = vld [vmem:[#allocation14 + $0x38] sm:$0xff] }
 0xc4e   :  { %v4418_v57 = vpop.eup %4417 }
 0xc4f   :  { %v1531_v60 = vmul.f32 %v4418_v57, %v4416_v55  ;;  %v4420_v58 = vpop.eup %4419  ;;  %v1530_v63 = vmul.f32 %v4418_v57, %v1430_v22  ;;  %v1814_v55 = vld [vmem:[#allocation14 + $0x10] sm:$0xff] }
 0xc50   :  { %v1527_v62 = vadd.f32 1.0, %v4420_v58  ;;  %v3883_v57 = vpack.c.bf16 %v1814_v55, %v1812_v53  ;;  %v896_v53 = vld [vmem:[#allocation16 + $0x18] sm:$0xff]  ;;  %v3911_v55 = vpack.c.bf16 %v1802_v49, %v1800_v47 }
 0xc51   :  { %1533 = vrot.lane.b32.xlu0 %v1531_v60, %s4750_s6  ;;  %v1817_v60 = vld [vmem:[#allocation14 + $0x28] sm:$0xff] }
 0xc52   :  { %4421 = vrcp.f32 %v1527_v62  ;;  %3884 = vmatpush1.bf16.msra.mxu0 %v3883_v57  ;;  %v3885_v58 = vpack.c.bf16 %v1819_v61, %v1817_v60  ;;  %v1816_v62 = vld [vmem:[#allocation14 + $0x20] sm:$0xff]  ;;  %v5356_v57 = vpack.c.bf16 %v896_v53, %v894_v51  ;;  %v1807_v60 = vld [vmem:[#allocation5 + $0x18] sm:$0xff] }
 0xc53   :  { %v1808_v61 = vld [vmem:[#allocation5 + $0x20] sm:$0xff] }
 0xc54   :  { %3886 = vmatprep.subr.bf16.mxu0 %v3885_v58  ;;  %v1809_v58 = vld [vmem:[#allocation5 + $0x28] sm:$0xff] }
 0xc5c   :  { %v4422_v50 = vpop.eup %4421 }
 0xcc3   :  { %v1534_v48 = vpop.permute.xlu0 %1533 }
 0xcc4   :  { %v1536_v2 = vadd.f32 %v1534_v48, %v1530_v63  ;;  %v1818_v63 = vld [vmem:[#allocation14 + $0x30] sm:$0xff] }
 0xcc5   :  { %v3887_v48 = vpack.c.bf16 %v1818_v63, %v1816_v62  ;;  %v1810_v62 = vld [vmem:[#allocation5 + $0x30] sm:$0xff]  ;;  %v893_v63 = vld [vmem:[#allocation16] sm:$0xff] }
 0xcc6   :  { %4423 = vtanh.f32 %v1536_v2 }
 0xcc7   :  { %3888 = vmatpush1.bf16.msra.mxu0 %v3887_v48  ;;  %v895_v48 = vld [vmem:[#allocation16 + $0x10] sm:$0xff] }
 0xcd0   :  { %v4424_v3 = vpop.eup %4423 }
 0xcd1   :  { %v1538_v25 = vmul.f32 %v4424_v3, %v4422_v50  ;;  %v1823_v50 = vld [vmem:[#allocation14 + $0x58] sm:$0xff] }
 0xcd3   :  { %1540 = vrot.lane.b32.xlu1 %v1538_v25, %s4750_s6  ;;  %v1820_v25 = vld [vmem:[#allocation14 + $0x40] sm:$0xff] }
 0xd45   :  { %v1541_v5 = vpop.permute.xlu1 %1540 }
 0xd46   :  { %1544 = vst.msk [vmem:[#allocation4 + $0x28] sm:$0xff] %vm911_vm6, %v1541_v5  ;;  %3640 = vmatmul.mubr.msk.f32.vlgmr.msra.gmra.mrb[8].mxu1 %vm911_vm6, %v1541_v5  ;;  %v1822_v5 = vld [vmem:[#allocation14 + $0x50] sm:$0xff] }
 0xd47   :  { %3868 = vmatpush1.bf16.msra.mxu1 %v5109_v4  ;;  %1720 = vmatprep.mubr.f32.mxu1 %v4747_v0 }
 0xd48   :  { %3870 = vmatprep.subr.bf16.mxu1 %v5113_v6 }
 0xd4b   :  { %3872 = vmatpush1.bf16.msra.mxu1 %v5123_v20 }
 0xd4c   :  { %3874 = vmatprep.subr.bf16.mxu1 %v5126_v21 }
 0xd4d   :  { %v5323_v31 = vld [vmem:[#allocation4 + $0x28] sm:$0xff] }
 0xd4e   :  { %1774 = vst.msk [vmem:[#allocation5 + $0x10] sm:$0xff] %vm911_vm6, %v5323_v31 }
 0xd4f   :  { %3876 = vmatpush1.bf16.msra.mxu1 %v5134_v26 }
 0xd50   :  { %3878 = vmatprep.subr.bf16.mxu1 %v5137_v27 }
 0xd53   :  { %3880 = vmatpush1.bf16.msra.mxu1 %v5145_v32 }
 0xe19   :  { %v1616_v4 = vpop.f32.mrb[8].mxu1 }
 0xe1a   :  { %v4260_v7 = vadd.f32 %v5205_v52, %v1616_v4  ;;  %v1618_v10 = vpop.f32.mrb[9].mxu1  ;;  %v3891_v4 = vpack.c.bf16 %v1822_v5, %v1820_v25  ;;  %v5369_v25 = vpack.c.bf16 %v895_v48, %v893_v63 }
 0xe1b   :  { %v4262_v6 = vadd.f32 %v5207_v54, %v1618_v10  ;;  %v1827_v10 = vld [vmem:[#allocation14 + $0x78] sm:$0xff] }
 0xe1c   :  { %v3641_v20 = vmul.f32 -1.442695, %v4260_v7  ;;  %v1825_v7 = vld [vmem:[#allocation14 + $0x68] sm:$0xff] }
 0xe1d   :  { %v3642_v26 = vmul.f32 -1.442695, %v4262_v6 }
 0xe1e   :  { %4425 = vpow2.f32 %v3641_v20 }
 0xe1f   :  { %4427 = vtanh.f32 %v4262_v6  ;;  %v1824_v6 = vld [vmem:[#allocation14 + $0x60] sm:$0xff] }
 0xe28   :  { %v4426_v21 = vpop.eup %4425 }
 0xe29   :  { %v1626_v11 = vadd.f32 1.0, %v4426_v21  ;;  %v4428_v24 = vpop.eup %4427  ;;  %v3893_v21 = vpack.c.bf16 %v1827_v10, %v1825_v7  ;;  %v899_v7 = vld [vmem:[#allocation16 + $0x30] sm:$0xff]  ;;  %v902_v10 = vld [vmem:[#allocation16 + $0x48] sm:$0xff] }
 0xe2b   :  { %4429 = vrcp.f32 %v1626_v11  ;;  %v1826_v11 = vld [vmem:[#allocation14 + $0x70] sm:$0xff] }
 0xe2c   :  { %4431 = vpow2.f32 %v3642_v26  ;;  %v1789_v26 = vld [vmem:[#allocation13 + $0x8] sm:$0xff] }
 0xe35   :  { %v4430_v23 = vpop.eup %4429 }
 0xe36   :  { %v1637_v28 = vmul.f32 %v4430_v23, %v4428_v24  ;;  %v4432_v27 = vpop.eup %4431  ;;  %v1636_v29 = vmul.f32 %v4430_v23, %v1536_v2  ;;  %v1821_v2 = vld [vmem:[#allocation14 + $0x48] sm:$0xff]  ;;  %v3895_v23 = vpack.c.bf16 %v1826_v11, %v1824_v6  ;;  %v904_v6 = vld [vmem:[#allocation16 + $0x58] sm:$0xff]  ;;  %v901_v11 = vld [vmem:[#allocation16 + $0x40] sm:$0xff] }
 0xe37   :  { %v1633_v32 = vadd.f32 1.0, %v4432_v27  ;;  %v3889_v3 = vpack.c.bf16 %v1823_v50, %v1821_v2  ;;  %v1791_v27 = vld [vmem:[#allocation13 + $0x18] sm:$0xff]  ;;  %v898_v50 = vld [vmem:[#allocation16 + $0x28] sm:$0xff] }
 0xe38   :  { %1639 = vrot.lane.b32.xlu0 %v1637_v28, %s4750_s6  ;;  %v1811_v2 = vld [vmem:[#allocation5 + $0x38] sm:$0xff] }
 0xe39   :  { %4433 = vrcp.f32 %v1633_v32  ;;  %3890 = vmatprep.subr.bf16.mxu0 %v3889_v3  ;;  %v3897_v32 = vpack.c.bf16 %v1791_v27, %v1789_v26  ;;  %v900_v3 = vld [vmem:[#allocation16 + $0x38] sm:$0xff]  ;;  %v905_v27 = vld [vmem:[#allocation16 + $0x60] sm:$0xff] }
 0xe3a   :  { %3892 = vmatpush1.bf16.msra.mxu0 %v3891_v4  ;;  %v5371_v5 = vpack.c.bf16 %v900_v3, %v898_v50  ;;  %v897_v4 = vld [vmem:[#allocation16 + $0x20] sm:$0xff] }
 0xe3b   :  { %3894 = vmatprep.subr.bf16.mxu0 %v3893_v21  ;;  %v5380_v21 = vpack.c.bf16 %v904_v6, %v902_v10 }
 0xe3e   :  { %3896 = vmatpush1.bf16.msra.mxu0 %v3895_v23  ;;  %v906_v23 = vld [vmem:[#allocation16 + $0x68] sm:$0xff] }
 0xe3f   :  { %3898 = vmatprep.subr.bf16.mxu0 %v3897_v32  ;;  %v907_v32 = vld [vmem:[#allocation16 + $0x70] sm:$0xff] }
 0xe43   :  { %v4434_v54 = vpop.eup %4433 }
 0xeaa   :  { %v1640_v52 = vpop.permute.xlu0 %1639 }
 0xeab   :  { %v1642_v34 = vadd.f32 %v1640_v52, %v1636_v29 }
 0xead   :  { %4435 = vtanh.f32 %v1642_v34 }
 0xeb7   :  { %v4436_v35 = vpop.eup %4435 }
 0xeb8   :  { %v1644_v42 = vmul.f32 %v4436_v35, %v4434_v54  ;;  %v1790_v54 = vld [vmem:[#allocation13 + $0x10] sm:$0xff]  ;;  %v1793_v35 = vld [vmem:[#allocation13 + $0x28] sm:$0xff] }
 0xeba   :  { %1646 = vrot.lane.b32.xlu1 %v1644_v42, %s4750_s6  ;;  %v1795_v42 = vld [vmem:[#allocation13 + $0x38] sm:$0xff] }
 0xf2c   :  { %v1647_v36 = vpop.permute.xlu1 %1646 }
 0xf2d   :  { %1650 = vst.msk [vmem:[#allocation4 + $0x30] sm:$0xff] %vm911_vm6, %v1647_v36  ;;  %3643 = vmatmul.mubr.msk.f32.vlgmr.msra.gmra.mrb[10].mxu1 %vm911_vm6, %v1647_v36 }
 0xf2e   :  { %3094 = vmatprep.mubr.f32.mxu1 %v4747_v0 }
 0xf34   :  { %v5337_v37 = vld [vmem:[#allocation4 + $0x30] sm:$0xff] }
 0xf35   :  { %1777 = vst.msk [vmem:[#allocation5 + $0x8] sm:$0xff] %vm911_vm6, %v5337_v37 }
0x1000   :  { %v1722_v38 = vpop.f32.mrb[10].mxu1 }
0x1001   :  { %v4264_v15 = vadd.f32 %v5209_v56, %v1722_v38  ;;  %v1724_v39 = vpop.f32.mrb[11].mxu1  ;;  %v3901_v38 = vpack.c.bf16 %v1795_v42, %v1793_v35 }
0x1002   :  { %v4266_v17 = vadd.f32 %v5211_v59, %v1724_v39  ;;  %v1794_v39 = vld [vmem:[#allocation13 + $0x30] sm:$0xff] }
0x1003   :  { %v3644_v40 = vmul.f32 -1.442695, %v4264_v15  ;;  %v1792_v15 = vld [vmem:[#allocation13 + $0x20] sm:$0xff] }
0x1004   :  { %v3645_v41 = vmul.f32 -1.442695, %v4266_v17 }
0x1005   :  { %4437 = vpow2.f32 %v3644_v40  ;;  %v1797_v40 = vld [vmem:[#allocation13 + $0x48] sm:$0xff] }
0x1006   :  { %4439 = vtanh.f32 %v4266_v17 }
0x100f   :  { %v4438_v9 = vpop.eup %4437 }
0x1010   :  { %v1732_v22 = vadd.f32 1.0, %v4438_v9  ;;  %v4440_v45 = vpop.eup %4439  ;;  %v1799_v9 = vld [vmem:[#allocation13 + $0x58] sm:$0xff] }
0x1012   :  { %4441 = vrcp.f32 %v1732_v22  ;;  %v3903_v22 = vpack.c.bf16 %v1794_v39, %v1792_v15 }
0x1013   :  { %4443 = vpow2.f32 %v3645_v41  ;;  %v1805_v41 = vld [vmem:[#allocation5 + $0x8] sm:$0xff] }
0x101c   :  { %v4442_v18 = vpop.eup %4441 }
0x101d   :  { %v1743_v1 = vmul.f32 %v4442_v18, %v4440_v45  ;;  %v4444_v44 = vpop.eup %4443  ;;  %v1742_v46 = vmul.f32 %v4442_v18, %v1642_v34  ;;  %v1788_v34 = vld [vmem:[#allocation13] sm:$0xff]  ;;  %v3905_v45 = vpack.c.bf16 %v1799_v9, %v1797_v40 }
0x101e   :  { %v1739_v14 = vadd.f32 1.0, %v4444_v44  ;;  %v3899_v36 = vpack.c.bf16 %v1790_v54, %v1788_v34  ;;  %v1796_v18 = vld [vmem:[#allocation13 + $0x40] sm:$0xff]  ;;  %v1801_v44 = vld [vmem:[#allocation13 + $0x68] sm:$0xff] }
0x101f   :  { %1745 = vrot.lane.b32.xlu0 %v1743_v1, %s4750_s6  ;;  %v1798_v1 = vld [vmem:[#allocation13 + $0x50] sm:$0xff] }
0x1020   :  { %4445 = vrcp.f32 %v1739_v14  ;;  %v1803_v14 = vld [vmem:[#allocation13 + $0x78] sm:$0xff] }
0x102a   :  { %v4446_v20 = vpop.eup %4445 }
0x1091   :  { %v1746_v56 = vpop.permute.xlu0 %1745 }
0x1092   :  { %v1748_v59 = vadd.f32 %v1746_v56, %v1742_v46  ;;  %v3907_v46 = vpack.c.bf16 %v1798_v1, %v1796_v18  ;;  %v3909_v56 = vpack.c.bf16 %v1803_v14, %v1801_v44 }
0x1094   :  { %4447 = vtanh.f32 %v1748_v59  ;;  %v1806_v59 = vld [vmem:[#allocation5 + $0x10] sm:$0xff] }
0x109e   :  { %v4448_v24 = vpop.eup %4447 }
0x109f   :  { %v1750_v28 = vmul.f32 %v4448_v24, %v4446_v20  ;;  %v5377_v20 = vpack.c.bf16 %v899_v7, %v897_v4  ;;  %v903_v24 = vld [vmem:[#allocation16 + $0x50] sm:$0xff] }
0x10a1   :  { %1752 = vrot.lane.b32.xlu1 %v1750_v28, %s4750_s6  ;;  %v908_v28 = vld [vmem:[#allocation16 + $0x78] sm:$0xff] }
0x10a2   :  { %v5389_v26 = vpack.c.bf16 %v908_v28, %v906_v23 }
0x1113   :  { %v1753_v29 = vpop.permute.xlu1 %1752 }
0x1114   :  { %1756 = vst.msk [vmem:[#allocation4 + $0x38] sm:$0xff] %vm911_vm6, %v1753_v29 }
0x111b   :  { %v5346_v52 = vld [vmem:[#allocation4 + $0x38] sm:$0xff] }
0x111c   :  { %1779 = vst.msk [vmem:[#allocation5] sm:$0xff] %vm911_vm6, %v5346_v52 }
0x1123   :  { %v1804_v17 = vld [vmem:[#allocation5] sm:$0xff] }
0x1124   :  { %3646 = vmatmul.mubr.msk.f32.vlgmr.msra.gmra.mrb[22].mxu0 %vm911_vm6, %v1804_v17 }
0x1125   :  { %3900 = vmatpush1.bf16.msra.mxu0 %v3899_v36  ;;  %1922 = vmatprep.mubr.f32.mxu0 %v4747_v0 }
0x1126   :  { %3902 = vmatprep.subr.bf16.mxu0 %v3901_v38 }
0x1128   :  { %3647 = vmatmul.mubr.msk.f32.gmra.mrb[24].mxu0 %vm911_vm6, %v1805_v41 }
0x1129   :  { %1928 = vmatprep.mubr.f32.mxu0 %v4747_v0  ;;  %3904 = vmatpush1.bf16.msra.mxu0 %v3903_v22 }
0x112a   :  { %3906 = vmatprep.subr.bf16.mxu0 %v3905_v45 }
0x112c   :  { %3648 = vmatmul.mubr.msk.f32.gmra.mrb[26].mxu0 %vm911_vm6, %v1806_v59 }
0x112d   :  { %1934 = vmatprep.mubr.f32.mxu0 %v4747_v0  ;;  %3908 = vmatpush1.bf16.msra.mxu0 %v3907_v46 }
0x112e   :  { %3910 = vmatprep.subr.bf16.mxu0 %v3909_v56 }
0x1130   :  { %3649 = vmatmul.mubr.msk.f32.gmra.mrb[28].mxu0 %vm911_vm6, %v1807_v60 }
0x1131   :  { %1940 = vmatprep.mubr.f32.mxu0 %v4747_v0  ;;  %3912 = vmatpush1.bf16.msra.mxu0 %v3911_v55 }
0x1132   :  { %3914 = vmatprep.subr.bf16.mxu0 %v5356_v57 }
0x1134   :  { %3650 = vmatmul.mubr.msk.f32.gmra.mrb[30].mxu0 %vm911_vm6, %v1808_v61 }
0x1135   :  { %1946 = vmatprep.mubr.f32.mxu0 %v4747_v0 }
0x1138   :  { %3651 = vmatmul.mubr.msk.f32.gmra.mrb[32].mxu0 %vm911_vm6, %v1809_v58 }
0x1139   :  { %1952 = vmatprep.mubr.f32.mxu0 %v4747_v0 }
0x113c   :  { %3652 = vmatmul.mubr.msk.f32.gmra.mrb[34].mxu0 %vm911_vm6, %v1810_v62 }
0x113d   :  { %1958 = vmatprep.mubr.f32.mxu0 %v4747_v0 }
0x1140   :  { %3653 = vmatmul.mubr.msk.f32.gmra.mrb[36].mxu0 %vm911_vm6, %v1811_v2 }
0x1141   :  { %2053 = vmatprep.mubr.f32.mxu0 %v4747_v0 }
0x1144   :  { %3654 = vmatmul.mubr.msk.f32.vlgmr.msra.gmra.mrb[22].mxu0 %vm911_vm6, %v5230_v8  ;;  %v5386_v8 = vpack.c.bf16 %v903_v24, %v901_v11 }
0x1145   :  { %3916 = vmatpush1.bf16.msra.mxu0 %v5369_v25  ;;  %2059 = vmatprep.mubr.f32.mxu0 %v4747_v0 }
0x1146   :  { %3918 = vmatprep.subr.bf16.mxu0 %v5371_v5 }
0x1148   :  { %3655 = vmatmul.mubr.msk.f32.gmra.mrb[24].mxu0 %vm911_vm6, %v5247_v16  ;;  %v5395_v16 = vpack.c.bf16 %v907_v32, %v905_v27 }
0x1149   :  { %2065 = vmatprep.mubr.f32.mxu0 %v4747_v0  ;;  %3920 = vmatpush1.bf16.msra.mxu0 %v5377_v20 }
0x114a   :  { %3922 = vmatprep.subr.bf16.mxu0 %v5380_v21 }
0x114c   :  { %3656 = vmatmul.mubr.msk.f32.gmra.mrb[26].mxu0 %vm911_vm6, %v5266_v13  ;;  %v2102_v13 = vld [vmem:[%s5786_s10] sm:$0x3] }
0x114d   :  { %2071 = vmatprep.mubr.f32.mxu0 %v4747_v0  ;;  %3924 = vmatpush1.bf16.msra.mxu0 %v5386_v8 }
0x114e   :  { %3926 = vmatprep.subr.bf16.mxu0 %v5389_v26 }
0x1150   :  { %3657 = vmatmul.mubr.msk.f32.gmra.mrb[28].mxu0 %vm911_vm6, %v5285_v12  ;;  %v5429_v12 = vrot.slane %v2102_v13, %v5068_v33 }
0x1151   :  { %2077 = vmatprep.mubr.f32.mxu0 %v4747_v0  ;;  %3928 = vmatpush1.bf16.msra.mxu0 %v5395_v16 }
0x1152   :  { %3930 = vmatprep.subr.bf16.mxu0 %v5356_v57 }
0x1154   :  { %3658 = vmatmul.mubr.msk.f32.gmra.mrb[30].mxu0 %vm911_vm6, %v5304_v19 }
0x1155   :  { %2083 = vmatprep.mubr.f32.mxu0 %v4747_v0 }
0x1158   :  { %3659 = vmatmul.mubr.msk.f32.gmra.mrb[32].mxu0 %vm911_vm6, %v5323_v31 }
0x1159   :  { %2089 = vmatprep.mubr.f32.mxu0 %v4747_v0 }
0x115c   :  { %3660 = vmatmul.mubr.msk.f32.gmra.mrb[34].mxu0 %vm911_vm6, %v5337_v37 }
0x115d   :  { %2095 = vmatprep.mubr.f32.mxu0 %v4747_v0 }
0x1160   :  { %3661 = vmatmul.mubr.msk.f32.gmra.mrb[36].mxu0 %vm911_vm6, %v5346_v52  ;;  %v5433_v52 = vrot.slane %v2102_v13, %v5193_v43 }
0x1161   :  { %2212 = vmatprep.mubr.f32.mxu0 %v4747_v0 }
0x1164   :  { %2213 = vmatmul.mubr.f32.vlgmr.msra.gmra.mrb[22].mxu0 %v4747_v0 }
0x1165   :  { %3932 = vmatpush1.bf16.msra.mxu0 %v5369_v25  ;;  %2315 = vmatprep.mubr.f32.mxu0 %v4747_v0 }
0x1166   :  { %3934 = vmatprep.subr.bf16.mxu0 %v5371_v5 }
0x1169   :  { %3936 = vmatpush1.bf16.msra.mxu0 %v5377_v20 }
0x116a   :  { %3938 = vmatprep.subr.bf16.mxu0 %v5380_v21 }
0x116d   :  { %3940 = vmatpush1.bf16.msra.mxu0 %v5386_v8 }
0x116e   :  { %3942 = vmatprep.subr.bf16.mxu0 %v5389_v26 }
0x1171   :  { %3944 = vmatpush1.bf16.msra.mxu0 %v5395_v16 }
0x1172   :  { %3946 = vmatprep.subr.bf16.mxu0 %v5356_v57 }
0x1237   :  { %v2214_v19 = vpop.f32.mrb[22].mxu0 }
0x1238   :  { %v4267_v31 = vadd.f32 %v2214_v19, %v5429_v12  ;;  %v2216_v37 = vpop.f32.mrb[23].mxu0 }
0x1239   :  { %v4268_v34 = vadd.f32 %v2216_v37, %v5433_v52 }
0x123a   :  { %v3662_v29 = vmul.f32 -1.442695, %v4267_v31 }
0x123b   :  { %v3663_v15 = vmul.f32 -1.442695, %v4268_v34 }
0x123c   :  { %4449 = vpow2.f32 %v3662_v29 }
0x123d   :  { %4451 = vtanh.f32 %v4268_v34 }
0x1246   :  { %v4450_v54 = vpop.eup %4449 }
0x1247   :  { %v2224_v35 = vadd.f32 1.0, %v4450_v54  ;;  %v4452_v42 = vpop.eup %4451 }
0x1249   :  { %4453 = vrcp.f32 %v2224_v35 }
0x124a   :  { %4455 = vpow2.f32 %v3663_v15 }
0x1253   :  { %v4454_v36 = vpop.eup %4453 }
0x1254   :  { %v2235_v38 = vmul.f32 %v4454_v36, %v4452_v42  ;;  %v4456_v39 = vpop.eup %4455  ;;  %v2234_v40 = vmul.f32 0.0, %v4454_v36 }
0x1255   :  { %v2231_v17 = vadd.f32 1.0, %v4456_v39 }
0x1256   :  { %2237 = vrot.lane.b32.xlu0 %v2235_v38, %s4750_s6 }
0x1257   :  { %4457 = vrcp.f32 %v2231_v17 }
0x1261   :  { %v4458_v45 = vpop.eup %4457 }
0x12c8   :  { %v2238_v9 = vpop.permute.xlu0 %2237 }
0x12c9   :  { %v2240_v22 = vadd.f32 %v2238_v9, %v2234_v40 }
0x12cb   :  { %4459 = vtanh.f32 %v2240_v22 }
0x12d5   :  { %v4460_v18 = vpop.eup %4459 }
0x12d6   :  { %v5437_v1 = vmul.f32 %v4460_v18, %v4458_v45 }
0x12d8   :  { %2247 = vrot.lane.b32.xlu1 %v5437_v1, %s4750_s6 }
0x134a   :  { %v2248_v41 = vpop.permute.xlu1 %2247 }
0x134b   :  { %3664 = vmatmul.mubr.msk.f32.vlgmr.msra.gmra.mrb[24].mxu0 %vm911_vm6, %v2248_v41 }
0x134c   :  { %3948 = vmatpush1.bf16.msra.mxu0 %v5369_v25  ;;  %2419 = vmatprep.mubr.f32.mxu0 %v4747_v0 }
0x134d   :  { %3950 = vmatprep.subr.bf16.mxu0 %v5371_v5 }
0x1350   :  { %3952 = vmatpush1.bf16.msra.mxu0 %v5377_v20 }
0x1351   :  { %3954 = vmatprep.subr.bf16.mxu0 %v5380_v21 }
0x1354   :  { %3956 = vmatpush1.bf16.msra.mxu0 %v5386_v8 }
0x1355   :  { %3958 = vmatprep.subr.bf16.mxu0 %v5389_v26 }
0x1358   :  { %3960 = vmatpush1.bf16.msra.mxu0 %v5395_v16 }
0x1359   :  { %3962 = vmatprep.subr.bf16.mxu0 %v5356_v57 }
0x141e   :  { %v2317_v44 = vpop.f32.mrb[24].mxu0 }
0x141f   :  { %v4269_v14 = vadd.f32 %v2317_v44, %v5429_v12  ;;  %v2319_v46 = vpop.f32.mrb[25].mxu0 }
0x1420   :  { %v4270_v47 = vadd.f32 %v2319_v46, %v5433_v52 }
0x1421   :  { %v3665_v56 = vmul.f32 -1.442695, %v4269_v14 }
0x1422   :  { %v3666_v60 = vmul.f32 -1.442695, %v4270_v47 }
0x1423   :  { %4461 = vpow2.f32 %v3665_v56 }
0x1424   :  { %4463 = vtanh.f32 %v4270_v47 }
0x142d   :  { %v4462_v49 = vpop.eup %4461 }
0x142e   :  { %v2327_v59 = vadd.f32 1.0, %v4462_v49  ;;  %v4464_v51 = vpop.eup %4463 }
0x1430   :  { %4465 = vrcp.f32 %v2327_v59 }
0x1431   :  { %4467 = vpow2.f32 %v3666_v60 }
0x143a   :  { %v4466_v53 = vpop.eup %4465 }
0x143b   :  { %v2338_v55 = vmul.f32 %v4466_v53, %v4464_v51  ;;  %v4468_v61 = vpop.eup %4467  ;;  %v2337_v62 = vmul.f32 %v4466_v53, %v2240_v22 }
0x143c   :  { %v2334_v58 = vadd.f32 1.0, %v4468_v61 }
0x143d   :  { %2340 = vrot.lane.b32.xlu0 %v2338_v55, %s4750_s6 }
0x143e   :  { %4469 = vrcp.f32 %v2334_v58 }
0x1448   :  { %v4470_v2 = vpop.eup %4469 }
0x14af   :  { %v2341_v63 = vpop.permute.xlu0 %2340 }
0x14b0   :  { %v2343_v48 = vadd.f32 %v2341_v63, %v2337_v62 }
0x14b2   :  { %4471 = vtanh.f32 %v2343_v48 }
0x14bc   :  { %v4472_v50 = vpop.eup %4471 }
0x14bd   :  { %v2345_v3 = vmul.f32 %v4472_v50, %v4470_v2 }
0x14bf   :  { %2351 = vrot.lane.b32.xlu1 %v2345_v3, %s4750_s6  ;;  %v2346_v36 = vmax.f32 %v5437_v1, %v2345_v3 }
0x1531   :  { %v2352_v4 = vpop.permute.xlu1 %2351 }
0x1532   :  { %3667 = vmatmul.mubr.msk.f32.vlgmr.msra.gmra.mrb[26].mxu0 %vm911_vm6, %v2352_v4 }
0x1533   :  { %3964 = vmatpush1.bf16.msra.mxu0 %v5369_v25  ;;  %2523 = vmatprep.mubr.f32.mxu0 %v4747_v0 }
0x1534   :  { %3966 = vmatprep.subr.bf16.mxu0 %v5371_v5 }
0x1537   :  { %3968 = vmatpush1.bf16.msra.mxu0 %v5377_v20 }
0x1538   :  { %3970 = vmatprep.subr.bf16.mxu0 %v5380_v21 }
0x153b   :  { %3972 = vmatpush1.bf16.msra.mxu0 %v5386_v8 }
0x153c   :  { %3974 = vmatprep.subr.bf16.mxu0 %v5389_v26 }
0x153f   :  { %3976 = vmatpush1.bf16.msra.mxu0 %v5395_v16 }
0x1540   :  { %3978 = vmatprep.subr.bf16.mxu0 %v5356_v57 }
0x1605   :  { %v2421_v7 = vpop.f32.mrb[26].mxu0 }
0x1606   :  { %v4271_v10 = vadd.f32 %v2421_v7, %v5429_v12  ;;  %v2423_v6 = vpop.f32.mrb[27].mxu0 }
0x1607   :  { %v4272_v24 = vadd.f32 %v2423_v6, %v5433_v52 }
0x1608   :  { %v3668_v11 = vmul.f32 -1.442695, %v4271_v10 }
0x1609   :  { %v3669_v19 = vmul.f32 -1.442695, %v4272_v24 }
0x160a   :  { %4473 = vpow2.f32 %v3668_v11 }
0x160b   :  { %4475 = vtanh.f32 %v4272_v24 }
0x1614   :  { %v4474_v23 = vpop.eup %4473 }
0x1615   :  { %v2431_v28 = vadd.f32 1.0, %v4474_v23  ;;  %v4476_v27 = vpop.eup %4475 }
0x1617   :  { %4477 = vrcp.f32 %v2431_v28 }
0x1618   :  { %4479 = vpow2.f32 %v3669_v19 }
0x1621   :  { %v4478_v32 = vpop.eup %4477 }
0x1622   :  { %v2442_v13 = vmul.f32 %v4478_v32, %v4476_v27  ;;  %v4480_v31 = vpop.eup %4479  ;;  %v2441_v29 = vmul.f32 %v4478_v32, %v2343_v48 }
0x1623   :  { %v2438_v37 = vadd.f32 1.0, %v4480_v31 }
0x1624   :  { %2444 = vrot.lane.b32.xlu0 %v2442_v13, %s4750_s6 }
0x1625   :  { %4481 = vrcp.f32 %v2438_v37 }
0x162f   :  { %v4482_v35 = vpop.eup %4481 }
0x1696   :  { %v2445_v34 = vpop.permute.xlu0 %2444 }
0x1697   :  { %v2447_v54 = vadd.f32 %v2445_v34, %v2441_v29 }
0x1699   :  { %4483 = vtanh.f32 %v2447_v54 }
0x16a3   :  { %v4484_v42 = vpop.eup %4483 }
0x16a4   :  { %v2449_v38 = vmul.f32 %v4484_v42, %v4482_v35 }
0x16a6   :  { %2455 = vrot.lane.b32.xlu1 %v2449_v38, %s4750_s6  ;;  %v5470_v15 = vmax.f32 %v2346_v36, %v2449_v38 }
0x1718   :  { %v2456_v39 = vpop.permute.xlu1 %2455 }
0x1719   :  { %3670 = vmatmul.mubr.msk.f32.vlgmr.msra.gmra.mrb[28].mxu0 %vm911_vm6, %v2456_v39 }
0x171a   :  { %3980 = vmatpush1.bf16.msra.mxu0 %v5369_v25  ;;  %2627 = vmatprep.mubr.f32.mxu0 %v4747_v0 }
0x171b   :  { %3982 = vmatprep.subr.bf16.mxu0 %v5371_v5 }
0x171e   :  { %3984 = vmatpush1.bf16.msra.mxu0 %v5377_v20 }
0x171f   :  { %3986 = vmatprep.subr.bf16.mxu0 %v5380_v21 }
0x1722   :  { %3988 = vmatpush1.bf16.msra.mxu0 %v5386_v8 }
0x1723   :  { %3990 = vmatprep.subr.bf16.mxu0 %v5389_v26 }
0x1726   :  { %3992 = vmatpush1.bf16.msra.mxu0 %v5395_v16 }
0x1727   :  { %3994 = vmatprep.subr.bf16.mxu0 %v5356_v57 }
0x17ec   :  { %v2525_v17 = vpop.f32.mrb[28].mxu0 }
0x17ed   :  { %v4273_v40 = vadd.f32 %v2525_v17, %v5429_v12  ;;  %v2527_v9 = vpop.f32.mrb[29].mxu0 }
0x17ee   :  { %v4274_v45 = vadd.f32 %v2527_v9, %v5433_v52 }
0x17ef   :  { %v3671_v22 = vmul.f32 -1.442695, %v4273_v40 }
0x17f0   :  { %v3672_v46 = vmul.f32 -1.442695, %v4274_v45 }
0x17f1   :  { %4485 = vpow2.f32 %v3671_v22 }
0x17f2   :  { %4487 = vtanh.f32 %v4274_v45 }
0x17fb   :  { %v4486_v18 = vpop.eup %4485 }
0x17fc   :  { %v2535_v1 = vadd.f32 1.0, %v4486_v18  ;;  %v4488_v41 = vpop.eup %4487 }
0x17fe   :  { %4489 = vrcp.f32 %v2535_v1 }
0x17ff   :  { %4491 = vpow2.f32 %v3672_v46 }
0x1808   :  { %v4490_v44 = vpop.eup %4489 }
0x1809   :  { %v2546_v14 = vmul.f32 %v4490_v44, %v4488_v41  ;;  %v4492_v56 = vpop.eup %4491  ;;  %v2545_v49 = vmul.f32 %v4490_v44, %v2447_v54 }
0x180a   :  { %v2542_v47 = vadd.f32 1.0, %v4492_v56 }
0x180b   :  { %2548 = vrot.lane.b32.xlu0 %v2546_v14, %s4750_s6 }
0x180c   :  { %4493 = vrcp.f32 %v2542_v47 }
0x1816   :  { %v4494_v53 = vpop.eup %4493 }
0x187d   :  { %v2549_v59 = vpop.permute.xlu0 %2548 }
0x187e   :  { %v2551_v51 = vadd.f32 %v2549_v59, %v2545_v49 }
0x1880   :  { %4495 = vtanh.f32 %v2551_v51 }
0x188a   :  { %v4496_v55 = vpop.eup %4495 }
0x188b   :  { %v2553_v60 = vmul.f32 %v4496_v55, %v4494_v53 }
0x188d   :  { %2559 = vrot.lane.b32.xlu1 %v2553_v60, %s4750_s6  ;;  %v2554_v61 = vmax.f32 %v5470_v15, %v2553_v60 }
0x18ff   :  { %v2560_v58 = vpop.permute.xlu1 %2559 }
0x1900   :  { %3673 = vmatmul.mubr.msk.f32.vlgmr.msra.gmra.mrb[30].mxu0 %vm911_vm6, %v2560_v58 }
0x1901   :  { %3996 = vmatpush1.bf16.msra.mxu0 %v5369_v25  ;;  %2731 = vmatprep.mubr.f32.mxu0 %v4747_v0 }
0x1902   :  { %3998 = vmatprep.subr.bf16.mxu0 %v5371_v5 }
0x1905   :  { %4000 = vmatpush1.bf16.msra.mxu0 %v5377_v20 }
0x1906   :  { %4002 = vmatprep.subr.bf16.mxu0 %v5380_v21 }
0x1909   :  { %4004 = vmatpush1.bf16.msra.mxu0 %v5386_v8 }
0x190a   :  { %4006 = vmatprep.subr.bf16.mxu0 %v5389_v26 }
0x190d   :  { %4008 = vmatpush1.bf16.msra.mxu0 %v5395_v16 }
0x190e   :  { %4010 = vmatprep.subr.bf16.mxu0 %v5356_v57 }
0x19d3   :  { %v2629_v62 = vpop.f32.mrb[30].mxu0 }
0x19d4   :  { %v4275_v63 = vadd.f32 %v2629_v62, %v5429_v12  ;;  %v2631_v48 = vpop.f32.mrb[31].mxu0 }
0x19d5   :  { %v4276_v50 = vadd.f32 %v2631_v48, %v5433_v52 }
0x19d6   :  { %v3674_v2 = vmul.f32 -1.442695, %v4275_v63 }
0x19d7   :  { %v3675_v11 = vmul.f32 -1.442695, %v4276_v50 }
0x19d8   :  { %4497 = vpow2.f32 %v3674_v2 }
0x19d9   :  { %4499 = vtanh.f32 %v4276_v50 }
0x19e2   :  { %v4498_v3 = vpop.eup %4497 }
0x19e3   :  { %v2639_v4 = vadd.f32 1.0, %v4498_v3  ;;  %v4500_v7 = vpop.eup %4499 }
0x19e5   :  { %4501 = vrcp.f32 %v2639_v4 }
0x19e6   :  { %4503 = vpow2.f32 %v3675_v11 }
0x19ef   :  { %v4502_v10 = vpop.eup %4501 }
0x19f0   :  { %v2650_v6 = vmul.f32 %v4502_v10, %v4500_v7  ;;  %v4504_v24 = vpop.eup %4503  ;;  %v2649_v28 = vmul.f32 %v4502_v10, %v2551_v51 }
0x19f1   :  { %v2646_v23 = vadd.f32 1.0, %v4504_v24 }
0x19f2   :  { %2652 = vrot.lane.b32.xlu0 %v2650_v6, %s4750_s6 }
0x19f3   :  { %4505 = vrcp.f32 %v2646_v23 }
0x19fd   :  { %v4506_v13 = vpop.eup %4505 }
0x1a64   :  { %v2653_v27 = vpop.permute.xlu0 %2652 }
0x1a65   :  { %v2655_v32 = vadd.f32 %v2653_v27, %v2649_v28 }
0x1a67   :  { %4507 = vtanh.f32 %v2655_v32 }
0x1a71   :  { %v4508_v19 = vpop.eup %4507 }
0x1a72   :  { %v2657_v31 = vmul.f32 %v4508_v19, %v4506_v13  ;;  %v2978_v13 = vld [vmem:[%s5788_s12 + $0x38] sm:$0xff]  ;;  %v2971_v19 = vld [vmem:[%s5788_s12] sm:$0xff] }
0x1a74   :  { %2663 = vrot.lane.b32.xlu1 %v2657_v31, %s4750_s6  ;;  %v5501_v37 = vmax.f32 %v2554_v61, %v2657_v31  ;;  %v2975_v31 = vld [vmem:[%s5788_s12 + $0x20] sm:$0xff] }
0x1ae6   :  { %v2664_v29 = vpop.permute.xlu1 %2663 }
0x1ae7   :  { %3676 = vmatmul.mubr.msk.f32.vlgmr.msra.gmra.mrb[32].mxu0 %vm911_vm6, %v2664_v29  ;;  %v4043_v29 = vpack.c.bf16 %v2975_v31, %v2971_v19  ;;  %v3181_v19 = vld [vmem:[#allocation17 + $0x28] sm:$0xff]  ;;  %v3183_v31 = vld [vmem:[#allocation17 + $0x38] sm:$0xff] }
0x1ae8   :  { %4012 = vmatpush1.bf16.msra.mxu0 %v5369_v25  ;;  %2835 = vmatprep.mubr.f32.mxu0 %v4747_v0 }
0x1ae9   :  { %4014 = vmatprep.subr.bf16.mxu0 %v5371_v5 }
0x1aec   :  { %4016 = vmatpush1.bf16.msra.mxu0 %v5377_v20 }
0x1aed   :  { %4018 = vmatprep.subr.bf16.mxu0 %v5380_v21 }
0x1af0   :  { %4020 = vmatpush1.bf16.msra.mxu0 %v5386_v8 }
0x1af1   :  { %4022 = vmatprep.subr.bf16.mxu0 %v5389_v26 }
0x1af4   :  { %4024 = vmatpush1.bf16.msra.mxu0 %v5395_v16 }
0x1af5   :  { %4026 = vmatprep.subr.bf16.mxu0 %v5356_v57 }
0x1bba   :  { %v2733_v34 = vpop.f32.mrb[32].mxu0 }
0x1bbb   :  { %v4277_v54 = vadd.f32 %v2733_v34, %v5429_v12  ;;  %v2735_v35 = vpop.f32.mrb[33].mxu0  ;;  %v2973_v34 = vld [vmem:[%s5788_s12 + $0x10] sm:$0xff] }
0x1bbc   :  { %v4278_v36 = vadd.f32 %v2735_v35, %v5433_v52  ;;  %v2980_v35 = vld [vmem:[%s5788_s12 + $0x48] sm:$0xff] }
0x1bbd   :  { %v3677_v42 = vmul.f32 -1.442695, %v4277_v54  ;;  %v2977_v54 = vld [vmem:[%s5788_s12 + $0x30] sm:$0xff] }
0x1bbe   :  { %v3678_v9 = vmul.f32 -1.442695, %v4278_v36 }
0x1bbf   :  { %4509 = vpow2.f32 %v3677_v42  ;;  %v4059_v42 = vpack.c.bf16 %v2977_v54, %v2973_v34  ;;  %v3185_v54 = vld [vmem:[#allocation17 + $0x48] sm:$0xff] }
0x1bc0   :  { %4511 = vtanh.f32 %v4278_v36  ;;  %v2984_v36 = vld [vmem:[%s5788_s12 + $0x68] sm:$0xff] }
0x1bc9   :  { %v4510_v38 = vpop.eup %4509 }
0x1bca   :  { %v2743_v15 = vadd.f32 1.0, %v4510_v38  ;;  %v4512_v39 = vpop.eup %4511  ;;  %v2982_v38 = vld [vmem:[%s5788_s12 + $0x58] sm:$0xff] }
0x1bcc   :  { %4513 = vrcp.f32 %v2743_v15  ;;  %v2986_v15 = vld [vmem:[%s5788_s12 + $0x78] sm:$0xff] }
0x1bcd   :  { %4515 = vpow2.f32 %v3678_v9  ;;  %v2983_v9 = vld [vmem:[%s5788_s12 + $0x60] sm:$0xff] }
0x1bd6   :  { %v4514_v17 = vpop.eup %4513 }
0x1bd7   :  { %v2754_v40 = vmul.f32 %v4514_v17, %v4512_v39  ;;  %v4516_v57 = vpop.eup %4515  ;;  %v2753_v45 = vmul.f32 %v4514_v17, %v2655_v32  ;;  %v4045_v39 = vpack.c.bf16 %v2984_v36, %v2980_v35  ;;  %v4061_v17 = vpack.c.bf16 %v2986_v15, %v2982_v38  ;;  %v3187_v35 = vld [vmem:[#allocation17 + $0x58] sm:$0xff]  ;;  %v3184_v36 = vld [vmem:[#allocation17 + $0x40] sm:$0xff]  ;;  %v3186_v38 = vld [vmem:[#allocation17 + $0x50] sm:$0xff] }
0x1bd8   :  { %v2750_v22 = vadd.f32 1.0, %v4516_v57  ;;  %v2981_v57 = vld [vmem:[%s5788_s12 + $0x50] sm:$0xff]  ;;  %v3189_v15 = vld [vmem:[#allocation17 + $0x68] sm:$0xff] }
0x1bd9   :  { %2756 = vrot.lane.b32.xlu0 %v2754_v40, %s4750_s6  ;;  %v2979_v40 = vld [vmem:[%s5788_s12 + $0x40] sm:$0xff] }
0x1bda   :  { %4517 = vrcp.f32 %v2750_v22  ;;  %v4047_v22 = vpack.c.bf16 %v2983_v9, %v2979_v40  ;;  %v3188_v9 = vld [vmem:[#allocation17 + $0x60] sm:$0xff] }
0x1be4   :  { %v4518_v41 = vpop.eup %4517 }
0x1c4b   :  { %v2757_v18 = vpop.permute.xlu0 %2756 }
0x1c4c   :  { %v2759_v1 = vadd.f32 %v2757_v18, %v2753_v45  ;;  %v2985_v45 = vld [vmem:[%s5788_s12 + $0x70] sm:$0xff]  ;;  %v2988_v18 = vld [vmem:[%s5788_s12 + $0x88] sm:$0xff] }
0x1c4e   :  { %4519 = vtanh.f32 %v2759_v1 }
0x1c58   :  { %v4520_v44 = vpop.eup %4519 }
0x1c59   :  { %v2761_v14 = vmul.f32 %v4520_v44, %v4518_v41  ;;  %v4063_v41 = vpack.c.bf16 %v2985_v45, %v2981_v57  ;;  %v3190_v57 = vld [vmem:[#allocation17 + $0x70] sm:$0xff]  ;;  %v3195_v45 = vld [vmem:[#allocation17 + $0x98] sm:$0xff] }
0x1c5b   :  { %2767 = vrot.lane.b32.xlu1 %v2761_v14, %s4750_s6  ;;  %v2762_v46 = vmax.f32 %v5501_v37, %v2761_v14  ;;  %v2990_v14 = vld [vmem:[%s5788_s12 + $0x98] sm:$0xff] }
0x1ccd   :  { %v2768_v56 = vpop.permute.xlu1 %2767 }
0x1cce   :  { %3679 = vmatmul.mubr.msk.f32.vlgmr.msra.gmra.mrb[34].mxu0 %vm911_vm6, %v2768_v56  ;;  %v2987_v56 = vld [vmem:[%s5788_s12 + $0x80] sm:$0xff] }
0x1ccf   :  { %4028 = vmatpush1.bf16.msra.mxu0 %v5369_v25  ;;  %2939 = vmatprep.mubr.f32.mxu0 %v4747_v0 }
0x1cd0   :  { %4030 = vmatprep.subr.bf16.mxu0 %v5371_v5 }
0x1cd3   :  { %4032 = vmatpush1.bf16.msra.mxu0 %v5377_v20 }
0x1cd4   :  { %4034 = vmatprep.subr.bf16.mxu0 %v5380_v21 }
0x1cd7   :  { %4036 = vmatpush1.bf16.msra.mxu0 %v5386_v8 }
0x1cd8   :  { %4038 = vmatprep.subr.bf16.mxu0 %v5389_v26 }
0x1cdb   :  { %4040 = vmatpush1.bf16.msra.mxu0 %v5395_v16 }
0x1da1   :  { %v2837_v47 = vpop.f32.mrb[34].mxu0 }
0x1da2   :  { %v4279_v49 = vadd.f32 %v2837_v47, %v5429_v12  ;;  %v2839_v59 = vpop.f32.mrb[35].mxu0 }
0x1da3   :  { %v4280_v25 = vadd.f32 %v2839_v59, %v5433_v52  ;;  %v2989_v59 = vld [vmem:[%s5788_s12 + $0x90] sm:$0xff] }
0x1da4   :  { %v3680_v51 = vmul.f32 -1.442695, %v4279_v49  ;;  %v2991_v49 = vld [vmem:[%s5788_s12 + $0xa0] sm:$0xff] }
0x1da5   :  { %v3681_v8 = vmul.f32 -1.442695, %v4280_v25 }
0x1da6   :  { %4521 = vpow2.f32 %v3680_v51  ;;  %v2993_v51 = vld [vmem:[%s5788_s12 + $0xb0] sm:$0xff] }
0x1da7   :  { %4523 = vtanh.f32 %v4280_v25  ;;  %v4051_v25 = vpack.c.bf16 %v2991_v49, %v2987_v56  ;;  %v3196_v49 = vld [vmem:[#allocation17 + $0xa0] sm:$0xff] }
0x1db0   :  { %v4522_v53 = vpop.eup %4521 }
0x1db1   :  { %v2847_v5 = vadd.f32 1.0, %v4522_v53  ;;  %v4524_v20 = vpop.eup %4523  ;;  %v2996_v53 = vld [vmem:[%s5788_s12 + $0xc8] sm:$0xff] }
0x1db3   :  { %4525 = vrcp.f32 %v2847_v5  ;;  %v3000_v5 = vld [vmem:[%s5788_s12 + $0xe8] sm:$0xff] }
0x1db4   :  { %4527 = vpow2.f32 %v3681_v8  ;;  %v3002_v8 = vld [vmem:[%s5788_s12 + $0xf8] sm:$0xff] }
0x1dbd   :  { %v4526_v21 = vpop.eup %4525 }
0x1dbe   :  { %v2858_v55 = vmul.f32 %v4526_v21, %v4524_v20  ;;  %v4528_v26 = vpop.eup %4527  ;;  %v2857_v60 = vmul.f32 %v4526_v21, %v2759_v1  ;;  %v2992_v1 = vld [vmem:[%s5788_s12 + $0xa8] sm:$0xff]  ;;  %v2998_v20 = vld [vmem:[%s5788_s12 + $0xd8] sm:$0xff]  ;;  %v4067_v21 = vpack.c.bf16 %v2993_v51, %v2989_v59  ;;  %v3198_v59 = vld [vmem:[#allocation17 + $0xb0] sm:$0xff] }
0x1dbf   :  { %v2854_v16 = vadd.f32 1.0, %v4528_v26  ;;  %v4049_v44 = vpack.c.bf16 %v2992_v1, %v2988_v18  ;;  %v2995_v26 = vld [vmem:[%s5788_s12 + $0xc0] sm:$0xff]  ;;  %v4087_v18 = vpack.c.bf16 %v3190_v57, %v3188_v9  ;;  %v3201_v51 = vld [vmem:[#allocation17 + $0xc8] sm:$0xff]  ;;  %v3230_v9 = vld [vmem:[#allocation17 + $0x1b0] sm:$0xff] }
0x1dc0   :  { %2860 = vrot.lane.b32.xlu0 %v2858_v55, %s4750_s6  ;;  %v4053_v55 = vpack.c.bf16 %v3000_v5, %v2996_v53  ;;  %v4095_v53 = vpack.c.bf16 %v3198_v59, %v3196_v49  ;;  %v3233_v57 = vld [vmem:[#allocation17 + $0x1c8] sm:$0xff]  ;;  %v3238_v49 = vld [vmem:[#allocation17 + $0x1f0] sm:$0xff] }
0x1dc1   :  { %4529 = vrcp.f32 %v2854_v16  ;;  %v2999_v16 = vld [vmem:[%s5788_s12 + $0xe0] sm:$0xff] }
0x1dcb   :  { %v4530_v62 = vpop.eup %4529 }
0x1e32   :  { %v2861_v61 = vpop.permute.xlu0 %2860 }
0x1e33   :  { %v5530_v58 = vadd.f32 %v2861_v61, %v2857_v60  ;;  %v4069_v60 = vpack.c.bf16 %v3002_v8, %v2998_v20  ;;  %v2997_v61 = vld [vmem:[%s5788_s12 + $0xd0] sm:$0xff]  ;;  %v3200_v20 = vld [vmem:[#allocation17 + $0xc0] sm:$0xff]  ;;  %v3207_v8 = vld [vmem:[#allocation17 + $0xf8] sm:$0xff] }
0x1e35   :  { %4531 = vtanh.f32 %v5530_v58 }
0x1e3f   :  { %v4532_v63 = vpop.eup %4531 }
0x1e40   :  { %v2865_v48 = vmul.f32 %v4532_v63, %v4530_v62  ;;  %v3001_v62 = vld [vmem:[%s5788_s12 + $0xf0] sm:$0xff]  ;;  %v4055_v63 = vpack.c.bf16 %v2999_v16, %v2995_v26 }
0x1e42   :  { %2871 = vrot.lane.b32.xlu1 %v2865_v48, %s4750_s6  ;;  %v5534_v2 = vmax.f32 %v2762_v46, %v2865_v48  ;;  %v2994_v46 = vld [vmem:[%s5788_s12 + $0xb8] sm:$0xff]  ;;  %v4071_v48 = vpack.c.bf16 %v3001_v62, %v2997_v61  ;;  %v3206_v61 = vld [vmem:[#allocation17 + $0xf0] sm:$0xff]  ;;  %v3209_v62 = vld [vmem:[#allocation17 + $0x108] sm:$0xff] }
0x1e43   :  { %v4065_v47 = vpack.c.bf16 %v2994_v46, %v2990_v14  ;;  %v3197_v14 = vld [vmem:[#allocation17 + $0xa8] sm:$0xff]  ;;  %v3199_v46 = vld [vmem:[#allocation17 + $0xb8] sm:$0xff] }
0x1eb4   :  { %v2872_v50 = vpop.permute.xlu1 %2871 }
0x1eb5   :  { %3682 = vmatmul.mubr.msk.f32.vlgmr.msra.gmra.mrb[36].mxu0 %vm911_vm6, %v2872_v50 }
0x1eb6   :  { %3165 = vmatprep.mubr.f32.mxu0 %v4747_v0  ;;  %v2972_v0 = vld [vmem:[%s5788_s12 + $0x8] sm:$0xff] }
0x1f88   :  { %v2941_v3 = vpop.f32.mrb[36].mxu0 }
0x1f89   :  { %v4281_v4 = vadd.f32 %v2941_v3, %v5429_v12  ;;  %v2943_v7 = vpop.f32.mrb[37].mxu0  ;;  %v2976_v12 = vld [vmem:[%s5788_s12 + $0x28] sm:$0xff] }
0x1f8a   :  { %v5540_v6 = vadd.f32 %v2943_v7, %v5433_v52  ;;  %v2974_v52 = vld [vmem:[%s5788_s12 + $0x18] sm:$0xff]  ;;  %v4041_v32 = vpack.c.bf16 %v2976_v12, %v2972_v0 }
0x1f8b   :  { %v3683_v10 = vmul.f32 -1.442695, %v4281_v4  ;;  %v4057_v37 = vpack.c.bf16 %v2978_v13, %v2974_v52  ;;  %v3178_v13 = vld [vmem:[#allocation17 + $0x10] sm:$0xff] }
0x1f8c   :  { %4042 = vmatprep.subr.bf16.mxu1 %v4041_v32  ;;  %v3684_v50 = vmul.f32 -1.442695, %v5540_v6 }
0x1f8d   :  { %4533 = vpow2.f32 %v3683_v10  ;;  %4058 = vmatprep.subr.bf16.mxu0 %v4057_v37  ;;  %4044 = vmatpush1.bf16.msra.mxu1 %v4043_v29  ;;  %v3180_v37 = vld [vmem:[#allocation17 + $0x20] sm:$0xff]  ;;  %v3182_v29 = vld [vmem:[#allocation17 + $0x30] sm:$0xff] }
0x1f8e   :  { %4535 = vtanh.f32 %v5540_v6  ;;  %4060 = vmatpush1.bf16.msra.mxu0 %v4059_v42  ;;  %4046 = vmatprep.subr.bf16.mxu1 %v4045_v39  ;;  %v3176_v6 = vld [vmem:[#allocation17] sm:$0xff]  ;;  %v4079_v42 = vpack.c.bf16 %v3182_v29, %v3180_v37  ;;  %v3191_v39 = vld [vmem:[#allocation17 + $0x78] sm:$0xff]  ;;  %v3222_v29 = vld [vmem:[#allocation17 + $0x170] sm:$0xff] }
0x1f8f   :  { %4062 = vmatprep.subr.bf16.mxu0 %v4061_v17  ;;  %v4083_v17 = vpack.c.bf16 %v3186_v38, %v3184_v36  ;;  %v4085_v40 = vpack.c.bf16 %v3191_v39, %v3189_v15  ;;  %v3220_v37 = vld [vmem:[#allocation17 + $0x160] sm:$0xff]  ;;  %v3226_v36 = vld [vmem:[#allocation17 + $0x190] sm:$0xff]  ;;  %v3229_v38 = vld [vmem:[#allocation17 + $0x1a8] sm:$0xff] }
0x1f90   :  { %v3231_v15 = vld [vmem:[#allocation17 + $0x1b8] sm:$0xff] }
0x1f91   :  { %4048 = vmatpush1.bf16.msra.mxu1 %v4047_v22  ;;  %v3193_v22 = vld [vmem:[#allocation17 + $0x88] sm:$0xff] }
0x1f92   :  { %4064 = vmatpush1.bf16.msra.mxu0 %v4063_v41  ;;  %4050 = vmatprep.subr.bf16.mxu1 %v4049_v44  ;;  %v4089_v1 = vpack.c.bf16 %v3195_v45, %v3193_v22  ;;  %v3192_v41 = vld [vmem:[#allocation17 + $0x80] sm:$0xff]  ;;  %v3194_v44 = vld [vmem:[#allocation17 + $0x90] sm:$0xff]  ;;  %v3235_v22 = vld [vmem:[#allocation17 + $0x1d8] sm:$0xff] }
0x1f93   :  { %4066 = vmatprep.subr.bf16.mxu0 %v4065_v47  ;;  %v4091_v56 = vpack.c.bf16 %v3194_v44, %v3192_v41  ;;  %v4093_v47 = vpack.c.bf16 %v3199_v46, %v3197_v14  ;;  %v3234_v41 = vld [vmem:[#allocation17 + $0x1d0] sm:$0xff]  ;;  %v3237_v14 = vld [vmem:[#allocation17 + $0x1e8] sm:$0xff]  ;;  %v3239_v46 = vld [vmem:[#allocation17 + $0x1f8] sm:$0xff] }
0x1f95   :  { %4052 = vmatpush1.bf16.msra.mxu1 %v4051_v25  ;;  %v3203_v25 = vld [vmem:[#allocation17 + $0xd8] sm:$0xff] }
0x1f96   :  { %4068 = vmatpush1.bf16.msra.mxu0 %v4067_v21  ;;  %4054 = vmatprep.subr.bf16.mxu1 %v4053_v55  ;;  %v4097_v5 = vpack.c.bf16 %v3203_v25, %v3201_v51  ;;  %v3202_v21 = vld [vmem:[#allocation17 + $0xd0] sm:$0xff]  ;;  %v3205_v55 = vld [vmem:[#allocation17 + $0xe8] sm:$0xff]  ;;  %v3243_v25 = vld [vmem:[#allocation17 + $0x218] sm:$0xff] }
0x1f97   :  { %v4534_v11 = vpop.eup %4533  ;;  %4070 = vmatprep.subr.bf16.mxu0 %v4069_v60  ;;  %v4099_v26 = vpack.c.bf16 %v3202_v21, %v3200_v20  ;;  %v4101_v16 = vpack.c.bf16 %v3207_v8, %v3205_v55  ;;  %v3204_v60 = vld [vmem:[#allocation17 + $0xe0] sm:$0xff]  ;;  %v3241_v51 = vld [vmem:[#allocation17 + $0x208] sm:$0xff] }
0x1f98   :  { %v2951_v24 = vadd.f32 1.0, %v4534_v11  ;;  %v4536_v23 = vpop.eup %4535  ;;  %v3477_v20 = vld [vmem:[%s5792_s16 + $0x88] sm:$0xff]  ;;  %v3460_v21 = vld [vmem:[%s5792_s16] sm:$0xff] }
0x1f99   :  { %4056 = vmatpush1.bf16.msra.mxu1 %v4055_v63  ;;  %v3211_v63 = vld [vmem:[#allocation17 + $0x118] sm:$0xff]  ;;  %v3461_v8 = vld [vmem:[%s5792_s16 + $0x8] sm:$0xff] }
0x1f9a   :  { %4537 = vrcp.f32 %v2951_v24  ;;  %4072 = vmatpush1.bf16.msra.mxu0 %v4071_v48  ;;  %v3177_v24 = vld [vmem:[#allocation17 + $0x8] sm:$0xff]  ;;  %v4103_v48 = vpack.c.bf16 %v3206_v61, %v3204_v60  ;;  %v4203_v60 = vpack.c.bf16 %v3461_v8, %v3460_v21  ;;  %v3251_v21 = vld [vmem:[#allocation17 + $0x258] sm:$0xff] }
0x1f9b   :  { %4539 = vpow2.f32 %v3684_v50  ;;  %v4105_v50 = vpack.c.bf16 %v3211_v63, %v3209_v62  ;;  %v3462_v62 = vld [vmem:[%s5792_s16 + $0x10] sm:$0xff]  ;;  %v3463_v63 = vld [vmem:[%s5792_s16 + $0x18] sm:$0xff] }
0x1fa4   :  { %v5543_v28 = vpop.eup %4537 }
0x1fa5   :  { %v2962_v27 = vmul.f32 %v5543_v28, %v4536_v23  ;;  %v4540_v3 = vpop.eup %4539  ;;  %v2961_v7 = vmul.f32 %v5543_v28, %v5530_v58  ;;  %v3179_v23 = vld [vmem:[#allocation17 + $0x18] sm:$0xff]  ;;  %v4075_v58 = vpack.c.bf16 %v3178_v13, %v3176_v6  ;;  %v4077_v28 = vpack.c.bf16 %v3183_v31, %v3181_v19  ;;  %v3216_v6 = vld [vmem:[#allocation17 + $0x140] sm:$0xff]  ;;  %v3218_v13 = vld [vmem:[#allocation17 + $0x150] sm:$0xff] }
0x1fa6   :  { %v2958_v4 = vadd.f32 1.0, %v4540_v3  ;;  %v3208_v3 = vld [vmem:[#allocation17 + $0x100] sm:$0xff]  ;;  %v3221_v19 = vld [vmem:[#allocation17 + $0x168] sm:$0xff]  ;;  %v3223_v31 = vld [vmem:[#allocation17 + $0x178] sm:$0xff] }
0x1fa7   :  { %2964 = vrot.lane.b32.xlu0 %v2962_v27, %s4750_s6  ;;  %v4073_v27 = vpack.c.bf16 %v3179_v23, %v3177_v24  ;;  %v3212_v23 = vld [vmem:[#allocation17 + $0x120] sm:$0xff] }
0x1fa8   :  { %4541 = vrcp.f32 %v2958_v4  ;;  %v3210_v4 = vld [vmem:[#allocation17 + $0x110] sm:$0xff] }
0x1fa9   :  { %4074 = vmatprep.subr.bf16.mxu1 %v4073_v27  ;;  %v3214_v27 = vld [vmem:[#allocation17 + $0x130] sm:$0xff] }
0x1fb2   :  { %v4542_v0 = vpop.eup %4541 }
0x2019   :  { %v2965_v10 = vpop.permute.xlu0 %2964 }
0x201a   :  { %v2967_v11 = vadd.f32 %v2965_v10, %v2961_v7  ;;  %v3213_v7 = vld [vmem:[#allocation17 + $0x128] sm:$0xff]  ;;  %v3215_v10 = vld [vmem:[#allocation17 + $0x138] sm:$0xff] }
0x201b   :  { %v4109_v24 = vpack.c.bf16 %v3215_v10, %v3213_v7  ;;  %v3464_v7 = vld [vmem:[%s5792_s16 + $0x20] sm:$0xff]  ;;  %v3465_v10 = vld [vmem:[%s5792_s16 + $0x28] sm:$0xff] }
0x201c   :  { %4543 = vtanh.f32 %v2967_v11  ;;  %v4107_v11 = vpack.c.bf16 %v3210_v4, %v3208_v3  ;;  %v4207_v3 = vpack.c.bf16 %v3463_v63, %v3462_v62 }
0x2026   :  { %v4544_v12 = vpop.eup %4543 }
0x2027   :  { %v2969_v52 = vmul.f32 %v4544_v12, %v4542_v0  ;;  %v3217_v0 = vld [vmem:[#allocation17 + $0x148] sm:$0xff]  ;;  %v3219_v12 = vld [vmem:[#allocation17 + $0x158] sm:$0xff] }
0x2029   :  { %v2970_v32 = vmax.f32 %v5534_v2, %v2969_v52  ;;  %v4081_v2 = vpack.c.bf16 %v3187_v35, %v3185_v54  ;;  %v4111_v52 = vpack.c.bf16 %v3214_v27, %v3212_v23  ;;  %v3227_v54 = vld [vmem:[#allocation17 + $0x198] sm:$0xff]  ;;  %v4119_v35 = vpack.c.bf16 %v3222_v29, %v3220_v37 }
0x202a   :  { %v4211_v23 = vpack.c.bf16 %v3465_v10, %v3464_v7 }
0x202b   :  { %3026 = vrot.lane.b32.xlu1 %v2970_v32, %s4750_s6  ;;  %v4113_v32 = vpack.c.bf16 %v3219_v12, %v3217_v0  ;;  %v3466_v0 = vld [vmem:[%s5792_s16 + $0x30] sm:$0xff]  ;;  %v3467_v12 = vld [vmem:[%s5792_s16 + $0x38] sm:$0xff] }
0x209d   :  { %v3027_v34 = vpop.permute.xlu1 %3026 }
0x209e   :  { %3685 = vmatmul.mubr.msk.f32.vlgmr.msra.gmra.mrb[20].mxu1 %vm911_vm6, %v3027_v34  ;;  %3686 = vmatmul.mubr.msk.f32.vlgmr.msra.gmra.mrb[38].mxu0 %vm911_vm6, %v3027_v34  ;;  %v3225_v34 = vld [vmem:[#allocation17 + $0x188] sm:$0xff] }
0x209f   :  { %4076 = vmatpush1.bf16.msra.mxu1 %v4075_v58  ;;  %v4115_v58 = vpack.c.bf16 %v3218_v13, %v3216_v6  ;;  %v4215_v6 = vpack.c.bf16 %v3467_v12, %v3466_v0 }
0x20a0   :  { %4078 = vmatprep.subr.bf16.mxu1 %v4077_v28  ;;  %v4117_v28 = vpack.c.bf16 %v3223_v31, %v3221_v19  ;;  %v3468_v19 = vld [vmem:[%s5792_s16 + $0x40] sm:$0xff]  ;;  %v3469_v31 = vld [vmem:[%s5792_s16 + $0x48] sm:$0xff] }
0x20a1   :  { %v4219_v37 = vpack.c.bf16 %v3469_v31, %v3468_v19 }
0x20a3   :  { %4080 = vmatpush1.bf16.msra.mxu1 %v4079_v42  ;;  %v4121_v42 = vpack.c.bf16 %v3227_v54, %v3225_v34  ;;  %v3470_v34 = vld [vmem:[%s5792_s16 + $0x50] sm:$0xff]  ;;  %v3471_v54 = vld [vmem:[%s5792_s16 + $0x58] sm:$0xff] }
0x20a4   :  { %4082 = vmatprep.subr.bf16.mxu1 %v4081_v2  ;;  %v3224_v2 = vld [vmem:[#allocation17 + $0x180] sm:$0xff] }
0x20a5   :  { %v4123_v39 = vpack.c.bf16 %v3226_v36, %v3224_v2  ;;  %v4223_v2 = vpack.c.bf16 %v3471_v54, %v3470_v34 }
0x20a7   :  { %4084 = vmatpush1.bf16.msra.mxu1 %v4083_v17  ;;  %v4125_v17 = vpack.c.bf16 %v3231_v15, %v3229_v38  ;;  %v5731_v38 = vld [vmem:[%s5789_s13] sm:$0xf]  ;;  %v3019_v15 = vsub.s32 3, %v5062_v30 }
0x20a8   :  { %4086 = vmatprep.subr.bf16.mxu1 %v4085_v40  ;;  %v3228_v40 = vld [vmem:[#allocation17 + $0x1a0] sm:$0xff] }
0x20a9   :  { %v4127_v45 = vpack.c.bf16 %v3230_v9, %v3228_v40  ;;  %v3020_v40 = vrot.slane %v5731_v38, %v3019_v15 }
0x20ab   :  { %4088 = vmatpush1.bf16.msra.mxu1 %v4087_v18  ;;  %v4129_v18 = vpack.c.bf16 %v3235_v22, %v3233_v57 }
0x20ac   :  { %4090 = vmatprep.subr.bf16.mxu1 %v4089_v1  ;;  %v3232_v1 = vld [vmem:[#allocation17 + $0x1c0] sm:$0xff] }
0x20ad   :  { %v4131_v44 = vpack.c.bf16 %v3234_v41, %v3232_v1  ;;  %v3240_v1 = vld [vmem:[#allocation17 + $0x200] sm:$0xff]  ;;  %v3242_v41 = vld [vmem:[#allocation17 + $0x210] sm:$0xff] }
0x20af   :  { %4092 = vmatpush1.bf16.msra.mxu1 %v4091_v56  ;;  %v4133_v56 = vpack.c.bf16 %v3239_v46, %v3237_v14  ;;  %v3245_v46 = vld [vmem:[#allocation17 + $0x228] sm:$0xff] }
0x20b0   :  { %4094 = vmatprep.subr.bf16.mxu1 %v4093_v47  ;;  %v3236_v47 = vld [vmem:[#allocation17 + $0x1e0] sm:$0xff] }
0x20b1   :  { %v4135_v59 = vpack.c.bf16 %v3238_v49, %v3236_v47  ;;  %v4139_v49 = vpack.c.bf16 %v3242_v41, %v3240_v1  ;;  %v3276_v1 = vld [vmem:[#allocation17 + $0x320] sm:$0xff]  ;;  %v3278_v41 = vld [vmem:[#allocation17 + $0x330] sm:$0xff] }
0x20b3   :  { %4096 = vmatpush1.bf16.msra.mxu1 %v4095_v53  ;;  %v4137_v53 = vpack.c.bf16 %v3243_v25, %v3241_v51  ;;  %v3244_v25 = vld [vmem:[#allocation17 + $0x220] sm:$0xff] }
0x20b4   :  { %4098 = vmatprep.subr.bf16.mxu1 %v4097_v5  ;;  %v3476_v5 = vld [vmem:[%s5792_s16 + $0x80] sm:$0xff] }
0x20b5   :  { %v4201_v55 = vpack.c.bf16 %v3477_v20, %v3476_v5  ;;  %v3249_v20 = vld [vmem:[#allocation17 + $0x248] sm:$0xff] }
0x20b6   :  { %v4145_v8 = vpack.c.bf16 %v3251_v21, %v3249_v20  ;;  %v3286_v20 = vld [vmem:[#allocation17 + $0x370] sm:$0xff]  ;;  %v3289_v21 = vld [vmem:[#allocation17 + $0x388] sm:$0xff] }
0x20b7   :  { %4100 = vmatpush1.bf16.msra.mxu1 %v4099_v26  ;;  %v3478_v26 = vld [vmem:[%s5792_s16 + $0x90] sm:$0xff]  ;;  %4202 = vmatprep.subr.bf16.mxu0 %v4201_v55 }
0x20b8   :  { %4102 = vmatprep.subr.bf16.mxu1 %v4101_v16  ;;  %v3479_v16 = vld [vmem:[%s5792_s16 + $0x98] sm:$0xff]  ;;  %4204 = vmatpush3.bf16.msra.mxu0 %v4203_v60  ;;  %v3253_v60 = vld [vmem:[#allocation17 + $0x268] sm:$0xff] }
0x20b9   :  { %v4205_v61 = vpack.c.bf16 %v3479_v16, %v3478_v26  ;;  %v3248_v26 = vld [vmem:[#allocation17 + $0x240] sm:$0xff]  ;;  %v3250_v16 = vld [vmem:[#allocation17 + $0x250] sm:$0xff] }
0x20ba   :  { %v4147_v62 = vpack.c.bf16 %v3250_v16, %v3248_v26  ;;  %v3288_v16 = vld [vmem:[#allocation17 + $0x380] sm:$0xff] }
0x20bb   :  { %4104 = vmatpush1.bf16.msra.mxu1 %v4103_v48  ;;  %v3480_v48 = vld [vmem:[%s5792_s16 + $0xa0] sm:$0xff]  ;;  %4206 = vmatprep.subr.bf16.mxu0 %v4205_v61  ;;  %v3255_v61 = vld [vmem:[#allocation17 + $0x278] sm:$0xff] }
0x20bc   :  { %4106 = vmatprep.subr.bf16.mxu1 %v4105_v50  ;;  %v3481_v50 = vld [vmem:[%s5792_s16 + $0xa8] sm:$0xff]  ;;  %4208 = vmatpush3.bf16.msra.mxu0 %v4207_v3  ;;  %v4149_v63 = vpack.c.bf16 %v3255_v61, %v3253_v60  ;;  %v3290_v60 = vld [vmem:[#allocation17 + $0x390] sm:$0xff] }
0x20bd   :  { %v4209_v4 = vpack.c.bf16 %v3481_v50, %v3480_v48  ;;  %v3252_v48 = vld [vmem:[#allocation17 + $0x260] sm:$0xff]  ;;  %v3254_v50 = vld [vmem:[#allocation17 + $0x270] sm:$0xff]  ;;  %v3257_v3 = vld [vmem:[#allocation17 + $0x288] sm:$0xff] }
0x20be   :  { %v4151_v7 = vpack.c.bf16 %v3254_v50, %v3252_v48  ;;  %v3293_v61 = vld [vmem:[#allocation17 + $0x3a8] sm:$0xff]  ;;  %v3292_v50 = vld [vmem:[#allocation17 + $0x3a0] sm:$0xff] }
0x20bf   :  { %4108 = vmatpush1.bf16.msra.mxu1 %v4107_v11  ;;  %v3482_v11 = vld [vmem:[%s5792_s16 + $0xb0] sm:$0xff]  ;;  %4210 = vmatprep.subr.bf16.mxu0 %v4209_v4  ;;  %v3259_v4 = vld [vmem:[#allocation17 + $0x298] sm:$0xff] }
0x20c0   :  { %4110 = vmatprep.subr.bf16.mxu1 %v4109_v24  ;;  %v3483_v24 = vld [vmem:[%s5792_s16 + $0xb8] sm:$0xff]  ;;  %4212 = vmatpush3.bf16.msra.mxu0 %v4211_v23  ;;  %v4153_v10 = vpack.c.bf16 %v3259_v4, %v3257_v3  ;;  %v3261_v23 = vld [vmem:[#allocation17 + $0x2a8] sm:$0xff]  ;;  %v3294_v3 = vld [vmem:[#allocation17 + $0x3b0] sm:$0xff] }
0x20c1   :  { %v4213_v27 = vpack.c.bf16 %v3483_v24, %v3482_v11  ;;  %v3256_v11 = vld [vmem:[#allocation17 + $0x280] sm:$0xff]  ;;  %v3258_v24 = vld [vmem:[#allocation17 + $0x290] sm:$0xff]  ;;  %v3297_v4 = vld [vmem:[#allocation17 + $0x3c8] sm:$0xff] }
0x20c2   :  { %v4155_v0 = vpack.c.bf16 %v3258_v24, %v3256_v11  ;;  %v3015_v11 = vsub.s32 2, %v5062_v30 }
0x20c3   :  { %4112 = vmatpush1.bf16.msra.mxu1 %v4111_v52  ;;  %v3484_v52 = vld [vmem:[%s5792_s16 + $0xc0] sm:$0xff]  ;;  %4214 = vmatprep.subr.bf16.mxu0 %v4213_v27  ;;  %v3263_v27 = vld [vmem:[#allocation17 + $0x2b8] sm:$0xff] }
0x20c4   :  { %4114 = vmatprep.subr.bf16.mxu1 %v4113_v32  ;;  %v3485_v32 = vld [vmem:[%s5792_s16 + $0xc8] sm:$0xff]  ;;  %4216 = vmatpush3.bf16.msra.mxu0 %v4215_v6  ;;  %v4157_v12 = vpack.c.bf16 %v3263_v27, %v3261_v23  ;;  %v3296_v23 = vld [vmem:[#allocation17 + $0x3c0] sm:$0xff]  ;;  %v3298_v27 = vld [vmem:[#allocation17 + $0x3d0] sm:$0xff] }
0x20c5   :  { %v4217_v13 = vpack.c.bf16 %v3485_v32, %v3484_v52  ;;  %v3260_v52 = vld [vmem:[#allocation17 + $0x2a0] sm:$0xff]  ;;  %v3262_v32 = vld [vmem:[#allocation17 + $0x2b0] sm:$0xff]  ;;  %v3265_v6 = vld [vmem:[#allocation17 + $0x2c8] sm:$0xff] }
0x20c6   :  { %v4159_v19 = vpack.c.bf16 %v3262_v32, %v3260_v52  ;;  %v4195_v52 = vpack.c.bf16 %v3298_v27, %v3296_v23  ;;  %v3016_v32 = vrot.slane %v5731_v38, %v3015_v11 }
0x20c7   :  { %4116 = vmatpush1.bf16.msra.mxu1 %v4115_v58  ;;  %v3486_v58 = vld [vmem:[%s5792_s16 + $0xd0] sm:$0xff]  ;;  %4218 = vmatprep.subr.bf16.mxu0 %v4217_v13  ;;  %v3267_v13 = vld [vmem:[#allocation17 + $0x2d8] sm:$0xff] }
0x20c8   :  { %4118 = vmatprep.subr.bf16.mxu1 %v4117_v28  ;;  %v3487_v28 = vld [vmem:[%s5792_s16 + $0xd8] sm:$0xff]  ;;  %4220 = vmatpush3.bf16.msra.mxu0 %v4219_v37  ;;  %v4161_v31 = vpack.c.bf16 %v3267_v13, %v3265_v6  ;;  %v3269_v37 = vld [vmem:[#allocation17 + $0x2e8] sm:$0xff]  ;;  %v3300_v13 = vld [vmem:[#allocation17 + $0x3e0] sm:$0xff] }
0x20c9   :  { %v4221_v29 = vpack.c.bf16 %v3487_v28, %v3486_v58  ;;  %v3264_v58 = vld [vmem:[#allocation17 + $0x2c0] sm:$0xff]  ;;  %v3266_v28 = vld [vmem:[#allocation17 + $0x2d0] sm:$0xff] }
0x20ca   :  { %v4163_v34 = vpack.c.bf16 %v3266_v28, %v3264_v58  ;;  %v3472_v28 = vld [vmem:[%s5792_s16 + $0x60] sm:$0xff] }
0x20cb   :  { %4120 = vmatpush1.bf16.msra.mxu1 %v4119_v35  ;;  %v3488_v35 = vld [vmem:[%s5792_s16 + $0xe0] sm:$0xff]  ;;  %4222 = vmatprep.subr.bf16.mxu0 %v4221_v29  ;;  %v3271_v29 = vld [vmem:[#allocation17 + $0x2f8] sm:$0xff] }
0x20cc   :  { %4122 = vmatprep.subr.bf16.mxu1 %v4121_v42  ;;  %v3489_v42 = vld [vmem:[%s5792_s16 + $0xe8] sm:$0xff]  ;;  %4224 = vmatpush3.bf16.msra.mxu0 %v4223_v2  ;;  %v4165_v54 = vpack.c.bf16 %v3271_v29, %v3269_v37  ;;  %v3490_v29 = vld [vmem:[%s5792_s16 + $0xf0] sm:$0xff] }
0x20cd   :  { %v4225_v36 = vpack.c.bf16 %v3489_v42, %v3488_v35  ;;  %v3268_v35 = vld [vmem:[#allocation17 + $0x2e0] sm:$0xff]  ;;  %v3270_v42 = vld [vmem:[#allocation17 + $0x2f0] sm:$0xff]  ;;  %v3273_v2 = vld [vmem:[#allocation17 + $0x308] sm:$0xff] }
0x20ce   :  { %v4167_v15 = vpack.c.bf16 %v3270_v42, %v3268_v35  ;;  %v3475_v35 = vld [vmem:[%s5792_s16 + $0x78] sm:$0xff] }
0x20cf   :  { %4124 = vmatpush1.bf16.msra.mxu1 %v4123_v39  ;;  %4226 = vmatprep.subr.bf16.mxu0 %v4225_v36  ;;  %v3008_v39 = vrot.slane %v5731_v38, %v5068_v33  ;;  %v3275_v36 = vld [vmem:[#allocation17 + $0x318] sm:$0xff] }
0x20d0   :  { %4126 = vmatprep.subr.bf16.mxu1 %v4125_v17  ;;  %v3012_v17 = vrot.slane %v5731_v38, %v5193_v43  ;;  %v3473_v38 = vld [vmem:[%s5792_s16 + $0x68] sm:$0xff] }
0x20d1   :  { %v4227_v37 = vpack.c.bf16 %v3473_v38, %v3472_v28 }
0x20d3   :  { %4128 = vmatpush1.bf16.msra.mxu1 %v4127_v45  ;;  %4228 = vmatpush3.bf16.msra.mxu0 %v4227_v37 }
0x20d4   :  { %4130 = vmatprep.subr.bf16.mxu1 %v4129_v18 }
0x20d7   :  { %4132 = vmatpush1.bf16.msra.mxu1 %v4131_v44 }
0x20d8   :  { %4134 = vmatprep.subr.bf16.mxu1 %v4133_v56  ;;  %v3247_v56 = vld [vmem:[#allocation17 + $0x238] sm:$0xff] }
0x20d9   :  { %v4141_v51 = vpack.c.bf16 %v3247_v56, %v3245_v46  ;;  %v4175_v46 = vpack.c.bf16 %v3278_v41, %v3276_v1  ;;  %v3687_v41 = vld [vmem:[%s5809_s3] ss:$0 sm:$0xff] }
0x20db   :  { %4136 = vmatpush1.bf16.msra.mxu1 %v4135_v59 }
0x20dc   :  { %4138 = vmatprep.subr.bf16.mxu1 %v4137_v53  ;;  %v3246_v53 = vld [vmem:[#allocation17 + $0x230] sm:$0xff] }
0x20dd   :  { %v4143_v55 = vpack.c.bf16 %v3246_v53, %v3244_v25 }
0x2171   :  { %v3096_v9 = vpop.f32.mrb[20].mxu1  ;;  %v5739_v57 = vpop.f32.mrb[38].mxu0 }
0x2172   :  { %v3097_v22 = vadd.f32 %v3096_v9, %v3008_v39  ;;  %v3098_v45 = vpop.f32.mrb[21].mxu1  ;;  %v3169_v18 = vpop.f32.mrb[39].mxu0  ;;  %v4169_v39 = vpack.c.bf16 %v3275_v36, %v3273_v2  ;;  %v3277_v9 = vld [vmem:[#allocation17 + $0x328] sm:$0xff]  ;;  %v3168_v58 = vadd.f32 %v5739_v57, %v3016_v32  ;;  %v3491_v57 = vld [vmem:[%s5792_s16 + $0xf8] sm:$0xff]  ;;  %v3304_v2 = vld [vmem:[%s5791_s15] sm:$0x3] }
0x2173   :  { %v3099_v44 = vadd.f32 %v3098_v45, %v3012_v17  ;;  %v3170_v14 = vadd.f32 %v3169_v18, %v3020_v40  ;;  %v3272_v17 = vld [vmem:[#allocation17 + $0x300] sm:$0xff]  ;;  %v3274_v40 = vld [vmem:[#allocation17 + $0x310] sm:$0xff]  ;;  %v3309_v36 = vrot.slane %v3304_v2, %v5068_v33 }
0x2174   :  { %v3172_v59 = vmax.f32 %v3097_v22, 0.0  ;;  %v3279_v22 = vld [vmem:[#allocation17 + $0x338] sm:$0xff]  ;;  %v4171_v45 = vpack.c.bf16 %v3274_v40, %v3272_v17  ;;  %v3174_v30 = vmax.f32 %v3168_v58, 0.0 }
0x2175   :  { %v3173_v47 = vmax.f32 %v3099_v44, 0.0  ;;  %v3175_v5 = vmax.f32 %v3170_v14, 0.0  ;;  %v4173_v18 = vpack.c.bf16 %v3279_v22, %v3277_v9  ;;  %v3281_v44 = vld [vmem:[#allocation17 + $0x348] sm:$0xff]  ;;  %v3283_v14 = vld [vmem:[#allocation17 + $0x358] sm:$0xff] }
0x2176   :  { %v4177_v56 = vpack.c.bf16 %v3283_v14, %v3281_v44 }
0x2177   :  { %3380 = vmatprep.mubr.f32.mxu1 %v3173_v47  ;;  %v3280_v47 = vld [vmem:[#allocation17 + $0x340] sm:$0xff] }
0x2178   :  { %3381 = vmatmul.mubr.f32.vlgmr.msra.gmra.mrb[22].mxu1 %v3172_v59  ;;  %v3285_v59 = vld [vmem:[#allocation17 + $0x368] sm:$0xff] }
0x2179   :  { %4140 = vmatpush1.bf16.msra.mxu1 %v4139_v49  ;;  %3451 = vmatprep.mubr.f32.mxu1 %v3175_v5  ;;  %v3282_v49 = vld [vmem:[#allocation17 + $0x350] sm:$0xff]  ;;  %v3284_v5 = vld [vmem:[#allocation17 + $0x360] sm:$0xff] }
0x217a   :  { %4142 = vmatprep.subr.bf16.mxu1 %v4141_v51  ;;  %v3287_v51 = vld [vmem:[#allocation17 + $0x378] sm:$0xff]  ;;  %v4179_v25 = vpack.c.bf16 %v3282_v49, %v3280_v47 }
0x217b   :  { %v4181_v53 = vpack.c.bf16 %v3287_v51, %v3285_v59 }
0x217d   :  { %4144 = vmatpush1.bf16.msra.mxu1 %v4143_v55  ;;  %v3291_v55 = vld [vmem:[#allocation17 + $0x398] sm:$0xff] }
0x217e   :  { %4146 = vmatprep.subr.bf16.mxu1 %v4145_v8  ;;  %v4183_v8 = vpack.c.bf16 %v3286_v20, %v3284_v5  ;;  %v4185_v26 = vpack.c.bf16 %v3291_v55, %v3289_v21 }
0x2181   :  { %4148 = vmatpush1.bf16.msra.mxu1 %v4147_v62  ;;  %v3295_v62 = vld [vmem:[#allocation17 + $0x3b8] sm:$0xff] }
0x2182   :  { %4150 = vmatprep.subr.bf16.mxu1 %v4149_v63  ;;  %v4187_v63 = vpack.c.bf16 %v3290_v60, %v3288_v16  ;;  %v4189_v48 = vpack.c.bf16 %v3295_v62, %v3293_v61 }
0x2185   :  { %4152 = vmatpush1.bf16.msra.mxu1 %v4151_v7  ;;  %v3299_v7 = vld [vmem:[#allocation17 + $0x3d8] sm:$0xff] }
0x2186   :  { %4154 = vmatprep.subr.bf16.mxu1 %v4153_v10  ;;  %v4191_v10 = vpack.c.bf16 %v3294_v3, %v3292_v50  ;;  %v4193_v24 = vpack.c.bf16 %v3299_v7, %v3297_v4 }
0x2189   :  { %4156 = vmatpush1.bf16.msra.mxu1 %v4155_v0  ;;  %v3301_v0 = vld [vmem:[#allocation17 + $0x3e8] sm:$0xff] }
0x218a   :  { %4158 = vmatprep.subr.bf16.mxu1 %v4157_v12  ;;  %v3303_v12 = vld [vmem:[#allocation17 + $0x3f8] sm:$0xff] }
0x218b   :  { %v4197_v6 = vpack.c.bf16 %v3303_v12, %v3301_v0 }
0x218d   :  { %4160 = vmatpush1.bf16.msra.mxu1 %v4159_v19  ;;  %v3302_v19 = vld [vmem:[#allocation17 + $0x3f0] sm:$0xff] }
0x218e   :  { %4162 = vmatprep.subr.bf16.mxu1 %v4161_v31  ;;  %v4199_v31 = vpack.c.bf16 %v3302_v19, %v3300_v13 }
0x2191   :  { %4164 = vmatpush1.bf16.msra.mxu1 %v4163_v34  ;;  %v4229_v34 = vpack.c.bf16 %v3491_v57, %v3490_v29 }
0x2192   :  { %4166 = vmatprep.subr.bf16.mxu1 %v4165_v54  ;;  %v3474_v54 = vld [vmem:[%s5792_s16 + $0x70] sm:$0xff] }
0x2193   :  { %v4231_v42 = vpack.c.bf16 %v3475_v35, %v3474_v54  ;;  %4230 = vmatprep.subr.bf16.mxu0 %v4229_v34 }
0x2195   :  { %4168 = vmatpush1.bf16.msra.mxu1 %v4167_v15  ;;  %4232 = vmatpush3.bf16.msra.mxu0 %v4231_v42  ;;  %v3313_v15 = vrot.slane %v3304_v2, %v5193_v43 }
0x2196   :  { %4170 = vmatprep.subr.bf16.mxu1 %v4169_v39 }
0x2199   :  { %4172 = vmatpush1.bf16.msra.mxu1 %v4171_v45 }
0x219a   :  { %4174 = vmatprep.subr.bf16.mxu1 %v4173_v18 }
0x219d   :  { %4176 = vmatpush1.bf16.msra.mxu1 %v4175_v46 }
0x219e   :  { %4178 = vmatprep.subr.bf16.mxu1 %v4177_v56 }
0x21a1   :  { %4180 = vmatpush1.bf16.msra.mxu1 %v4179_v25 }
0x21a2   :  { %4182 = vmatprep.subr.bf16.mxu1 %v4181_v53 }
0x21a5   :  { %4184 = vmatpush1.bf16.msra.mxu1 %v4183_v8 }
0x21a6   :  { %4186 = vmatprep.subr.bf16.mxu1 %v4185_v26 }
0x21a9   :  { %4188 = vmatpush1.bf16.msra.mxu1 %v4187_v63 }
0x21aa   :  { %4190 = vmatprep.subr.bf16.mxu1 %v4189_v48 }
0x21ad   :  { %4192 = vmatpush1.bf16.msra.mxu1 %v4191_v10 }
0x21ae   :  { %4194 = vmatprep.subr.bf16.mxu1 %v4193_v24 }
0x21b1   :  { %4196 = vmatpush1.bf16.msra.mxu1 %v4195_v52 }
0x21b2   :  { %4198 = vmatprep.subr.bf16.mxu1 %v4197_v6 }
0x21b5   :  { %4200 = vmatpush1.bf16.msra.mxu1 %v4199_v31 }
0x21b8   :  { %3452 = vmatmul.mubr.f32.vlgmr.msra.gmra.mrb[22].mxu1 %v3174_v30 }
0x228b   :  { %v3453_v39 = vpop.f32.mrb[22].mxu1 }
0x228c   :  { %v4283_v17 = vadd.f32 %v3453_v39, %v3309_v36  ;;  %v3455_v40 = vpop.f32.mrb[23].mxu1 }
0x228d   :  { %v4284_v9 = vadd.f32 %v3455_v40, %v3313_v15 }
0x228e   :  { %v3458_v45 = vmax.f32 %v4283_v17, 0.0 }
0x228f   :  { %v3459_v22 = vmax.f32 %v4284_v9, 0.0 }
0x2291   :  { %3563 = vmatprep.mubr.f32.mxu0 %v3459_v22 }
0x2292   :  { %3564 = vmatmul.mubr.f32.vlgmr.msra.gmra.mrb[40].mxu0 %v3458_v45 }
0x2365   :  { %v3720_v18 = vpop.f32.mrb[40].mxu0 }
0x2366   :  { %v3721_v1 = vpop.f32.mrb[41].mxu0 }
0x2367   :  { %v3722_v44 = vadd.f32 %v3721_v1, %v3720_v18 }
0x2369   :  { %v3566_v14 = vadd.f32 %v3722_v44, %v3687_v41 }
0x236b   :  { %v3570_v33 = vsel %vm3569_vm7, %v3566_v14, -inf }
0x236c   :  { %3571 = vmax.xlane.f32.xlu0 %v3570_v33 }
0x23f9   :  { %v3572_v43 = vpop.xlane.xlu0 %3571 }
0x23fa   :  { %v3573_v46 = vsub.f32 %v3566_v14, %v3572_v43 }
0x23fc   :  { %v3574_v56 = vmul.f32 1.442695, %v3573_v46 }
0x23fe   :  { %4545 = vpow2.f32 %v3574_v56 }
0x2408   :  { %v4546_v47 = vpop.eup %4545 }
0x2409   :  { %v3576_v49 = vsel %vm3569_vm7, %v4546_v47, 0.0 }
0x240a   :  { %3577 = vadd.xlane.f32.xlu1 %v3576_v49 }
0x2497   :  { %v3578_v59 = vpop.xlane.xlu1 %3577 }
0x2498   :  { %4547 = vlog2.f32 %v3578_v59 }
0x24a2   :  { %v4548_v51 = vpop.eup %4547 }
0x24a3   :  { %v3580_v25 = vmul.f32 0.6931472, %v4548_v51 }
0x24a5   :  { %v3581_v53 = vsub.f32 %v3573_v46, %v3580_v25 }
0x24a7   :  { %3582 = vst.msk [vmem:[%s5810_s27] sm:$0xff] %vm3569_vm7, %v3581_v53 }
0x24a8   :  { %3587 = vsyncpa [#allocation7], 1 }
0x24a9   :  { %3588 = vsyncpa [#allocation9], 1 }
0x24aa   :  { %3589 = vsyncpa [#allocation12], 1 }
0x24ab   :  { %3590 = vsyncpa [#allocation15], 1 }
0x24ac   :  { %3591 = vsyncpa [#allocation18], 1 }

</bundles_post_ra>
